<compile_context>
chip_gen: v5e
topology: v5e:2x2
jax: 0.10.0
libtpu: 0.0.40
codegen_flags: <defaults>
</compile_context>

<pallas_src>
import jax
import jax.numpy as jnp
from jax import lax
from jax.experimental import pallas as pl
from jax.experimental.pallas import tpu as pltpu


# ------------------------------ fused kernel --------------------------------
def _make_fused_kernel(num_layers, S, B, E, H, C):
    H2, H4, H6, H8 = 2 * H, 4 * H, 6 * H, 8 * H

    def kernel(*refs):
        # refs layout:
        #   [0]                 x_ref (S, B, E)          time-major input
        #   per layer (3 refs): wihT (In, 8H), whhT (2H, 8H), b (1, 8H)
        #                       (direction-fused, gate-major permuted columns)
        #   then:               w (1, 2H), fc1T (2H, H), fc1b (1, H),
        #                       fcT (H, C), fcb (1, C)
        #   output:             out_ref (B, C)
        x_ref = refs[0]
        pos = 1
        layers = []
        for _ in range(num_layers):
            layers.append(refs[pos:pos + 3])
            pos += 3
        w_ref, fc1T_ref, fc1b_ref, fcT_ref, fcb_ref = refs[pos:pos + 5]
        out_ref = refs[pos + 5]

        # Static lane masks (2-D iota required on TPU).
        col8 = lax.broadcasted_iota(jnp.int32, (1, H8), 1)
        fwd_col_mask = (col8 % H2) < H          # fwd-direction gate columns
        lane2 = lax.broadcasted_iota(jnp.int32, (1, H2), 1)
        fwd_lane_mask = lane2 < H               # fwd half of the (B, 2H) state

        O = None
        cur = x_ref[...].reshape(S * B, E)      # layer-0 input (time-major, flat)
        for l in range(num_layers):
            wihT_ref, whhT_ref, b_ref = layers[l]

            # One big MXU matmul per layer for all input projections (both
            # directions, all timesteps) outside the serial recurrence.
            xp = (jnp.dot(cur, wihT_ref[...],
                          preferred_element_type=jnp.float32)
                  + b_ref[...]).reshape(S, B, H8)
            # fwd columns use x_t, bwd columns use x_{S-1-t}: one static select
            # per step, done with values (no per-step DMA / relayout).
            xp_steps = [jnp.where(fwd_col_mask, xp[t], xp[S - 1 - t])
                        for t in range(S)]

            whh = whhT_ref[...]                 # (2H, 8H) block-diag, permuted
            h = jnp.zeros((B, H2), jnp.float32)  # [h_fwd | h_bwd]
            c = jnp.zeros((B, H2), jnp.float32)
            hs = []
            # S is small & static: fully unrolled; one fused MXU dot per step.
            for t in range(S):
                gates = xp_steps[t] + jnp.dot(
                    h, whh, preferred_element_type=jnp.float32)   # (B, 8H)
                sg = jax.nn.sigmoid(gates[:, :H6])   # i,f,o (both directions)
                g = jnp.tanh(gates[:, H6:])          # g     (both directions)
                i = sg[:, :H2]
                f = sg[:, H2:H4]
                o = sg[:, H4:H6]
                c = f * c + i * g
                h = o * jnp.tanh(c)
                hs.append(h)                  # [h_f(time t) | h_b(time S-1-t)]

            # Layer output O[t] = [h_f(t) | h_b(t)]: assembled once with a
            # static lane-mask select + stack (no masked per-step stores).
            O = jnp.stack([jnp.where(fwd_lane_mask, hs[t], hs[S - 1 - t])
                           for t in range(S)])       # (S, B, 2H)
            cur = O.reshape(S * B, H2)               # next layer's input

        # ------------- tanh attention over time + classifier -----------------
        wv = w_ref[...]                                       # (1, 2H)
        scores = jnp.sum(jnp.tanh(O) * wv, axis=-1, keepdims=True)   # (S, B, 1)
        m = jnp.max(scores, axis=0, keepdims=True)            # softmax over time
        e = jnp.exp(scores - m)
        alpha = e / jnp.sum(e, axis=0, keepdims=True)         # (S, B, 1)
        ctx = jnp.sum(O * alpha, axis=0)                      # (B, 2H)
        r = jnp.maximum(ctx, 0.0)                             # relu
        h1 = (jnp.dot(r, fc1T_ref[...], preferred_element_type=jnp.float32)
              + fc1b_ref[...])
        out_ref[...] = (jnp.dot(h1, fcT_ref[...],
                                preferred_element_type=jnp.float32)
                        + fcb_ref[...])

    return kernel


# ------------------------- host-side weight preparation ----------------------
def _permute_gate_cols(wt_f, wt_b, H):
    """Reorder last-dim gate blocks from PyTorch [i, f, g, o] per direction into
    the fused, gate-major layout [i_f i_b | f_f f_b | o_f o_b | g_f g_b]."""
    def blk(w, k):
        return w[..., k * H:(k + 1) * H]
    # PyTorch gate order: i=0, f=1, g=2, o=3  (g goes last in the fused layout)
    return jnp.concatenate(
        [blk(wt_f, 0), blk(wt_b, 0),
         blk(wt_f, 1), blk(wt_b, 1),
         blk(wt_f, 3), blk(wt_b, 3),
         blk(wt_f, 2), blk(wt_b, 2)], axis=-1)


def prepare_kernel_params(params):
    """One-time host-side prep: transpose, fuse directions, permute gate
    columns, fold biases.  Keeps the per-call forward path free of re-layouts."""
    H = params["fc1_w"].shape[0]
    C = params["fc_w"].shape[0]
    layers = []
    for layer in params["lstm"]:
        w_ih_f, w_hh_f, b_ih_f, b_hh_f = layer["fwd"]
        w_ih_b, w_hh_b, b_ih_b, b_hh_b = layer["bwd"]
        wihT_f = jnp.transpose(w_ih_f).astype(jnp.float32)        # (In, 4H)
        wihT_b = jnp.transpose(w_ih_b).astype(jnp.float32)
        wihT = _permute_gate_cols(wihT_f, wihT_b, H)              # (In, 8H)
        whhT_f = jnp.transpose(w_hh_f).astype(jnp.float32)        # (H, 4H)
        whhT_b = jnp.transpose(w_hh_b).astype(jnp.float32)
        z = jnp.zeros_like(whhT_f)
        whhT = jnp.concatenate(                                   # (2H, 8H)
            [_permute_gate_cols(whhT_f, z, H),
             _permute_gate_cols(z, whhT_b, H)], axis=0)
        b_f = (b_ih_f + b_hh_f).reshape(1, 4 * H).astype(jnp.float32)
        b_b = (b_ih_b + b_hh_b).reshape(1, 4 * H).astype(jnp.float32)
        b = _permute_gate_cols(b_f, b_b, H)                       # (1, 8H)
        layers.append((wihT, whhT, b))
    return {
        "layers": layers,
        "w": params["w"].reshape(1, 2 * H).astype(jnp.float32),
        "fc1T": jnp.transpose(params["fc1_w"]).astype(jnp.float32),  # (2H, H)
        "fc1b": params["fc1_b"].reshape(1, H).astype(jnp.float32),
        "fcT": jnp.transpose(params["fc_w"]).astype(jnp.float32),    # (H, C)
        "fcb": params["fc_b"].reshape(1, C).astype(jnp.float32),
    }


def fused_forward(emb_sbe, kp):
    """Whole post-embedding forward in a single pallas_call."""
    S, B, E = emb_sbe.shape
    layers = kp["layers"]
    num_layers = len(layers)
    H = kp["fc1T"].shape[1]
    C = kp["fcT"].shape[1]

    args = [emb_sbe.astype(jnp.float32)]
    for (wihT, whhT, b) in layers:
        args += [wihT, whhT, b]
    args += [kp["w"], kp["fc1T"], kp["fc1b"], kp["fcT"], kp["fcb"]]

    kernel = _make_fused_kernel(num_layers, S, B, E, H, C)
    return pl.pallas_call(
        kernel,
        out_shape=jax.ShapeDtypeStruct((B, C), jnp.float32),
        in_specs=[pl.BlockSpec(memory_space=pltpu.MemorySpace.VMEM)] * len(args),
        out_specs=pl.BlockSpec(memory_space=pltpu.MemorySpace.VMEM),
    )(*args)


# ------------------------------ parameters ----------------------------------
def init_params(key, n_vocab, embed, hidden, num_layers, num_classes):
    keys = list(jax.random.split(key, 64))
    it = iter(keys)

    def rand(shape):
        return jax.random.normal(next(it), shape, jnp.float32) * 0.1

    emb = rand((n_vocab, embed)).at[0].set(0.0)   # padding_idx=0 -> zero row
    lstm_layers = []
    in_size = embed
    for _ in range(num_layers):
        layer = {}
        for dname in ("fwd", "bwd"):
            layer[dname] = (rand((4 * hidden, in_size)),   # weight_ih
                            rand((4 * hidden, hidden)),    # weight_hh
                            rand((4 * hidden,)),           # bias_ih
                            rand((4 * hidden,)))           # bias_hh
        lstm_layers.append(layer)
        in_size = 2 * hidden
    return {
        "embedding": emb,
        "lstm": lstm_layers,
        "w": rand((2 * hidden,)),
        "fc1_w": rand((hidden, 2 * hidden)),
        "fc1_b": rand((hidden,)),
        "fc_w": rand((num_classes, hidden)),
        "fc_b": rand((num_classes,)),
    }


# ----------------------------- reference path --------------------------------
def _ref_lstm_dir(x_sbe, w_ih, w_hh, b_ih, b_hh):
    H = w_hh.shape[1]
    B = x_sbe.shape[1]

    def step(carry, x_t):
        h, c = carry
        gates = x_t @ w_ih.T + b_ih + h @ w_hh.T + b_hh
        i = jax.nn.sigmoid(gates[:, :H])
        f = jax.nn.sigmoid(gates[:, H:2 * H])
        g = jnp.tanh(gates[:, 2 * H:3 * H])
        o = jax.nn.sigmoid(gates[:, 3 * H:])
        c = f * c + i * g
        h = o * jnp.tanh(c)
        return (h, c), h

    init = (jnp.zeros((B, H), jnp.float32), jnp.zeros((B, H), jnp.float32))
    _, hs = lax.scan(step, init, x_sbe)
    return hs


def model_forward_ref(params, ids):
    x = params["embedding"][ids]                       # (B, S, E)
    for layer in params["lstm"]:
        x_t = jnp.transpose(x, (1, 0, 2))
        o_f = _ref_lstm_dir(x_t, *layer["fwd"])
        o_b = _ref_lstm_dir(x_t[::-1], *layer["bwd"])[::-1]
        x = jnp.transpose(jnp.concatenate([o_f, o_b], axis=-1), (1, 0, 2))
    O = x
    M = jnp.tanh(O)
    alpha = jax.nn.softmax(M @ params["w"], axis=1)[..., None]
    ctx = jnp.sum(O * alpha, axis=1)
    h = jax.nn.relu(ctx)
    h1 = h @ params["fc1_w"].T + params["fc1_b"]
    return h1 @ params["fc_w"].T + params["fc_b"]


def model_forward_pallas(kernel_params, embedding, ids):
    emb = embedding[ids]                               # (B, S, E) gather (glue)
    x_t = jnp.transpose(emb, (1, 0, 2))                # time-major (S, B, E)
    return fused_forward(x_t, kernel_params)


# --------------------------------- main --------------------------------------
if __name__ == "__main__":
    n_vocab, embed, hidden, num_layers, num_classes = 32, 16, 32, 2, 4
    B, S = 2, 8

    key = jax.random.PRNGKey(0)
    k_param, k_ids = jax.random.split(key)
    params = init_params(k_param, n_vocab, embed, hidden, num_layers, num_classes)

    # One-time host-side weight re-layout (not repeated per forward call).
    kparams = jax.tree_util.tree_map(lambda a: a, prepare_kernel_params(params))

    ids = jax.random.randint(k_ids, (B, S), 0, n_vocab, dtype=jnp.int32)
    x = (ids, jnp.full((B,), S, jnp.int32))            # module's forward uses x[0]

    fwd = jax.jit(model_forward_pallas)
    out = jax.block_until_ready(fwd(kparams, params["embedding"], x[0]))

    ref = model_forward_ref(params, x[0])
    assert out.shape == (B, num_classes)
    assert jnp.allclose(out, ref, atol=1e-3, rtol=1e-3), (out, ref)
    print("KERNEL_OK")
</pallas_src>

<mosaic_0001>
module attributes {stable_mosaic.version = 11 : i64} {
  func.func @kernel(%arg0: memref<8x2x16xf32, #tpu.memory_space<vmem>>, %arg1: memref<16x256xf32, #tpu.memory_space<vmem>>, %arg2: memref<64x256xf32, #tpu.memory_space<vmem>>, %arg3: memref<1x256xf32, #tpu.memory_space<vmem>>, %arg4: memref<64x256xf32, #tpu.memory_space<vmem>>, %arg5: memref<64x256xf32, #tpu.memory_space<vmem>>, %arg6: memref<1x256xf32, #tpu.memory_space<vmem>>, %arg7: memref<1x64xf32, #tpu.memory_space<vmem>>, %arg8: memref<64x32xf32, #tpu.memory_space<vmem>>, %arg9: memref<1x32xf32, #tpu.memory_space<vmem>>, %arg10: memref<32x4xf32, #tpu.memory_space<vmem>>, %arg11: memref<1x4xf32, #tpu.memory_space<vmem>>, %arg12: memref<2x4xf32, #tpu.memory_space<vmem>>) attributes {dimension_semantics = [], scalar_prefetch = 0 : i64, scratch_operands = 0 : i64, tpu.core_type = #tpu.core_type<tc>} {
    %0 = tpu.iota {dimensions = array<i32: 1>} : vector<1x256xi32>
    %c64_i32 = arith.constant 64 : i32
    %c0_i32 = arith.constant 0 : i32
    %1 = arith.cmpi eq, %c64_i32, %c0_i32 : i32
    %c1_i32 = arith.constant 1 : i32
    %2 = arith.select %1, %c1_i32, %c64_i32 : i32
    %3 = vector.broadcast %2 : i32 to vector<1x256xi32>
    %4 = arith.remsi %0, %3 : vector<1x256xi32>
    %c0_i32_0 = arith.constant 0 : i32
    %5 = vector.broadcast %c0_i32_0 : i32 to vector<1x256xi32>
    %6 = arith.cmpi ne, %4, %5 : vector<1x256xi32>
    %c0_i32_1 = arith.constant 0 : i32
    %7 = vector.broadcast %c0_i32_1 : i32 to vector<1x256xi32>
    %8 = arith.cmpi slt, %4, %7 : vector<1x256xi32>
    %c0_i32_2 = arith.constant 0 : i32
    %9 = arith.cmpi slt, %2, %c0_i32_2 : i32
    %10 = vector.broadcast %9 : i1 to vector<1x256xi1>
    %11 = vector.broadcast %10 : vector<1x256xi1> to vector<1x256xi1>
    %12 = arith.xori %8, %11 : vector<1x256xi1>
    %13 = arith.andi %12, %6 : vector<1x256xi1>
    %14 = vector.broadcast %2 : i32 to vector<1x256xi32>
    %15 = arith.addi %4, %14 : vector<1x256xi32>
    %16 = arith.select %13, %15, %4 : vector<1x256xi1>, vector<1x256xi32>
    %c32_i32 = arith.constant 32 : i32
    %17 = vector.broadcast %c32_i32 : i32 to vector<1x256xi32>
    %18 = arith.cmpi slt, %16, %17 : vector<1x256xi32>
    %19 = tpu.iota {dimensions = array<i32: 1>} : vector<1x64xi32>
    %c32_i32_3 = arith.constant 32 : i32
    %20 = vector.broadcast %c32_i32_3 : i32 to vector<1x64xi32>
    %21 = arith.cmpi slt, %19, %20 : vector<1x64xi32>
    %c0 = arith.constant 0 : index
    %c0_4 = arith.constant 0 : index
    %c0_5 = arith.constant 0 : index
    %22 = vector.load %arg0[%c0, %c0_4, %c0_5] : memref<8x2x16xf32, #tpu.memory_space<vmem>>, vector<8x2x16xf32>
    %23 = vector.shape_cast %22 : vector<8x2x16xf32> to vector<16x16xf32>
    %c0_6 = arith.constant 0 : index
    %c0_7 = arith.constant 0 : index
    %24 = vector.load %arg1[%c0_6, %c0_7] : memref<16x256xf32, #tpu.memory_space<vmem>>, vector<16x256xf32>
    %cst = arith.constant dense<0.000000e+00> : vector<16x256xf32>
    %25 = tpu.matmul %23, %24, %cst {dimension_numbers = #tpu.dot_dimension_numbers<[1], [0], [0], [1], [0, 0, 1, 1], [], []>} : vector<16x16xf32>, vector<16x256xf32>, vector<16x256xf32> -> vector<16x256xf32>
    %c0_8 = arith.constant 0 : index
    %c0_9 = arith.constant 0 : index
    %26 = vector.load %arg3[%c0_8, %c0_9] : memref<1x256xf32, #tpu.memory_space<vmem>>, vector<1x256xf32>
    %27 = vector.broadcast %26 : vector<1x256xf32> to vector<16x256xf32>
    %28 = arith.addf %25, %27 : vector<16x256xf32>
    %29 = vector.shape_cast %28 : vector<16x256xf32> to vector<8x2x256xf32>
    %30 = vector.extract_strided_slice %29 {offsets = [0, 0, 0], sizes = [1, 2, 256], strides = [1, 1, 1]} : vector<8x2x256xf32> to vector<1x2x256xf32>
    %31 = vector.shape_cast %30 : vector<1x2x256xf32> to vector<2x256xf32>
    %32 = vector.extract_strided_slice %29 {offsets = [7, 0, 0], sizes = [1, 2, 256], strides = [1, 1, 1]} : vector<8x2x256xf32> to vector<1x2x256xf32>
    %33 = vector.shape_cast %32 : vector<1x2x256xf32> to vector<2x256xf32>
    %34 = vector.shape_cast %18 : vector<1x256xi1> to vector<1x256xi1>
    %35 = vector.broadcast %34 : vector<1x256xi1> to vector<2x256xi1>
    %36 = arith.select %35, %31, %33 : vector<2x256xi1>, vector<2x256xf32>
    %37 = vector.extract_strided_slice %29 {offsets = [1, 0, 0], sizes = [1, 2, 256], strides = [1, 1, 1]} : vector<8x2x256xf32> to vector<1x2x256xf32>
    %38 = vector.shape_cast %37 : vector<1x2x256xf32> to vector<2x256xf32>
    %39 = vector.extract_strided_slice %29 {offsets = [6, 0, 0], sizes = [1, 2, 256], strides = [1, 1, 1]} : vector<8x2x256xf32> to vector<1x2x256xf32>
    %40 = vector.shape_cast %39 : vector<1x2x256xf32> to vector<2x256xf32>
    %41 = vector.shape_cast %18 : vector<1x256xi1> to vector<1x256xi1>
    %42 = vector.broadcast %41 : vector<1x256xi1> to vector<2x256xi1>
    %43 = arith.select %42, %38, %40 : vector<2x256xi1>, vector<2x256xf32>
    %44 = vector.extract_strided_slice %29 {offsets = [2, 0, 0], sizes = [1, 2, 256], strides = [1, 1, 1]} : vector<8x2x256xf32> to vector<1x2x256xf32>
    %45 = vector.shape_cast %44 : vector<1x2x256xf32> to vector<2x256xf32>
    %46 = vector.extract_strided_slice %29 {offsets = [5, 0, 0], sizes = [1, 2, 256], strides = [1, 1, 1]} : vector<8x2x256xf32> to vector<1x2x256xf32>
    %47 = vector.shape_cast %46 : vector<1x2x256xf32> to vector<2x256xf32>
    %48 = vector.shape_cast %18 : vector<1x256xi1> to vector<1x256xi1>
    %49 = vector.broadcast %48 : vector<1x256xi1> to vector<2x256xi1>
    %50 = arith.select %49, %45, %47 : vector<2x256xi1>, vector<2x256xf32>
    %51 = vector.extract_strided_slice %29 {offsets = [3, 0, 0], sizes = [1, 2, 256], strides = [1, 1, 1]} : vector<8x2x256xf32> to vector<1x2x256xf32>
    %52 = vector.shape_cast %51 : vector<1x2x256xf32> to vector<2x256xf32>
    %53 = vector.extract_strided_slice %29 {offsets = [4, 0, 0], sizes = [1, 2, 256], strides = [1, 1, 1]} : vector<8x2x256xf32> to vector<1x2x256xf32>
    %54 = vector.shape_cast %53 : vector<1x2x256xf32> to vector<2x256xf32>
    %55 = vector.shape_cast %18 : vector<1x256xi1> to vector<1x256xi1>
    %56 = vector.broadcast %55 : vector<1x256xi1> to vector<2x256xi1>
    %57 = arith.select %56, %52, %54 : vector<2x256xi1>, vector<2x256xf32>
    %58 = vector.extract_strided_slice %29 {offsets = [4, 0, 0], sizes = [1, 2, 256], strides = [1, 1, 1]} : vector<8x2x256xf32> to vector<1x2x256xf32>
    %59 = vector.shape_cast %58 : vector<1x2x256xf32> to vector<2x256xf32>
    %60 = vector.extract_strided_slice %29 {offsets = [3, 0, 0], sizes = [1, 2, 256], strides = [1, 1, 1]} : vector<8x2x256xf32> to vector<1x2x256xf32>
    %61 = vector.shape_cast %60 : vector<1x2x256xf32> to vector<2x256xf32>
    %62 = vector.shape_cast %18 : vector<1x256xi1> to vector<1x256xi1>
    %63 = vector.broadcast %62 : vector<1x256xi1> to vector<2x256xi1>
    %64 = arith.select %63, %59, %61 : vector<2x256xi1>, vector<2x256xf32>
    %65 = vector.extract_strided_slice %29 {offsets = [5, 0, 0], sizes = [1, 2, 256], strides = [1, 1, 1]} : vector<8x2x256xf32> to vector<1x2x256xf32>
    %66 = vector.shape_cast %65 : vector<1x2x256xf32> to vector<2x256xf32>
    %67 = vector.extract_strided_slice %29 {offsets = [2, 0, 0], sizes = [1, 2, 256], strides = [1, 1, 1]} : vector<8x2x256xf32> to vector<1x2x256xf32>
    %68 = vector.shape_cast %67 : vector<1x2x256xf32> to vector<2x256xf32>
    %69 = vector.shape_cast %18 : vector<1x256xi1> to vector<1x256xi1>
    %70 = vector.broadcast %69 : vector<1x256xi1> to vector<2x256xi1>
    %71 = arith.select %70, %66, %68 : vector<2x256xi1>, vector<2x256xf32>
    %72 = vector.extract_strided_slice %29 {offsets = [6, 0, 0], sizes = [1, 2, 256], strides = [1, 1, 1]} : vector<8x2x256xf32> to vector<1x2x256xf32>
    %73 = vector.shape_cast %72 : vector<1x2x256xf32> to vector<2x256xf32>
    %74 = vector.extract_strided_slice %29 {offsets = [1, 0, 0], sizes = [1, 2, 256], strides = [1, 1, 1]} : vector<8x2x256xf32> to vector<1x2x256xf32>
    %75 = vector.shape_cast %74 : vector<1x2x256xf32> to vector<2x256xf32>
    %76 = vector.shape_cast %18 : vector<1x256xi1> to vector<1x256xi1>
    %77 = vector.broadcast %76 : vector<1x256xi1> to vector<2x256xi1>
    %78 = arith.select %77, %73, %75 : vector<2x256xi1>, vector<2x256xf32>
    %79 = vector.extract_strided_slice %29 {offsets = [7, 0, 0], sizes = [1, 2, 256], strides = [1, 1, 1]} : vector<8x2x256xf32> to vector<1x2x256xf32>
    %80 = vector.shape_cast %79 : vector<1x2x256xf32> to vector<2x256xf32>
    %81 = vector.extract_strided_slice %29 {offsets = [0, 0, 0], sizes = [1, 2, 256], strides = [1, 1, 1]} : vector<8x2x256xf32> to vector<1x2x256xf32>
    %82 = vector.shape_cast %81 : vector<1x2x256xf32> to vector<2x256xf32>
    %83 = vector.shape_cast %18 : vector<1x256xi1> to vector<1x256xi1>
    %84 = vector.broadcast %83 : vector<1x256xi1> to vector<2x256xi1>
    %85 = arith.select %84, %80, %82 : vector<2x256xi1>, vector<2x256xf32>
    %c0_10 = arith.constant 0 : index
    %c0_11 = arith.constant 0 : index
    %86 = vector.load %arg2[%c0_10, %c0_11] : memref<64x256xf32, #tpu.memory_space<vmem>>, vector<64x256xf32>
    %cst_12 = arith.constant 0.000000e+00 : f32
    %87 = vector.broadcast %cst_12 : f32 to vector<2x64xf32>
    %cst_13 = arith.constant 0.000000e+00 : f32
    %88 = vector.broadcast %cst_13 : f32 to vector<2x64xf32>
    %cst_14 = arith.constant dense<0.000000e+00> : vector<2x256xf32>
    %89 = tpu.matmul %87, %86, %cst_14 {dimension_numbers = #tpu.dot_dimension_numbers<[1], [0], [0], [1], [0, 0, 1, 1], [], []>} : vector<2x64xf32>, vector<64x256xf32>, vector<2x256xf32> -> vector<2x256xf32>
    %90 = arith.addf %36, %89 : vector<2x256xf32>
    %91 = vector.extract_strided_slice %90 {offsets = [0, 0], sizes = [2, 192], strides = [1, 1]} : vector<2x256xf32> to vector<2x192xf32>
    %92 = arith.negf %91 : vector<2x192xf32>
    %93 = math.exp %92 : vector<2x192xf32>
    %cst_15 = arith.constant 1.000000e+00 : f32
    %94 = vector.broadcast %cst_15 : f32 to vector<2x192xf32>
    %95 = arith.addf %94, %93 : vector<2x192xf32>
    %96 = arith.divf %94, %95 : vector<2x192xf32>
    %97 = vector.extract_strided_slice %90 {offsets = [0, 192], sizes = [2, 64], strides = [1, 1]} : vector<2x256xf32> to vector<2x64xf32>
    %98 = math.tanh %97 : vector<2x64xf32>
    %99 = vector.extract_strided_slice %96 {offsets = [0, 0], sizes = [2, 64], strides = [1, 1]} : vector<2x192xf32> to vector<2x64xf32>
    %100 = vector.extract_strided_slice %96 {offsets = [0, 64], sizes = [2, 64], strides = [1, 1]} : vector<2x192xf32> to vector<2x64xf32>
    %101 = vector.extract_strided_slice %96 {offsets = [0, 128], sizes = [2, 64], strides = [1, 1]} : vector<2x192xf32> to vector<2x64xf32>
    %102 = arith.mulf %100, %88 : vector<2x64xf32>
    %103 = arith.mulf %99, %98 : vector<2x64xf32>
    %104 = arith.addf %102, %103 : vector<2x64xf32>
    %105 = math.tanh %104 : vector<2x64xf32>
    %106 = arith.mulf %101, %105 : vector<2x64xf32>
    %cst_16 = arith.constant dense<0.000000e+00> : vector<2x256xf32>
    %107 = tpu.matmul %106, %86, %cst_16 {dimension_numbers = #tpu.dot_dimension_numbers<[1], [0], [0], [1], [0, 0, 1, 1], [], []>} : vector<2x64xf32>, vector<64x256xf32>, vector<2x256xf32> -> vector<2x256xf32>
    %108 = arith.addf %43, %107 : vector<2x256xf32>
    %109 = vector.extract_strided_slice %108 {offsets = [0, 0], sizes = [2, 192], strides = [1, 1]} : vector<2x256xf32> to vector<2x192xf32>
    %110 = arith.negf %109 : vector<2x192xf32>
    %111 = math.exp %110 : vector<2x192xf32>
    %cst_17 = arith.constant 1.000000e+00 : f32
    %112 = vector.broadcast %cst_17 : f32 to vector<2x192xf32>
    %113 = arith.addf %112, %111 : vector<2x192xf32>
    %114 = arith.divf %112, %113 : vector<2x192xf32>
    %115 = vector.extract_strided_slice %108 {offsets = [0, 192], sizes = [2, 64], strides = [1, 1]} : vector<2x256xf32> to vector<2x64xf32>
    %116 = math.tanh %115 : vector<2x64xf32>
    %117 = vector.extract_strided_slice %114 {offsets = [0, 0], sizes = [2, 64], strides = [1, 1]} : vector<2x192xf32> to vector<2x64xf32>
    %118 = vector.extract_strided_slice %114 {offsets = [0, 64], sizes = [2, 64], strides = [1, 1]} : vector<2x192xf32> to vector<2x64xf32>
    %119 = vector.extract_strided_slice %114 {offsets = [0, 128], sizes = [2, 64], strides = [1, 1]} : vector<2x192xf32> to vector<2x64xf32>
    %120 = arith.mulf %118, %104 : vector<2x64xf32>
    %121 = arith.mulf %117, %116 : vector<2x64xf32>
    %122 = arith.addf %120, %121 : vector<2x64xf32>
    %123 = math.tanh %122 : vector<2x64xf32>
    %124 = arith.mulf %119, %123 : vector<2x64xf32>
    %cst_18 = arith.constant dense<0.000000e+00> : vector<2x256xf32>
    %125 = tpu.matmul %124, %86, %cst_18 {dimension_numbers = #tpu.dot_dimension_numbers<[1], [0], [0], [1], [0, 0, 1, 1], [], []>} : vector<2x64xf32>, vector<64x256xf32>, vector<2x256xf32> -> vector<2x256xf32>
    %126 = arith.addf %50, %125 : vector<2x256xf32>
    %127 = vector.extract_strided_slice %126 {offsets = [0, 0], sizes = [2, 192], strides = [1, 1]} : vector<2x256xf32> to vector<2x192xf32>
    %128 = arith.negf %127 : vector<2x192xf32>
    %129 = math.exp %128 : vector<2x192xf32>
    %cst_19 = arith.constant 1.000000e+00 : f32
    %130 = vector.broadcast %cst_19 : f32 to vector<2x192xf32>
    %131 = arith.addf %130, %129 : vector<2x192xf32>
    %132 = arith.divf %130, %131 : vector<2x192xf32>
    %133 = vector.extract_strided_slice %126 {offsets = [0, 192], sizes = [2, 64], strides = [1, 1]} : vector<2x256xf32> to vector<2x64xf32>
    %134 = math.tanh %133 : vector<2x64xf32>
    %135 = vector.extract_strided_slice %132 {offsets = [0, 0], sizes = [2, 64], strides = [1, 1]} : vector<2x192xf32> to vector<2x64xf32>
    %136 = vector.extract_strided_slice %132 {offsets = [0, 64], sizes = [2, 64], strides = [1, 1]} : vector<2x192xf32> to vector<2x64xf32>
    %137 = vector.extract_strided_slice %132 {offsets = [0, 128], sizes = [2, 64], strides = [1, 1]} : vector<2x192xf32> to vector<2x64xf32>
    %138 = arith.mulf %136, %122 : vector<2x64xf32>
    %139 = arith.mulf %135, %134 : vector<2x64xf32>
    %140 = arith.addf %138, %139 : vector<2x64xf32>
    %141 = math.tanh %140 : vector<2x64xf32>
    %142 = arith.mulf %137, %141 : vector<2x64xf32>
    %cst_20 = arith.constant dense<0.000000e+00> : vector<2x256xf32>
    %143 = tpu.matmul %142, %86, %cst_20 {dimension_numbers = #tpu.dot_dimension_numbers<[1], [0], [0], [1], [0, 0, 1, 1], [], []>} : vector<2x64xf32>, vector<64x256xf32>, vector<2x256xf32> -> vector<2x256xf32>
    %144 = arith.addf %57, %143 : vector<2x256xf32>
    %145 = vector.extract_strided_slice %144 {offsets = [0, 0], sizes = [2, 192], strides = [1, 1]} : vector<2x256xf32> to vector<2x192xf32>
    %146 = arith.negf %145 : vector<2x192xf32>
    %147 = math.exp %146 : vector<2x192xf32>
    %cst_21 = arith.constant 1.000000e+00 : f32
    %148 = vector.broadcast %cst_21 : f32 to vector<2x192xf32>
    %149 = arith.addf %148, %147 : vector<2x192xf32>
    %150 = arith.divf %148, %149 : vector<2x192xf32>
    %151 = vector.extract_strided_slice %144 {offsets = [0, 192], sizes = [2, 64], strides = [1, 1]} : vector<2x256xf32> to vector<2x64xf32>
    %152 = math.tanh %151 : vector<2x64xf32>
    %153 = vector.extract_strided_slice %150 {offsets = [0, 0], sizes = [2, 64], strides = [1, 1]} : vector<2x192xf32> to vector<2x64xf32>
    %154 = vector.extract_strided_slice %150 {offsets = [0, 64], sizes = [2, 64], strides = [1, 1]} : vector<2x192xf32> to vector<2x64xf32>
    %155 = vector.extract_strided_slice %150 {offsets = [0, 128], sizes = [2, 64], strides = [1, 1]} : vector<2x192xf32> to vector<2x64xf32>
    %156 = arith.mulf %154, %140 : vector<2x64xf32>
    %157 = arith.mulf %153, %152 : vector<2x64xf32>
    %158 = arith.addf %156, %157 : vector<2x64xf32>
    %159 = math.tanh %158 : vector<2x64xf32>
    %160 = arith.mulf %155, %159 : vector<2x64xf32>
    %cst_22 = arith.constant dense<0.000000e+00> : vector<2x256xf32>
    %161 = tpu.matmul %160, %86, %cst_22 {dimension_numbers = #tpu.dot_dimension_numbers<[1], [0], [0], [1], [0, 0, 1, 1], [], []>} : vector<2x64xf32>, vector<64x256xf32>, vector<2x256xf32> -> vector<2x256xf32>
    %162 = arith.addf %64, %161 : vector<2x256xf32>
    %163 = vector.extract_strided_slice %162 {offsets = [0, 0], sizes = [2, 192], strides = [1, 1]} : vector<2x256xf32> to vector<2x192xf32>
    %164 = arith.negf %163 : vector<2x192xf32>
    %165 = math.exp %164 : vector<2x192xf32>
    %cst_23 = arith.constant 1.000000e+00 : f32
    %166 = vector.broadcast %cst_23 : f32 to vector<2x192xf32>
    %167 = arith.addf %166, %165 : vector<2x192xf32>
    %168 = arith.divf %166, %167 : vector<2x192xf32>
    %169 = vector.extract_strided_slice %162 {offsets = [0, 192], sizes = [2, 64], strides = [1, 1]} : vector<2x256xf32> to vector<2x64xf32>
    %170 = math.tanh %169 : vector<2x64xf32>
    %171 = vector.extract_strided_slice %168 {offsets = [0, 0], sizes = [2, 64], strides = [1, 1]} : vector<2x192xf32> to vector<2x64xf32>
    %172 = vector.extract_strided_slice %168 {offsets = [0, 64], sizes = [2, 64], strides = [1, 1]} : vector<2x192xf32> to vector<2x64xf32>
    %173 = vector.extract_strided_slice %168 {offsets = [0, 128], sizes = [2, 64], strides = [1, 1]} : vector<2x192xf32> to vector<2x64xf32>
    %174 = arith.mulf %172, %158 : vector<2x64xf32>
    %175 = arith.mulf %171, %170 : vector<2x64xf32>
    %176 = arith.addf %174, %175 : vector<2x64xf32>
    %177 = math.tanh %176 : vector<2x64xf32>
    %178 = arith.mulf %173, %177 : vector<2x64xf32>
    %cst_24 = arith.constant dense<0.000000e+00> : vector<2x256xf32>
    %179 = tpu.matmul %178, %86, %cst_24 {dimension_numbers = #tpu.dot_dimension_numbers<[1], [0], [0], [1], [0, 0, 1, 1], [], []>} : vector<2x64xf32>, vector<64x256xf32>, vector<2x256xf32> -> vector<2x256xf32>
    %180 = arith.addf %71, %179 : vector<2x256xf32>
    %181 = vector.extract_strided_slice %180 {offsets = [0, 0], sizes = [2, 192], strides = [1, 1]} : vector<2x256xf32> to vector<2x192xf32>
    %182 = arith.negf %181 : vector<2x192xf32>
    %183 = math.exp %182 : vector<2x192xf32>
    %cst_25 = arith.constant 1.000000e+00 : f32
    %184 = vector.broadcast %cst_25 : f32 to vector<2x192xf32>
    %185 = arith.addf %184, %183 : vector<2x192xf32>
    %186 = arith.divf %184, %185 : vector<2x192xf32>
    %187 = vector.extract_strided_slice %180 {offsets = [0, 192], sizes = [2, 64], strides = [1, 1]} : vector<2x256xf32> to vector<2x64xf32>
    %188 = math.tanh %187 : vector<2x64xf32>
    %189 = vector.extract_strided_slice %186 {offsets = [0, 0], sizes = [2, 64], strides = [1, 1]} : vector<2x192xf32> to vector<2x64xf32>
    %190 = vector.extract_strided_slice %186 {offsets = [0, 64], sizes = [2, 64], strides = [1, 1]} : vector<2x192xf32> to vector<2x64xf32>
    %191 = vector.extract_strided_slice %186 {offsets = [0, 128], sizes = [2, 64], strides = [1, 1]} : vector<2x192xf32> to vector<2x64xf32>
    %192 = arith.mulf %190, %176 : vector<2x64xf32>
    %193 = arith.mulf %189, %188 : vector<2x64xf32>
    %194 = arith.addf %192, %193 : vector<2x64xf32>
    %195 = math.tanh %194 : vector<2x64xf32>
    %196 = arith.mulf %191, %195 : vector<2x64xf32>
    %cst_26 = arith.constant dense<0.000000e+00> : vector<2x256xf32>
    %197 = tpu.matmul %196, %86, %cst_26 {dimension_numbers = #tpu.dot_dimension_numbers<[1], [0], [0], [1], [0, 0, 1, 1], [], []>} : vector<2x64xf32>, vector<64x256xf32>, vector<2x256xf32> -> vector<2x256xf32>
    %198 = arith.addf %78, %197 : vector<2x256xf32>
    %199 = vector.extract_strided_slice %198 {offsets = [0, 0], sizes = [2, 192], strides = [1, 1]} : vector<2x256xf32> to vector<2x192xf32>
    %200 = arith.negf %199 : vector<2x192xf32>
    %201 = math.exp %200 : vector<2x192xf32>
    %cst_27 = arith.constant 1.000000e+00 : f32
    %202 = vector.broadcast %cst_27 : f32 to vector<2x192xf32>
    %203 = arith.addf %202, %201 : vector<2x192xf32>
    %204 = arith.divf %202, %203 : vector<2x192xf32>
    %205 = vector.extract_strided_slice %198 {offsets = [0, 192], sizes = [2, 64], strides = [1, 1]} : vector<2x256xf32> to vector<2x64xf32>
    %206 = math.tanh %205 : vector<2x64xf32>
    %207 = vector.extract_strided_slice %204 {offsets = [0, 0], sizes = [2, 64], strides = [1, 1]} : vector<2x192xf32> to vector<2x64xf32>
    %208 = vector.extract_strided_slice %204 {offsets = [0, 64], sizes = [2, 64], strides = [1, 1]} : vector<2x192xf32> to vector<2x64xf32>
    %209 = vector.extract_strided_slice %204 {offsets = [0, 128], sizes = [2, 64], strides = [1, 1]} : vector<2x192xf32> to vector<2x64xf32>
    %210 = arith.mulf %208, %194 : vector<2x64xf32>
    %211 = arith.mulf %207, %206 : vector<2x64xf32>
    %212 = arith.addf %210, %211 : vector<2x64xf32>
    %213 = math.tanh %212 : vector<2x64xf32>
    %214 = arith.mulf %209, %213 : vector<2x64xf32>
    %cst_28 = arith.constant dense<0.000000e+00> : vector<2x256xf32>
    %215 = tpu.matmul %214, %86, %cst_28 {dimension_numbers = #tpu.dot_dimension_numbers<[1], [0], [0], [1], [0, 0, 1, 1], [], []>} : vector<2x64xf32>, vector<64x256xf32>, vector<2x256xf32> -> vector<2x256xf32>
    %216 = arith.addf %85, %215 : vector<2x256xf32>
    %217 = vector.extract_strided_slice %216 {offsets = [0, 0], sizes = [2, 192], strides = [1, 1]} : vector<2x256xf32> to vector<2x192xf32>
    %218 = arith.negf %217 : vector<2x192xf32>
    %219 = math.exp %218 : vector<2x192xf32>
    %cst_29 = arith.constant 1.000000e+00 : f32
    %220 = vector.broadcast %cst_29 : f32 to vector<2x192xf32>
    %221 = arith.addf %220, %219 : vector<2x192xf32>
    %222 = arith.divf %220, %221 : vector<2x192xf32>
    %223 = vector.extract_strided_slice %216 {offsets = [0, 192], sizes = [2, 64], strides = [1, 1]} : vector<2x256xf32> to vector<2x64xf32>
    %224 = math.tanh %223 : vector<2x64xf32>
    %225 = vector.extract_strided_slice %222 {offsets = [0, 0], sizes = [2, 64], strides = [1, 1]} : vector<2x192xf32> to vector<2x64xf32>
    %226 = vector.extract_strided_slice %222 {offsets = [0, 64], sizes = [2, 64], strides = [1, 1]} : vector<2x192xf32> to vector<2x64xf32>
    %227 = vector.extract_strided_slice %222 {offsets = [0, 128], sizes = [2, 64], strides = [1, 1]} : vector<2x192xf32> to vector<2x64xf32>
    %228 = arith.mulf %226, %212 : vector<2x64xf32>
    %229 = arith.mulf %225, %224 : vector<2x64xf32>
    %230 = arith.addf %228, %229 : vector<2x64xf32>
    %231 = math.tanh %230 : vector<2x64xf32>
    %232 = arith.mulf %227, %231 : vector<2x64xf32>
    %233 = vector.shape_cast %21 : vector<1x64xi1> to vector<1x64xi1>
    %234 = vector.broadcast %233 : vector<1x64xi1> to vector<2x64xi1>
    %235 = arith.select %234, %106, %232 : vector<2x64xi1>, vector<2x64xf32>
    %236 = vector.shape_cast %21 : vector<1x64xi1> to vector<1x64xi1>
    %237 = vector.broadcast %236 : vector<1x64xi1> to vector<2x64xi1>
    %238 = arith.select %237, %124, %214 : vector<2x64xi1>, vector<2x64xf32>
    %239 = vector.shape_cast %21 : vector<1x64xi1> to vector<1x64xi1>
    %240 = vector.broadcast %239 : vector<1x64xi1> to vector<2x64xi1>
    %241 = arith.select %240, %142, %196 : vector<2x64xi1>, vector<2x64xf32>
    %242 = vector.shape_cast %21 : vector<1x64xi1> to vector<1x64xi1>
    %243 = vector.broadcast %242 : vector<1x64xi1> to vector<2x64xi1>
    %244 = arith.select %243, %160, %178 : vector<2x64xi1>, vector<2x64xf32>
    %245 = vector.shape_cast %21 : vector<1x64xi1> to vector<1x64xi1>
    %246 = vector.broadcast %245 : vector<1x64xi1> to vector<2x64xi1>
    %247 = arith.select %246, %178, %160 : vector<2x64xi1>, vector<2x64xf32>
    %248 = vector.shape_cast %21 : vector<1x64xi1> to vector<1x64xi1>
    %249 = vector.broadcast %248 : vector<1x64xi1> to vector<2x64xi1>
    %250 = arith.select %249, %196, %142 : vector<2x64xi1>, vector<2x64xf32>
    %251 = vector.shape_cast %21 : vector<1x64xi1> to vector<1x64xi1>
    %252 = vector.broadcast %251 : vector<1x64xi1> to vector<2x64xi1>
    %253 = arith.select %252, %214, %124 : vector<2x64xi1>, vector<2x64xf32>
    %254 = vector.shape_cast %21 : vector<1x64xi1> to vector<1x64xi1>
    %255 = vector.broadcast %254 : vector<1x64xi1> to vector<2x64xi1>
    %256 = arith.select %255, %232, %106 : vector<2x64xi1>, vector<2x64xf32>
    %257 = vector.shape_cast %235 : vector<2x64xf32> to vector<1x2x64xf32>
    %258 = vector.shape_cast %238 : vector<2x64xf32> to vector<1x2x64xf32>
    %259 = vector.shape_cast %241 : vector<2x64xf32> to vector<1x2x64xf32>
    %260 = vector.shape_cast %244 : vector<2x64xf32> to vector<1x2x64xf32>
    %261 = vector.shape_cast %247 : vector<2x64xf32> to vector<1x2x64xf32>
    %262 = vector.shape_cast %250 : vector<2x64xf32> to vector<1x2x64xf32>
    %263 = vector.shape_cast %253 : vector<2x64xf32> to vector<1x2x64xf32>
    %264 = vector.shape_cast %256 : vector<2x64xf32> to vector<1x2x64xf32>
    %265 = tpu.concatenate %257, %258, %259, %260, %261, %262, %263, %264 in 0 : vector<1x2x64xf32>, vector<1x2x64xf32>, vector<1x2x64xf32>, vector<1x2x64xf32>, vector<1x2x64xf32>, vector<1x2x64xf32>, vector<1x2x64xf32>, vector<1x2x64xf32> -> vector<8x2x64xf32>
    %266 = vector.shape_cast %265 : vector<8x2x64xf32> to vector<16x64xf32>
    %c0_30 = arith.constant 0 : index
    %c0_31 = arith.constant 0 : index
    %267 = vector.load %arg4[%c0_30, %c0_31] : memref<64x256xf32, #tpu.memory_space<vmem>>, vector<64x256xf32>
    %cst_32 = arith.constant dense<0.000000e+00> : vector<16x256xf32>
    %268 = tpu.matmul %266, %267, %cst_32 {dimension_numbers = #tpu.dot_dimension_numbers<[1], [0], [0], [1], [0, 0, 1, 1], [], []>} : vector<16x64xf32>, vector<64x256xf32>, vector<16x256xf32> -> vector<16x256xf32>
    %c0_33 = arith.constant 0 : index
    %c0_34 = arith.constant 0 : index
    %269 = vector.load %arg6[%c0_33, %c0_34] : memref<1x256xf32, #tpu.memory_space<vmem>>, vector<1x256xf32>
    %270 = vector.broadcast %269 : vector<1x256xf32> to vector<16x256xf32>
    %271 = arith.addf %268, %270 : vector<16x256xf32>
    %272 = vector.shape_cast %271 : vector<16x256xf32> to vector<8x2x256xf32>
    %273 = vector.extract_strided_slice %272 {offsets = [0, 0, 0], sizes = [1, 2, 256], strides = [1, 1, 1]} : vector<8x2x256xf32> to vector<1x2x256xf32>
    %274 = vector.shape_cast %273 : vector<1x2x256xf32> to vector<2x256xf32>
    %275 = vector.extract_strided_slice %272 {offsets = [7, 0, 0], sizes = [1, 2, 256], strides = [1, 1, 1]} : vector<8x2x256xf32> to vector<1x2x256xf32>
    %276 = vector.shape_cast %275 : vector<1x2x256xf32> to vector<2x256xf32>
    %277 = vector.shape_cast %18 : vector<1x256xi1> to vector<1x256xi1>
    %278 = vector.broadcast %277 : vector<1x256xi1> to vector<2x256xi1>
    %279 = arith.select %278, %274, %276 : vector<2x256xi1>, vector<2x256xf32>
    %280 = vector.extract_strided_slice %272 {offsets = [1, 0, 0], sizes = [1, 2, 256], strides = [1, 1, 1]} : vector<8x2x256xf32> to vector<1x2x256xf32>
    %281 = vector.shape_cast %280 : vector<1x2x256xf32> to vector<2x256xf32>
    %282 = vector.extract_strided_slice %272 {offsets = [6, 0, 0], sizes = [1, 2, 256], strides = [1, 1, 1]} : vector<8x2x256xf32> to vector<1x2x256xf32>
    %283 = vector.shape_cast %282 : vector<1x2x256xf32> to vector<2x256xf32>
    %284 = vector.shape_cast %18 : vector<1x256xi1> to vector<1x256xi1>
    %285 = vector.broadcast %284 : vector<1x256xi1> to vector<2x256xi1>
    %286 = arith.select %285, %281, %283 : vector<2x256xi1>, vector<2x256xf32>
    %287 = vector.extract_strided_slice %272 {offsets = [2, 0, 0], sizes = [1, 2, 256], strides = [1, 1, 1]} : vector<8x2x256xf32> to vector<1x2x256xf32>
    %288 = vector.shape_cast %287 : vector<1x2x256xf32> to vector<2x256xf32>
    %289 = vector.extract_strided_slice %272 {offsets = [5, 0, 0], sizes = [1, 2, 256], strides = [1, 1, 1]} : vector<8x2x256xf32> to vector<1x2x256xf32>
    %290 = vector.shape_cast %289 : vector<1x2x256xf32> to vector<2x256xf32>
    %291 = vector.shape_cast %18 : vector<1x256xi1> to vector<1x256xi1>
    %292 = vector.broadcast %291 : vector<1x256xi1> to vector<2x256xi1>
    %293 = arith.select %292, %288, %290 : vector<2x256xi1>, vector<2x256xf32>
    %294 = vector.extract_strided_slice %272 {offsets = [3, 0, 0], sizes = [1, 2, 256], strides = [1, 1, 1]} : vector<8x2x256xf32> to vector<1x2x256xf32>
    %295 = vector.shape_cast %294 : vector<1x2x256xf32> to vector<2x256xf32>
    %296 = vector.extract_strided_slice %272 {offsets = [4, 0, 0], sizes = [1, 2, 256], strides = [1, 1, 1]} : vector<8x2x256xf32> to vector<1x2x256xf32>
    %297 = vector.shape_cast %296 : vector<1x2x256xf32> to vector<2x256xf32>
    %298 = vector.shape_cast %18 : vector<1x256xi1> to vector<1x256xi1>
    %299 = vector.broadcast %298 : vector<1x256xi1> to vector<2x256xi1>
    %300 = arith.select %299, %295, %297 : vector<2x256xi1>, vector<2x256xf32>
    %301 = vector.extract_strided_slice %272 {offsets = [4, 0, 0], sizes = [1, 2, 256], strides = [1, 1, 1]} : vector<8x2x256xf32> to vector<1x2x256xf32>
    %302 = vector.shape_cast %301 : vector<1x2x256xf32> to vector<2x256xf32>
    %303 = vector.extract_strided_slice %272 {offsets = [3, 0, 0], sizes = [1, 2, 256], strides = [1, 1, 1]} : vector<8x2x256xf32> to vector<1x2x256xf32>
    %304 = vector.shape_cast %303 : vector<1x2x256xf32> to vector<2x256xf32>
    %305 = vector.shape_cast %18 : vector<1x256xi1> to vector<1x256xi1>
    %306 = vector.broadcast %305 : vector<1x256xi1> to vector<2x256xi1>
    %307 = arith.select %306, %302, %304 : vector<2x256xi1>, vector<2x256xf32>
    %308 = vector.extract_strided_slice %272 {offsets = [5, 0, 0], sizes = [1, 2, 256], strides = [1, 1, 1]} : vector<8x2x256xf32> to vector<1x2x256xf32>
    %309 = vector.shape_cast %308 : vector<1x2x256xf32> to vector<2x256xf32>
    %310 = vector.extract_strided_slice %272 {offsets = [2, 0, 0], sizes = [1, 2, 256], strides = [1, 1, 1]} : vector<8x2x256xf32> to vector<1x2x256xf32>
    %311 = vector.shape_cast %310 : vector<1x2x256xf32> to vector<2x256xf32>
    %312 = vector.shape_cast %18 : vector<1x256xi1> to vector<1x256xi1>
    %313 = vector.broadcast %312 : vector<1x256xi1> to vector<2x256xi1>
    %314 = arith.select %313, %309, %311 : vector<2x256xi1>, vector<2x256xf32>
    %315 = vector.extract_strided_slice %272 {offsets = [6, 0, 0], sizes = [1, 2, 256], strides = [1, 1, 1]} : vector<8x2x256xf32> to vector<1x2x256xf32>
    %316 = vector.shape_cast %315 : vector<1x2x256xf32> to vector<2x256xf32>
    %317 = vector.extract_strided_slice %272 {offsets = [1, 0, 0], sizes = [1, 2, 256], strides = [1, 1, 1]} : vector<8x2x256xf32> to vector<1x2x256xf32>
    %318 = vector.shape_cast %317 : vector<1x2x256xf32> to vector<2x256xf32>
    %319 = vector.shape_cast %18 : vector<1x256xi1> to vector<1x256xi1>
    %320 = vector.broadcast %319 : vector<1x256xi1> to vector<2x256xi1>
    %321 = arith.select %320, %316, %318 : vector<2x256xi1>, vector<2x256xf32>
    %322 = vector.extract_strided_slice %272 {offsets = [7, 0, 0], sizes = [1, 2, 256], strides = [1, 1, 1]} : vector<8x2x256xf32> to vector<1x2x256xf32>
    %323 = vector.shape_cast %322 : vector<1x2x256xf32> to vector<2x256xf32>
    %324 = vector.extract_strided_slice %272 {offsets = [0, 0, 0], sizes = [1, 2, 256], strides = [1, 1, 1]} : vector<8x2x256xf32> to vector<1x2x256xf32>
    %325 = vector.shape_cast %324 : vector<1x2x256xf32> to vector<2x256xf32>
    %326 = vector.shape_cast %18 : vector<1x256xi1> to vector<1x256xi1>
    %327 = vector.broadcast %326 : vector<1x256xi1> to vector<2x256xi1>
    %328 = arith.select %327, %323, %325 : vector<2x256xi1>, vector<2x256xf32>
    %c0_35 = arith.constant 0 : index
    %c0_36 = arith.constant 0 : index
    %329 = vector.load %arg5[%c0_35, %c0_36] : memref<64x256xf32, #tpu.memory_space<vmem>>, vector<64x256xf32>
    %cst_37 = arith.constant 0.000000e+00 : f32
    %330 = vector.broadcast %cst_37 : f32 to vector<2x64xf32>
    %cst_38 = arith.constant 0.000000e+00 : f32
    %331 = vector.broadcast %cst_38 : f32 to vector<2x64xf32>
    %cst_39 = arith.constant dense<0.000000e+00> : vector<2x256xf32>
    %332 = tpu.matmul %330, %329, %cst_39 {dimension_numbers = #tpu.dot_dimension_numbers<[1], [0], [0], [1], [0, 0, 1, 1], [], []>} : vector<2x64xf32>, vector<64x256xf32>, vector<2x256xf32> -> vector<2x256xf32>
    %333 = arith.addf %279, %332 : vector<2x256xf32>
    %334 = vector.extract_strided_slice %333 {offsets = [0, 0], sizes = [2, 192], strides = [1, 1]} : vector<2x256xf32> to vector<2x192xf32>
    %335 = arith.negf %334 : vector<2x192xf32>
    %336 = math.exp %335 : vector<2x192xf32>
    %cst_40 = arith.constant 1.000000e+00 : f32
    %337 = vector.broadcast %cst_40 : f32 to vector<2x192xf32>
    %338 = arith.addf %337, %336 : vector<2x192xf32>
    %339 = arith.divf %337, %338 : vector<2x192xf32>
    %340 = vector.extract_strided_slice %333 {offsets = [0, 192], sizes = [2, 64], strides = [1, 1]} : vector<2x256xf32> to vector<2x64xf32>
    %341 = math.tanh %340 : vector<2x64xf32>
    %342 = vector.extract_strided_slice %339 {offsets = [0, 0], sizes = [2, 64], strides = [1, 1]} : vector<2x192xf32> to vector<2x64xf32>
    %343 = vector.extract_strided_slice %339 {offsets = [0, 64], sizes = [2, 64], strides = [1, 1]} : vector<2x192xf32> to vector<2x64xf32>
    %344 = vector.extract_strided_slice %339 {offsets = [0, 128], sizes = [2, 64], strides = [1, 1]} : vector<2x192xf32> to vector<2x64xf32>
    %345 = arith.mulf %343, %331 : vector<2x64xf32>
    %346 = arith.mulf %342, %341 : vector<2x64xf32>
    %347 = arith.addf %345, %346 : vector<2x64xf32>
    %348 = math.tanh %347 : vector<2x64xf32>
    %349 = arith.mulf %344, %348 : vector<2x64xf32>
    %cst_41 = arith.constant dense<0.000000e+00> : vector<2x256xf32>
    %350 = tpu.matmul %349, %329, %cst_41 {dimension_numbers = #tpu.dot_dimension_numbers<[1], [0], [0], [1], [0, 0, 1, 1], [], []>} : vector<2x64xf32>, vector<64x256xf32>, vector<2x256xf32> -> vector<2x256xf32>
    %351 = arith.addf %286, %350 : vector<2x256xf32>
    %352 = vector.extract_strided_slice %351 {offsets = [0, 0], sizes = [2, 192], strides = [1, 1]} : vector<2x256xf32> to vector<2x192xf32>
    %353 = arith.negf %352 : vector<2x192xf32>
    %354 = math.exp %353 : vector<2x192xf32>
    %cst_42 = arith.constant 1.000000e+00 : f32
    %355 = vector.broadcast %cst_42 : f32 to vector<2x192xf32>
    %356 = arith.addf %355, %354 : vector<2x192xf32>
    %357 = arith.divf %355, %356 : vector<2x192xf32>
    %358 = vector.extract_strided_slice %351 {offsets = [0, 192], sizes = [2, 64], strides = [1, 1]} : vector<2x256xf32> to vector<2x64xf32>
    %359 = math.tanh %358 : vector<2x64xf32>
    %360 = vector.extract_strided_slice %357 {offsets = [0, 0], sizes = [2, 64], strides = [1, 1]} : vector<2x192xf32> to vector<2x64xf32>
    %361 = vector.extract_strided_slice %357 {offsets = [0, 64], sizes = [2, 64], strides = [1, 1]} : vector<2x192xf32> to vector<2x64xf32>
    %362 = vector.extract_strided_slice %357 {offsets = [0, 128], sizes = [2, 64], strides = [1, 1]} : vector<2x192xf32> to vector<2x64xf32>
    %363 = arith.mulf %361, %347 : vector<2x64xf32>
    %364 = arith.mulf %360, %359 : vector<2x64xf32>
    %365 = arith.addf %363, %364 : vector<2x64xf32>
    %366 = math.tanh %365 : vector<2x64xf32>
    %367 = arith.mulf %362, %366 : vector<2x64xf32>
    %cst_43 = arith.constant dense<0.000000e+00> : vector<2x256xf32>
    %368 = tpu.matmul %367, %329, %cst_43 {dimension_numbers = #tpu.dot_dimension_numbers<[1], [0], [0], [1], [0, 0, 1, 1], [], []>} : vector<2x64xf32>, vector<64x256xf32>, vector<2x256xf32> -> vector<2x256xf32>
    %369 = arith.addf %293, %368 : vector<2x256xf32>
    %370 = vector.extract_strided_slice %369 {offsets = [0, 0], sizes = [2, 192], strides = [1, 1]} : vector<2x256xf32> to vector<2x192xf32>
    %371 = arith.negf %370 : vector<2x192xf32>
    %372 = math.exp %371 : vector<2x192xf32>
    %cst_44 = arith.constant 1.000000e+00 : f32
    %373 = vector.broadcast %cst_44 : f32 to vector<2x192xf32>
    %374 = arith.addf %373, %372 : vector<2x192xf32>
    %375 = arith.divf %373, %374 : vector<2x192xf32>
    %376 = vector.extract_strided_slice %369 {offsets = [0, 192], sizes = [2, 64], strides = [1, 1]} : vector<2x256xf32> to vector<2x64xf32>
    %377 = math.tanh %376 : vector<2x64xf32>
    %378 = vector.extract_strided_slice %375 {offsets = [0, 0], sizes = [2, 64], strides = [1, 1]} : vector<2x192xf32> to vector<2x64xf32>
    %379 = vector.extract_strided_slice %375 {offsets = [0, 64], sizes = [2, 64], strides = [1, 1]} : vector<2x192xf32> to vector<2x64xf32>
    %380 = vector.extract_strided_slice %375 {offsets = [0, 128], sizes = [2, 64], strides = [1, 1]} : vector<2x192xf32> to vector<2x64xf32>
    %381 = arith.mulf %379, %365 : vector<2x64xf32>
    %382 = arith.mulf %378, %377 : vector<2x64xf32>
    %383 = arith.addf %381, %382 : vector<2x64xf32>
    %384 = math.tanh %383 : vector<2x64xf32>
    %385 = arith.mulf %380, %384 : vector<2x64xf32>
    %cst_45 = arith.constant dense<0.000000e+00> : vector<2x256xf32>
    %386 = tpu.matmul %385, %329, %cst_45 {dimension_numbers = #tpu.dot_dimension_numbers<[1], [0], [0], [1], [0, 0, 1, 1], [], []>} : vector<2x64xf32>, vector<64x256xf32>, vector<2x256xf32> -> vector<2x256xf32>
    %387 = arith.addf %300, %386 : vector<2x256xf32>
    %388 = vector.extract_strided_slice %387 {offsets = [0, 0], sizes = [2, 192], strides = [1, 1]} : vector<2x256xf32> to vector<2x192xf32>
    %389 = arith.negf %388 : vector<2x192xf32>
    %390 = math.exp %389 : vector<2x192xf32>
    %cst_46 = arith.constant 1.000000e+00 : f32
    %391 = vector.broadcast %cst_46 : f32 to vector<2x192xf32>
    %392 = arith.addf %391, %390 : vector<2x192xf32>
    %393 = arith.divf %391, %392 : vector<2x192xf32>
    %394 = vector.extract_strided_slice %387 {offsets = [0, 192], sizes = [2, 64], strides = [1, 1]} : vector<2x256xf32> to vector<2x64xf32>
    %395 = math.tanh %394 : vector<2x64xf32>
    %396 = vector.extract_strided_slice %393 {offsets = [0, 0], sizes = [2, 64], strides = [1, 1]} : vector<2x192xf32> to vector<2x64xf32>
    %397 = vector.extract_strided_slice %393 {offsets = [0, 64], sizes = [2, 64], strides = [1, 1]} : vector<2x192xf32> to vector<2x64xf32>
    %398 = vector.extract_strided_slice %393 {offsets = [0, 128], sizes = [2, 64], strides = [1, 1]} : vector<2x192xf32> to vector<2x64xf32>
    %399 = arith.mulf %397, %383 : vector<2x64xf32>
    %400 = arith.mulf %396, %395 : vector<2x64xf32>
    %401 = arith.addf %399, %400 : vector<2x64xf32>
    %402 = math.tanh %401 : vector<2x64xf32>
    %403 = arith.mulf %398, %402 : vector<2x64xf32>
    %cst_47 = arith.constant dense<0.000000e+00> : vector<2x256xf32>
    %404 = tpu.matmul %403, %329, %cst_47 {dimension_numbers = #tpu.dot_dimension_numbers<[1], [0], [0], [1], [0, 0, 1, 1], [], []>} : vector<2x64xf32>, vector<64x256xf32>, vector<2x256xf32> -> vector<2x256xf32>
    %405 = arith.addf %307, %404 : vector<2x256xf32>
    %406 = vector.extract_strided_slice %405 {offsets = [0, 0], sizes = [2, 192], strides = [1, 1]} : vector<2x256xf32> to vector<2x192xf32>
    %407 = arith.negf %406 : vector<2x192xf32>
    %408 = math.exp %407 : vector<2x192xf32>
    %cst_48 = arith.constant 1.000000e+00 : f32
    %409 = vector.broadcast %cst_48 : f32 to vector<2x192xf32>
    %410 = arith.addf %409, %408 : vector<2x192xf32>
    %411 = arith.divf %409, %410 : vector<2x192xf32>
    %412 = vector.extract_strided_slice %405 {offsets = [0, 192], sizes = [2, 64], strides = [1, 1]} : vector<2x256xf32> to vector<2x64xf32>
    %413 = math.tanh %412 : vector<2x64xf32>
    %414 = vector.extract_strided_slice %411 {offsets = [0, 0], sizes = [2, 64], strides = [1, 1]} : vector<2x192xf32> to vector<2x64xf32>
    %415 = vector.extract_strided_slice %411 {offsets = [0, 64], sizes = [2, 64], strides = [1, 1]} : vector<2x192xf32> to vector<2x64xf32>
    %416 = vector.extract_strided_slice %411 {offsets = [0, 128], sizes = [2, 64], strides = [1, 1]} : vector<2x192xf32> to vector<2x64xf32>
    %417 = arith.mulf %415, %401 : vector<2x64xf32>
    %418 = arith.mulf %414, %413 : vector<2x64xf32>
    %419 = arith.addf %417, %418 : vector<2x64xf32>
    %420 = math.tanh %419 : vector<2x64xf32>
    %421 = arith.mulf %416, %420 : vector<2x64xf32>
    %cst_49 = arith.constant dense<0.000000e+00> : vector<2x256xf32>
    %422 = tpu.matmul %421, %329, %cst_49 {dimension_numbers = #tpu.dot_dimension_numbers<[1], [0], [0], [1], [0, 0, 1, 1], [], []>} : vector<2x64xf32>, vector<64x256xf32>, vector<2x256xf32> -> vector<2x256xf32>
    %423 = arith.addf %314, %422 : vector<2x256xf32>
    %424 = vector.extract_strided_slice %423 {offsets = [0, 0], sizes = [2, 192], strides = [1, 1]} : vector<2x256xf32> to vector<2x192xf32>
    %425 = arith.negf %424 : vector<2x192xf32>
    %426 = math.exp %425 : vector<2x192xf32>
    %cst_50 = arith.constant 1.000000e+00 : f32
    %427 = vector.broadcast %cst_50 : f32 to vector<2x192xf32>
    %428 = arith.addf %427, %426 : vector<2x192xf32>
    %429 = arith.divf %427, %428 : vector<2x192xf32>
    %430 = vector.extract_strided_slice %423 {offsets = [0, 192], sizes = [2, 64], strides = [1, 1]} : vector<2x256xf32> to vector<2x64xf32>
    %431 = math.tanh %430 : vector<2x64xf32>
    %432 = vector.extract_strided_slice %429 {offsets = [0, 0], sizes = [2, 64], strides = [1, 1]} : vector<2x192xf32> to vector<2x64xf32>
    %433 = vector.extract_strided_slice %429 {offsets = [0, 64], sizes = [2, 64], strides = [1, 1]} : vector<2x192xf32> to vector<2x64xf32>
    %434 = vector.extract_strided_slice %429 {offsets = [0, 128], sizes = [2, 64], strides = [1, 1]} : vector<2x192xf32> to vector<2x64xf32>
    %435 = arith.mulf %433, %419 : vector<2x64xf32>
    %436 = arith.mulf %432, %431 : vector<2x64xf32>
    %437 = arith.addf %435, %436 : vector<2x64xf32>
    %438 = math.tanh %437 : vector<2x64xf32>
    %439 = arith.mulf %434, %438 : vector<2x64xf32>
    %cst_51 = arith.constant dense<0.000000e+00> : vector<2x256xf32>
    %440 = tpu.matmul %439, %329, %cst_51 {dimension_numbers = #tpu.dot_dimension_numbers<[1], [0], [0], [1], [0, 0, 1, 1], [], []>} : vector<2x64xf32>, vector<64x256xf32>, vector<2x256xf32> -> vector<2x256xf32>
    %441 = arith.addf %321, %440 : vector<2x256xf32>
    %442 = vector.extract_strided_slice %441 {offsets = [0, 0], sizes = [2, 192], strides = [1, 1]} : vector<2x256xf32> to vector<2x192xf32>
    %443 = arith.negf %442 : vector<2x192xf32>
    %444 = math.exp %443 : vector<2x192xf32>
    %cst_52 = arith.constant 1.000000e+00 : f32
    %445 = vector.broadcast %cst_52 : f32 to vector<2x192xf32>
    %446 = arith.addf %445, %444 : vector<2x192xf32>
    %447 = arith.divf %445, %446 : vector<2x192xf32>
    %448 = vector.extract_strided_slice %441 {offsets = [0, 192], sizes = [2, 64], strides = [1, 1]} : vector<2x256xf32> to vector<2x64xf32>
    %449 = math.tanh %448 : vector<2x64xf32>
    %450 = vector.extract_strided_slice %447 {offsets = [0, 0], sizes = [2, 64], strides = [1, 1]} : vector<2x192xf32> to vector<2x64xf32>
    %451 = vector.extract_strided_slice %447 {offsets = [0, 64], sizes = [2, 64], strides = [1, 1]} : vector<2x192xf32> to vector<2x64xf32>
    %452 = vector.extract_strided_slice %447 {offsets = [0, 128], sizes = [2, 64], strides = [1, 1]} : vector<2x192xf32> to vector<2x64xf32>
    %453 = arith.mulf %451, %437 : vector<2x64xf32>
    %454 = arith.mulf %450, %449 : vector<2x64xf32>
    %455 = arith.addf %453, %454 : vector<2x64xf32>
    %456 = math.tanh %455 : vector<2x64xf32>
    %457 = arith.mulf %452, %456 : vector<2x64xf32>
    %cst_53 = arith.constant dense<0.000000e+00> : vector<2x256xf32>
    %458 = tpu.matmul %457, %329, %cst_53 {dimension_numbers = #tpu.dot_dimension_numbers<[1], [0], [0], [1], [0, 0, 1, 1], [], []>} : vector<2x64xf32>, vector<64x256xf32>, vector<2x256xf32> -> vector<2x256xf32>
    %459 = arith.addf %328, %458 : vector<2x256xf32>
    %460 = vector.extract_strided_slice %459 {offsets = [0, 0], sizes = [2, 192], strides = [1, 1]} : vector<2x256xf32> to vector<2x192xf32>
    %461 = arith.negf %460 : vector<2x192xf32>
    %462 = math.exp %461 : vector<2x192xf32>
    %cst_54 = arith.constant 1.000000e+00 : f32
    %463 = vector.broadcast %cst_54 : f32 to vector<2x192xf32>
    %464 = arith.addf %463, %462 : vector<2x192xf32>
    %465 = arith.divf %463, %464 : vector<2x192xf32>
    %466 = vector.extract_strided_slice %459 {offsets = [0, 192], sizes = [2, 64], strides = [1, 1]} : vector<2x256xf32> to vector<2x64xf32>
    %467 = math.tanh %466 : vector<2x64xf32>
    %468 = vector.extract_strided_slice %465 {offsets = [0, 0], sizes = [2, 64], strides = [1, 1]} : vector<2x192xf32> to vector<2x64xf32>
    %469 = vector.extract_strided_slice %465 {offsets = [0, 64], sizes = [2, 64], strides = [1, 1]} : vector<2x192xf32> to vector<2x64xf32>
    %470 = vector.extract_strided_slice %465 {offsets = [0, 128], sizes = [2, 64], strides = [1, 1]} : vector<2x192xf32> to vector<2x64xf32>
    %471 = arith.mulf %469, %455 : vector<2x64xf32>
    %472 = arith.mulf %468, %467 : vector<2x64xf32>
    %473 = arith.addf %471, %472 : vector<2x64xf32>
    %474 = math.tanh %473 : vector<2x64xf32>
    %475 = arith.mulf %470, %474 : vector<2x64xf32>
    %476 = vector.shape_cast %21 : vector<1x64xi1> to vector<1x64xi1>
    %477 = vector.broadcast %476 : vector<1x64xi1> to vector<2x64xi1>
    %478 = arith.select %477, %349, %475 : vector<2x64xi1>, vector<2x64xf32>
    %479 = vector.shape_cast %21 : vector<1x64xi1> to vector<1x64xi1>
    %480 = vector.broadcast %479 : vector<1x64xi1> to vector<2x64xi1>
    %481 = arith.select %480, %367, %457 : vector<2x64xi1>, vector<2x64xf32>
    %482 = vector.shape_cast %21 : vector<1x64xi1> to vector<1x64xi1>
    %483 = vector.broadcast %482 : vector<1x64xi1> to vector<2x64xi1>
    %484 = arith.select %483, %385, %439 : vector<2x64xi1>, vector<2x64xf32>
    %485 = vector.shape_cast %21 : vector<1x64xi1> to vector<1x64xi1>
    %486 = vector.broadcast %485 : vector<1x64xi1> to vector<2x64xi1>
    %487 = arith.select %486, %403, %421 : vector<2x64xi1>, vector<2x64xf32>
    %488 = vector.shape_cast %21 : vector<1x64xi1> to vector<1x64xi1>
    %489 = vector.broadcast %488 : vector<1x64xi1> to vector<2x64xi1>
    %490 = arith.select %489, %421, %403 : vector<2x64xi1>, vector<2x64xf32>
    %491 = vector.shape_cast %21 : vector<1x64xi1> to vector<1x64xi1>
    %492 = vector.broadcast %491 : vector<1x64xi1> to vector<2x64xi1>
    %493 = arith.select %492, %439, %385 : vector<2x64xi1>, vector<2x64xf32>
    %494 = vector.shape_cast %21 : vector<1x64xi1> to vector<1x64xi1>
    %495 = vector.broadcast %494 : vector<1x64xi1> to vector<2x64xi1>
    %496 = arith.select %495, %457, %367 : vector<2x64xi1>, vector<2x64xf32>
    %497 = vector.shape_cast %21 : vector<1x64xi1> to vector<1x64xi1>
    %498 = vector.broadcast %497 : vector<1x64xi1> to vector<2x64xi1>
    %499 = arith.select %498, %475, %349 : vector<2x64xi1>, vector<2x64xf32>
    %500 = vector.shape_cast %478 : vector<2x64xf32> to vector<1x2x64xf32>
    %501 = vector.shape_cast %481 : vector<2x64xf32> to vector<1x2x64xf32>
    %502 = vector.shape_cast %484 : vector<2x64xf32> to vector<1x2x64xf32>
    %503 = vector.shape_cast %487 : vector<2x64xf32> to vector<1x2x64xf32>
    %504 = vector.shape_cast %490 : vector<2x64xf32> to vector<1x2x64xf32>
    %505 = vector.shape_cast %493 : vector<2x64xf32> to vector<1x2x64xf32>
    %506 = vector.shape_cast %496 : vector<2x64xf32> to vector<1x2x64xf32>
    %507 = vector.shape_cast %499 : vector<2x64xf32> to vector<1x2x64xf32>
    %508 = tpu.concatenate %500, %501, %502, %503, %504, %505, %506, %507 in 0 : vector<1x2x64xf32>, vector<1x2x64xf32>, vector<1x2x64xf32>, vector<1x2x64xf32>, vector<1x2x64xf32>, vector<1x2x64xf32>, vector<1x2x64xf32>, vector<1x2x64xf32> -> vector<8x2x64xf32>
    %c0_55 = arith.constant 0 : index
    %c0_56 = arith.constant 0 : index
    %509 = vector.load %arg7[%c0_55, %c0_56] : memref<1x64xf32, #tpu.memory_space<vmem>>, vector<1x64xf32>
    %510 = math.tanh %508 : vector<8x2x64xf32>
    %511 = vector.shape_cast %509 : vector<1x64xf32> to vector<1x1x64xf32>
    %512 = vector.broadcast %511 : vector<1x1x64xf32> to vector<8x2x64xf32>
    %513 = arith.mulf %510, %512 : vector<8x2x64xf32>
    %cst_57 = arith.constant dense<0.000000e+00> : vector<8x2xf32>
    %514 = vector.multi_reduction <add>, %513, %cst_57 [2] : vector<8x2x64xf32> to vector<8x2xf32>
    %515 = vector.shape_cast %514 : vector<8x2xf32> to vector<8x2x1xf32>
    %cst_58 = arith.constant dense<0xFF800000> : vector<2x1xf32>
    %516 = vector.multi_reduction <maximumf>, %515, %cst_58 [0] : vector<8x2x1xf32> to vector<2x1xf32>
    %517 = vector.shape_cast %516 : vector<2x1xf32> to vector<1x2x1xf32>
    %518 = vector.broadcast %517 : vector<1x2x1xf32> to vector<8x2x1xf32>
    %519 = arith.subf %515, %518 : vector<8x2x1xf32>
    %520 = math.exp %519 : vector<8x2x1xf32>
    %cst_59 = arith.constant dense<0.000000e+00> : vector<2x1xf32>
    %521 = vector.multi_reduction <add>, %520, %cst_59 [0] : vector<8x2x1xf32> to vector<2x1xf32>
    %522 = vector.shape_cast %521 : vector<2x1xf32> to vector<1x2x1xf32>
    %523 = vector.broadcast %522 : vector<1x2x1xf32> to vector<8x2x1xf32>
    %524 = arith.divf %520, %523 : vector<8x2x1xf32>
    %525 = vector.broadcast %524 : vector<8x2x1xf32> to vector<8x2x64xf32>
    %526 = arith.mulf %508, %525 : vector<8x2x64xf32>
    %cst_60 = arith.constant dense<0.000000e+00> : vector<2x64xf32>
    %527 = vector.multi_reduction <add>, %526, %cst_60 [0] : vector<8x2x64xf32> to vector<2x64xf32>
    %cst_61 = arith.constant 0.000000e+00 : f32
    %528 = vector.broadcast %cst_61 : f32 to vector<2x64xf32>
    %529 = arith.maximumf %527, %528 : vector<2x64xf32>
    %c0_62 = arith.constant 0 : index
    %c0_63 = arith.constant 0 : index
    %530 = vector.load %arg8[%c0_62, %c0_63] : memref<64x32xf32, #tpu.memory_space<vmem>>, vector<64x32xf32>
    %cst_64 = arith.constant dense<0.000000e+00> : vector<2x32xf32>
    %531 = tpu.matmul %529, %530, %cst_64 {dimension_numbers = #tpu.dot_dimension_numbers<[1], [0], [0], [1], [0, 0, 1, 1], [], []>} : vector<2x64xf32>, vector<64x32xf32>, vector<2x32xf32> -> vector<2x32xf32>
    %c0_65 = arith.constant 0 : index
    %c0_66 = arith.constant 0 : index
    %532 = vector.load %arg9[%c0_65, %c0_66] : memref<1x32xf32, #tpu.memory_space<vmem>>, vector<1x32xf32>
    %533 = vector.broadcast %532 : vector<1x32xf32> to vector<2x32xf32>
    %534 = arith.addf %531, %533 : vector<2x32xf32>
    %c0_67 = arith.constant 0 : index
    %c0_68 = arith.constant 0 : index
    %535 = vector.load %arg10[%c0_67, %c0_68] : memref<32x4xf32, #tpu.memory_space<vmem>>, vector<32x4xf32>
    %cst_69 = arith.constant dense<0.000000e+00> : vector<2x4xf32>
    %536 = tpu.matmul %534, %535, %cst_69 {dimension_numbers = #tpu.dot_dimension_numbers<[1], [0], [0], [1], [0, 0, 1, 1], [], []>} : vector<2x32xf32>, vector<32x4xf32>, vector<2x4xf32> -> vector<2x4xf32>
    %c0_70 = arith.constant 0 : index
    %c0_71 = arith.constant 0 : index
    %537 = vector.load %arg11[%c0_70, %c0_71] : memref<1x4xf32, #tpu.memory_space<vmem>>, vector<1x4xf32>
    %538 = vector.broadcast %537 : vector<1x4xf32> to vector<2x4xf32>
    %539 = arith.addf %536, %538 : vector<2x4xf32>
    %c0_72 = arith.constant 0 : index
    %c0_73 = arith.constant 0 : index
    %540 = vector.load %arg12[%c0_72, %c0_73] : memref<2x4xf32, #tpu.memory_space<vmem>>, vector<2x4xf32>
    tpu.vector_store %arg12[%c0_72, %c0_73], %539 {strides = array<i32>} : memref<2x4xf32, #tpu.memory_space<vmem>>, vector<2x4xf32>,
    return
  }
}

</mosaic_0001>

<bundles_post_ra>
// kernel: model_forward_pallas.1
= control target key start
LH: loop header
LB: loop body
LE: loop exit
PB: predicated region body
PF: predicated region fallthrough
CT: control target
= control target key end

     0   :  { %17 = vsyncpa [#allocation3], 0  ;;  %s4001_s0 = inlined_call_operand.vmem [shape: f32[8,2,16], index: 0, kind: input, shape index: {}]   ;;  %s4002_s1 = inlined_call_operand.vmem [shape: f32[16,256], index: 1, kind: input, shape index: {}]   ;;  %s4003_s2 = inlined_call_operand.vmem [shape: f32[64,256], index: 2, kind: input, shape index: {}]   ;;  %s4004_s3 = inlined_call_operand.vmem [shape: f32[1,256], index: 3, kind: input, shape index: {}]   ;;  %s4005_s4 = inlined_call_operand.hbm [shape: f32[64,256], index: 4, kind: input, shape index: {}]   ;;  %s4006_s5 = inlined_call_operand.hbm [shape: f32[64,256], index: 5, kind: input, shape index: {}]   ;;  %s4007_s6 = inlined_call_operand.vmem [shape: f32[1,256], index: 6, kind: input, shape index: {}]   ;;  %s4008_s7 = inlined_call_operand.vmem [shape: f32[1,64], index: 7, kind: input, shape index: {}]   ;;  %s4009_s8 = inlined_call_operand.vmem [shape: f32[64,32], index: 8, kind: input, shape index: {}]   ;;  %s4010_s9 = inlined_call_operand.vmem [shape: f32[1,32], index: 9, kind: input, shape index: {}]   ;;  %s4011_s10 = inlined_call_operand.vmem [shape: f32[32,4], index: 10, kind: input, shape index: {}]   ;;  %s4012_s11 = inlined_call_operand.vmem [shape: f32[1,4], index: 11, kind: input, shape index: {}]   ;;  %s4013_s12 = inlined_call_operand.hbm [shape: f32[2,4], index: 12, kind: output, shape index: {}]  }
   0x1   :  { %18 = vsyncpa [#allocation6], 0 }
   0x2   :  { %19 = vsyncpa [#allocation4], 0  ;;  %s32_s23 = sshll.u32 %s4005_s4, 4  ;;  %s2815_s24 = smov [#allocation2]   ;;  %s33_s23 = int_to_ptr.hbm [resolvable:$true] %s32_s23 }
   0x3   :  { %s34_s25 = sshll.u32 %s2815_s24, 4  ;;  %s45_s28 = sshll.u32 %s4006_s5, 4  ;;  %s35_s25 = int_to_ptr.vmem [resolvable:$true] %s34_s25  ;;  %s46_s28 = int_to_ptr.hbm [resolvable:$true] %s45_s28 }
   0x4   :  { %s2816_s29 = smov 256   ;;  %s2817_s30 = smov 16  }
   0x5   :  { %40 = dma.hbm_to_vmem [thread:$0]  %s33_s23, 2048, %s35_s25, [#allocation3], %s2816_s29, %s2816_s29, %s2817_s30  }
   0x6   :  { %s2818_s13 = smov [#allocation5]  }
   0x7   :  { %s47_s14 = sshll.u32 %s2818_s13, 4  ;;  %s48_s14 = int_to_ptr.vmem [resolvable:$true] %s47_s14 }
   0x8   :  { %53 = dma.hbm_to_vmem [thread:$0]  %s46_s28, 2048, %s48_s14, [#allocation6], %s2816_s29, %s2816_s29, %s2817_s30  }
   0x9   :  { %2809 = dma.done.wait [#allocation3], 2048  }
   0xa   :  { %2810 = vsyncadd [#allocation3], 4294965248 }
   0xb   :  { %2811 = dma.done.wait [#allocation6], 2048  }
   0xc   :  { %2812 = vsyncadd [#allocation6], 4294965248  ;;  %v115_v0 = vld [vmem:[%s4002_s1 + $0x18] sm:$0xff]  ;;  %v114_v1 = vld [vmem:[%s4002_s1 + $0x10] sm:$0xff]  ;;  %vm147_vm0 = vcmask 130048   ;;  %v2819_v30 = vmov 0.0   ;;  %v74_v40 = vlaneseq }
   0xd   :  { %v113_v2 = vld [vmem:[%s4002_s1 + $0x8] sm:$0xff]  ;;  %189 = vmatpush.msra.mxu1 %v115_v0  ;;  %166 = vmatpush.msra.mxu0 %v114_v1  ;;  %v104_v3 = vld [vmem:[%s4001_s0] sm:$0x3]  ;;  %v105_v4 = vld [vmem:[%s4001_s0 + $0x2] sm:$0x3]  ;;  %vm204_vm1 = vcmask 1041408  }
   0xe   :  { %v106_v5 = vld [vmem:[%s4001_s0 + $0x4] sm:$0x3]  ;;  %v107_v6 = vld [vmem:[%s4001_s0 + $0x6] sm:$0x3]  ;;  %130 = vst [vmem:[#allocation1] ss:$4 sm:$0xff] %v104_v3 }
   0xf   :  { %v112_v7 = vld [vmem:[%s4002_s1] sm:$0xff]  ;;  %v2920_v8 = vld [vmem:[%s4003_s2 + $0x70] sm:$0xff]  ;;  %190 = vmatpush.msra.mxu1 %v113_v2  ;;  %132 = vst [vmem:[#allocation1 + $0x1] ss:$4 sm:$0xff] %v105_v4  ;;  %v2925_v9 = vld [vmem:[%s4003_s2 + $0x78] sm:$0xff]  ;;  %v3102_v45 = vand.u32 127, %v74_v40 }
  0x10   :  { %167 = vmatpush.msra.mxu0 %v112_v7  ;;  %v2930_v10 = vld [vmem:[%s4003_s2 + $0x60] sm:$0xff]  ;;  %v2935_v11 = vld [vmem:[%s4003_s2 + $0x68] sm:$0xff]  ;;  %134 = vst [vmem:[#allocation1 + $0x2] ss:$4 sm:$0xff] %v106_v5  ;;  %350 = vmatpush.msra.mxu2 %v2920_v8  ;;  %v2942_v12 = vld [vmem:[%s4003_s2 + $0x50] sm:$0xff]  ;;  %vm212_vm2 = vcmask 1045504  }
  0x11   :  { %370 = vmatpush.msra.mxu3 %v2925_v9  ;;  %v2947_v13 = vld [vmem:[%s4003_s2 + $0x58] sm:$0xff]  ;;  %v108_v14 = vld [vmem:[%s4001_s0 + $0x8] sm:$0x3]  ;;  %136 = vst [vmem:[#allocation1 + $0x3] ss:$4 sm:$0xff] %v107_v6  ;;  %471 = vmatpush.msrb.mxu1 %v2925_v9  ;;  %v2968_v18 = vld [vmem:[%s4003_s2 + $0x40] sm:$0xff] }
  0x12   :  { %v109_v15 = vld [vmem:[%s4001_s0 + $0xa] sm:$0x3]  ;;  %v110_v16 = vld [vmem:[%s4001_s0 + $0xc] sm:$0x3]  ;;  %451 = vmatpush.msrb.mxu0 %v2920_v8  ;;  %351 = vmatpush.msra.mxu2 %v2930_v10  ;;  %v111_v17 = vld [vmem:[%s4001_s0 + $0xe] sm:$0x3] }
  0x13   :  { %371 = vmatpush.msra.mxu3 %v2935_v11  ;;  %138 = vst [vmem:[#allocation1 + $0x20] ss:$4 sm:$0xff] %v108_v14  ;;  %v2973_v19 = vld [vmem:[%s4003_s2 + $0x48] sm:$0xff]  ;;  %472 = vmatpush.msrb.mxu1 %v2935_v11  ;;  %v2982_v20 = vld [vmem:[%s4003_s2 + $0x30] sm:$0xff]  ;;  %v2987_v21 = vld [vmem:[%s4003_s2 + $0x38] sm:$0xff]  ;;  %v76_v48 = vadd.s32 128, %v3102_v45 }
  0x14   :  { %140 = vst [vmem:[#allocation1 + $0x21] ss:$4 sm:$0xff] %v109_v15  ;;  %452 = vmatpush.msrb.mxu0 %v2930_v10  ;;  %352 = vmatpush.msra.mxu2 %v2942_v12  ;;  %v2996_v22 = vld [vmem:[%s4003_s2 + $0x20] sm:$0xff]  ;;  %v3001_v23 = vld [vmem:[%s4003_s2 + $0x28] sm:$0xff]  ;;  %v3012_v25 = vld [vmem:[%s4003_s2 + $0x10] sm:$0xff]  ;;  %vm206_vm3 = vcmask 1043458  }
  0x15   :  { %372 = vmatpush.msra.mxu3 %v2947_v13  ;;  %142 = vst [vmem:[#allocation1 + $0x22] ss:$4 sm:$0xff] %v110_v16  ;;  %473 = vmatpush.msrb.mxu1 %v2947_v13  ;;  %v3017_v26 = vld [vmem:[%s4003_s2 + $0x18] sm:$0xff]  ;;  %v3024_v27 = vld [vmem:[%s4003_s2] sm:$0xff]  ;;  %v3029_v28 = vld [vmem:[%s4003_s2 + $0x8] sm:$0xff]  ;;  %v88_v52 = vand.u32 63, %v76_v48 }
  0x16   :  { %144 = vst [vmem:[#allocation1 + $0x23] ss:$4 sm:$0xff] %v111_v17  ;;  %453 = vmatpush.msrb.mxu0 %v2942_v12  ;;  %353 = vmatpush.msra.mxu2 %v2968_v18  ;;  %v116_v31 = vld [vmem:[%s4004_s3] sm:$0x3]  ;;  %vm209_vm5 = vcmask 1045508   ;;  %s2820_s3 = smov 64  }
  0x17   :  { %373 = vmatpush.msra.mxu3 %v2973_v19  ;;  %474 = vmatpush.msrb.mxu1 %v2973_v19  ;;  %v119_v32 = vperm.slane %v116_v31, 1  ;;  %v118_v33 = vperm.slane %v116_v31, 0  ;;  %vm3112_vm4 = vcmp.lt.s32.totalorder %v88_v52, 32  ;;  %vm338_vm15 = vcmask 523264   ;;  %v3843_v54 = vld [vmem:[%s4008_s7] ss:$0 sm:$0xff] }
  0x18   :  { %454 = vmatpush.msrb.mxu0 %v2968_v18  ;;  %v145_v24 = vld.sshfl [vmem:[#allocation1] sm:$0xff pattern:$0x73625140]  ;;  %354 = vmatpush.msra.mxu2 %v2982_v20  ;;  %s2821_s30 = smov [#allocation7]   ;;  %s2420_s4 = sshll.u32 %s4013_s12, 4  ;;  %s2421_s4 = int_to_ptr.hbm [resolvable:$true] %s2420_s4 }
  0x19   :  { %374 = vmatpush.msra.mxu3 %v2987_v21  ;;  %2433 = vmatmul.msk.f32.vlgmr.msra.gmra.mxu1 %vm147_vm0, %v145_v24  ;;  %s2418_s13 = sshll.u32 %s2821_s30, 4  ;;  %s2419_s13 = int_to_ptr.vmem [resolvable:$true] %s2418_s13 }
  0x1a   :  { %2431 = vmatmul.msk.f32.vlgmr.msra.gmra.mxu0 %vm147_vm0, %v145_v24  ;;  %355 = vmatpush.msra.mxu2 %v2996_v22 }
  0x1b   :  { %375 = vmatpush.msra.mxu3 %v3001_v23  ;;  %475 = vmatpush.msrb.mxu1 %v2987_v21 }
  0x1c   :  { %455 = vmatpush.msrb.mxu0 %v2982_v20  ;;  %356 = vmatpush.msra.mxu2 %v3012_v25 }
  0x1d   :  { %376 = vmatpush.msra.mxu3 %v3017_v26  ;;  %476 = vmatpush.msrb.mxu1 %v3001_v23  ;;  %v146_v29 = vld.sshfl [vmem:[#allocation1 + $0x20] sm:$0xff pattern:$0x73625140] }
  0x1e   :  { %456 = vmatpush.msrb.mxu0 %v2996_v22  ;;  %357 = vmatpush.msra.mxu2 %v3024_v27 }
  0x1f   :  { %377 = vmatpush.msra.mxu3 %v3029_v28  ;;  %358 = vmatmul.f32.vlgmr.msra.gmra.mxu2 %v2819_v30 }
  0x20   :  { %378 = vmatmul.f32.vlgmr.msra.gmra.mxu3 %v2819_v30  ;;  %477 = vmatpush.msrb.mxu1 %v3017_v26 }
  0x21   :  { %457 = vmatpush.msrb.mxu0 %v3012_v25  ;;  %2434 = vmatmul.msk.f32.gmra.mxu1 %vm147_vm0, %v146_v29 }
  0x22   :  { %2432 = vmatmul.msk.f32.gmra.mxu0 %vm147_vm0, %v146_v29  ;;  %478 = vmatpush.msrb.mxu1 %v3029_v28 }
  0x23   :  { %458 = vmatpush.msrb.mxu0 %v3024_v27  ;;  %552 = vmatpush.msrb.mxu2 %v2920_v8 }
  0x24   :  { %572 = vmatpush.msrb.mxu3 %v2925_v9  ;;  %673 = vmatpush.msra.mxu1 %v2925_v9 }
  0x25   :  { %653 = vmatpush.msra.mxu0 %v2920_v8  ;;  %553 = vmatpush.msrb.mxu2 %v2930_v10 }
  0x26   :  { %573 = vmatpush.msrb.mxu3 %v2935_v11  ;;  %674 = vmatpush.msra.mxu1 %v2935_v11 }
  0x27   :  { %654 = vmatpush.msra.mxu0 %v2930_v10  ;;  %554 = vmatpush.msrb.mxu2 %v2942_v12 }
  0x28   :  { %574 = vmatpush.msrb.mxu3 %v2947_v13  ;;  %675 = vmatpush.msra.mxu1 %v2947_v13 }
  0x29   :  { %655 = vmatpush.msra.mxu0 %v2942_v12  ;;  %555 = vmatpush.msrb.mxu2 %v2968_v18 }
  0x2a   :  { %575 = vmatpush.msrb.mxu3 %v2973_v19  ;;  %676 = vmatpush.msra.mxu1 %v2973_v19 }
  0x2b   :  { %656 = vmatpush.msra.mxu0 %v2968_v18  ;;  %556 = vmatpush.msrb.mxu2 %v2982_v20 }
  0x2c   :  { %576 = vmatpush.msrb.mxu3 %v2987_v21  ;;  %677 = vmatpush.msra.mxu1 %v2987_v21 }
  0x2d   :  { %657 = vmatpush.msra.mxu0 %v2982_v20  ;;  %557 = vmatpush.msrb.mxu2 %v2996_v22 }
  0x2e   :  { %577 = vmatpush.msrb.mxu3 %v3001_v23  ;;  %678 = vmatpush.msra.mxu1 %v3001_v23 }
  0x2f   :  { %658 = vmatpush.msra.mxu0 %v2996_v22  ;;  %558 = vmatpush.msrb.mxu2 %v3012_v25 }
  0x30   :  { %578 = vmatpush.msrb.mxu3 %v3017_v26  ;;  %679 = vmatpush.msra.mxu1 %v3017_v26 }
  0x31   :  { %659 = vmatpush.msra.mxu0 %v3012_v25  ;;  %559 = vmatpush.msrb.mxu2 %v3024_v27 }
  0x32   :  { %579 = vmatpush.msrb.mxu3 %v3029_v28  ;;  %680 = vmatpush.msra.mxu1 %v3029_v28 }
  0x33   :  { %660 = vmatpush.msra.mxu0 %v3024_v27  ;;  %754 = vmatpush.msra.mxu2 %v2920_v8 }
  0x34   :  { %774 = vmatpush.msra.mxu3 %v2925_v9 }
  0x35   :  { %755 = vmatpush.msra.mxu2 %v2930_v10 }
  0x36   :  { %775 = vmatpush.msra.mxu3 %v2935_v11 }
  0x37   :  { %756 = vmatpush.msra.mxu2 %v2942_v12 }
  0x38   :  { %776 = vmatpush.msra.mxu3 %v2947_v13 }
  0x39   :  { %757 = vmatpush.msra.mxu2 %v2968_v18 }
  0x3a   :  { %777 = vmatpush.msra.mxu3 %v2973_v19 }
  0x3b   :  { %758 = vmatpush.msra.mxu2 %v2982_v20 }
  0x3c   :  { %778 = vmatpush.msra.mxu3 %v2987_v21 }
  0x3d   :  { %759 = vmatpush.msra.mxu2 %v2996_v22 }
  0x3e   :  { %779 = vmatpush.msra.mxu3 %v3001_v23 }
  0x3f   :  { %760 = vmatpush.msra.mxu2 %v3012_v25 }
  0x40   :  { %780 = vmatpush.msra.mxu3 %v3017_v26 }
  0x41   :  { %761 = vmatpush.msra.mxu2 %v3024_v27 }
  0x42   :  { %781 = vmatpush.msra.mxu3 %v3029_v28 }
  0x96   :  { %v192_v34 = vpop.f32.mrf.mxu1 }
  0x97   :  { %v169_v35 = vpop.f32.mrf.mxu0  ;;  %v193_v36 = vadd.f32 %v192_v34, %v119_v32 }
  0x98   :  { %v170_v37 = vadd.f32 %v169_v35, %v118_v33 }
  0x99   :  { %v202_v38 = vrot.slane %v193_v36, 6 }
  0x9b   :  { %v3099_v39 = vsel %vm204_vm1, %v170_v37, %v202_v38  ;;  %v207_v53 = vsel %vm206_vm3, %v170_v37, %v202_v38  ;;  %v210_v2 = vsel %vm209_vm5, %v170_v37, %v202_v38  ;;  %v213_v16 = vsel %vm212_vm2, %v202_v38, %v170_v37 }
  0x9c   :  { %226 = vst [vmem:[#allocation1] ss:$4 sm:$0xff] %v3099_v39  ;;  %v208_v55 = vrot.slane %v207_v53, 2  ;;  %v211_v3 = vrot.slane %v210_v2, 4  ;;  %v214_v17 = vrot.slane %v213_v16, 6 }
  0x9e   :  { %v195_v41 = vpop.f32.mrf.mxu1 }
  0x9f   :  { %v172_v42 = vpop.f32.mrf.mxu0  ;;  %v196_v43 = vadd.f32 %v195_v41, %v119_v32  ;;  %v81_v41 = vand.u32 63, %v3102_v45 }
  0xa0   :  { %v173_v44 = vadd.f32 %v172_v42, %v118_v33 }
  0xa1   :  { %v203_v46 = vrot.slane %v196_v43, 6  ;;  %vm3160_vm6 = vcmp.lt.s32.totalorder %v81_v41, 32 }
  0xa2   :  { %v359_v48 = vpop.f32.mrf.mxu2 }
  0xa3   :  { %v3105_v47 = vsel %vm212_vm2, %v203_v46, %v173_v44  ;;  %v227_v50 = vld.sshfl [vmem:[#allocation1] sm:$0xff pattern:$0x73625140]  ;;  %v228_v51 = vld.sshfl [vmem:[#allocation1 + $0x8] sm:$0xff pattern:$0x73625140]  ;;  %v379_v56 = vpop.f32.mrf.mxu3  ;;  %v218_v61 = vsel %vm209_vm5, %v173_v44, %v203_v46  ;;  %v216_v6 = vsel %vm206_vm3, %v173_v44, %v203_v46  ;;  %v215_v31 = vsel %vm204_vm1, %v173_v44, %v203_v46 }
  0xa4   :  { %v221_v49 = vrot.slane %v3105_v47, 6  ;;  %v219_v62 = vrot.slane %v218_v61, 4  ;;  %v217_v7 = vrot.slane %v216_v6, 2 }
  0xa6   :  { %231 = vst [vmem:[#allocation1] ss:$4 sm:$0xff] %v221_v49 }
  0xad   :  { %v232_v57 = vld.sshfl [vmem:[#allocation1] sm:$0xff pattern:$0x73625140]  ;;  %v233_v58 = vld.sshfl [vmem:[#allocation1 + $0x8] sm:$0xff pattern:$0x73625140] }
  0xae   :  { %238 = vst [vmem:[#allocation1] ss:$4 sm:$0xff] %v208_v55  ;;  %v237_v59 = vsel %vm3112_vm4, %v228_v51, %v233_v58  ;;  %v236_v46 = vsel %vm3160_vm6, %v227_v50, %v232_v57 }
  0xaf   :  { %v3118_v60 = vadd.f32 %v379_v56, %v237_v59  ;;  %v382_v51 = vadd.f32 %v359_v48, %v236_v46 }
  0xb1   :  { %2511 = vtanh.f32 %v3118_v60  ;;  %v2435_v52 = vmul.f32 -1.442695, %v382_v51 }
  0xb3   :  { %2513 = vpow2.f32 %v2435_v52 }
  0xb5   :  { %v3122_v63 = vld.sshfl [vmem:[#allocation1] sm:$0xff pattern:$0x73625140]  ;;  %v3124_v0 = vld.sshfl [vmem:[#allocation1 + $0x8] sm:$0xff pattern:$0x73625140] }
  0xb6   :  { %243 = vst [vmem:[#allocation1] ss:$4 sm:$0xff] %v219_v62 }
  0xb7   :  { %v2512_v1 = vpop.eup %2511 }
  0xb8   :  { %425 = vrot.lane.b32.xlu0 %v2512_v1, %s2820_s3 }
  0xb9   :  { %v2514_v61 = vpop.eup %2513 }
  0xba   :  { %v390_v1 = vadd.f32 1.0, %v2514_v61 }
  0xbc   :  { %2515 = vrcp.f32 %v390_v1  ;;  %vm397_vm8 = vweird.f32 %v390_v1 }
  0xbd   :  { %v3128_v4 = vld.sshfl [vmem:[#allocation1] sm:$0xff pattern:$0x73625140]  ;;  %v3130_v5 = vld.sshfl [vmem:[#allocation1 + $0x8] sm:$0xff pattern:$0x73625140] }
  0xbe   :  { %250 = vst [vmem:[#allocation1] ss:$4 sm:$0xff] %v211_v3 }
  0xc2   :  { %v2516_v57 = vpop.eup %2515 }
  0xc3   :  { %v393_v6 = vmul.f32 %v2516_v57, %v390_v1  ;;  %vm398_vm7 = vweird.f32 %v2516_v57 }
  0xc4   :  { %vm399_vm9 = vmor %vm397_vm8, %vm398_vm7 }
  0xc5   :  { %v3133_v14 = vld.sshfl [vmem:[#allocation1] sm:$0xff pattern:$0x73625140]  ;;  %v3135_v15 = vld.sshfl [vmem:[#allocation1 + $0x8] sm:$0xff pattern:$0x73625140] }
  0xc6   :  { %255 = vst [vmem:[#allocation1] ss:$4 sm:$0xff] %v217_v7 }
  0xcd   :  { %v3138_v24 = vld.sshfl [vmem:[#allocation1] sm:$0xff pattern:$0x73625140]  ;;  %v3140_v29 = vld.sshfl [vmem:[#allocation1 + $0x8] sm:$0xff pattern:$0x73625140] }
  0xce   :  { %262 = vst [vmem:[#allocation1] ss:$4 sm:$0xff] %v214_v17 }
  0xd5   :  { %v3143_v32 = vld.sshfl [vmem:[#allocation1] sm:$0xff pattern:$0x73625140]  ;;  %v3145_v33 = vld.sshfl [vmem:[#allocation1 + $0x8] sm:$0xff pattern:$0x73625140] }
  0xd6   :  { %267 = vst [vmem:[#allocation1] ss:$4 sm:$0xff] %v215_v31 }
  0xdd   :  { %v3147_v34 = vld.sshfl [vmem:[#allocation1] sm:$0xff pattern:$0x73625140]  ;;  %v3149_v35 = vld.sshfl [vmem:[#allocation1 + $0x8] sm:$0xff pattern:$0x73625140] }
  0xde   :  { %274 = vst [vmem:[#allocation1] ss:$4 sm:$0xff] %v215_v31  ;;  %v401_v31 = vand.u32 2147483647, %v390_v1 }
  0xe0   :  { %vm402_vm10 = vcmp.eq.f32.partialorder %v401_v31, 8.507059e+37 }
  0xe5   :  { %v3151_v36 = vld.sshfl [vmem:[#allocation1] sm:$0xff pattern:$0x73625140]  ;;  %v3153_v37 = vld.sshfl [vmem:[#allocation1 + $0x8] sm:$0xff pattern:$0x73625140] }
  0xe6   :  { %279 = vst [vmem:[#allocation1] ss:$4 sm:$0xff] %v214_v17  ;;  %v403_v17 = vand.u32 2147483648, %v390_v1  ;;  %v2436_v1 = vmul.f32 -1.442695, %v3118_v60 }
  0xe8   :  { %v404_v47 = vor.u32 1.1754944e-38, %v403_v17 }
  0xed   :  { %v3155_v38 = vld.sshfl [vmem:[#allocation1] sm:$0xff pattern:$0x73625140]  ;;  %v3157_v40 = vld.sshfl [vmem:[#allocation1 + $0x8] sm:$0xff pattern:$0x73625140] }
  0xee   :  { %286 = vst [vmem:[#allocation1] ss:$4 sm:$0xff] %v217_v7  ;;  %v394_v7 = vsub.f32 1.0, %v393_v6 }
  0xf5   :  { %v3164_v43 = vld.sshfl [vmem:[#allocation1] sm:$0xff pattern:$0x73625140]  ;;  %v3166_v44 = vld.sshfl [vmem:[#allocation1 + $0x8] sm:$0xff pattern:$0x73625140] }
  0xf6   :  { %291 = vst [vmem:[#allocation1] ss:$4 sm:$0xff] %v211_v3 }
  0xfd   :  { %v3170_v53 = vld.sshfl [vmem:[#allocation1] sm:$0xff pattern:$0x73625140]  ;;  %v3172_v56 = vld.sshfl [vmem:[#allocation1 + $0x8] sm:$0xff pattern:$0x73625140] }
  0xfe   :  { %298 = vst [vmem:[#allocation1] ss:$4 sm:$0xff] %v219_v62 }
 0x105   :  { %v3174_v58 = vld.sshfl [vmem:[#allocation1] sm:$0xff pattern:$0x73625140]  ;;  %v3176_v59 = vld.sshfl [vmem:[#allocation1 + $0x8] sm:$0xff pattern:$0x73625140] }
 0x106   :  { %303 = vst [vmem:[#allocation1] ss:$4 sm:$0xff] %v208_v55  ;;  %v395_v55 = vmul.f32 %v2516_v57, %v394_v7 }
 0x108   :  { %v396_v16 = vadd.f32 %v2516_v57, %v395_v55 }
 0x10a   :  { %v400_v41 = vsel %vm399_vm9, %v2516_v57, %v396_v16 }
 0x10b   :  { %v405_v46 = vsel %vm402_vm10, %v404_v47, %v400_v41 }
 0x10c   :  { %v423_v51 = vmul.f32 0.0, %v405_v46 }
 0x10d   :  { %v3178_v2 = vld.sshfl [vmem:[#allocation1] sm:$0xff pattern:$0x73625140]  ;;  %v3180_v50 = vld.sshfl [vmem:[#allocation1 + $0x8] sm:$0xff pattern:$0x73625140] }
 0x10e   :  { %310 = vst [vmem:[#allocation1] ss:$4 sm:$0xff] %v221_v49 }
 0x115   :  { %v3184_v3 = vld.sshfl [vmem:[#allocation1 + $0x8] sm:$0xff pattern:$0x73625140]  ;;  %v3186_v62 = vld.sshfl [vmem:[#allocation1] sm:$0xff pattern:$0x73625140] }
 0x116   :  { %315 = vst [vmem:[#allocation1] ss:$4 sm:$0xff] %v3099_v39 }
 0x12a   :  { %v426_v49 = vpop.permute.xlu0 %425 }
 0x12b   :  { %v428_v48 = vmul.f32 %v426_v49, %v405_v46 }
 0x12d   :  { %430 = vrot.lane.b32.xlu0 %v428_v48, %s2820_s3 }
 0x19f   :  { %v431_v52 = vpop.permute.xlu0 %430 }
 0x1a0   :  { %v3190_v39 = vadd.f32 %v431_v52, %v423_v51  ;;  %v249_v52 = vsel %vm3112_vm4, %v3124_v0, %v3130_v5 }
 0x1a2   :  { %2517 = vtanh.f32 %v3190_v39 }
 0x1a3   :  { %2519 = vpow2.f32 %v2436_v1 }
 0x1a8   :  { %v2518_v61 = vpop.eup %2517 }
 0x1a9   :  { %436 = vrot.lane.b32.xlu1 %v2518_v61, %s2820_s3  ;;  %v2520_v57 = vpop.eup %2519 }
 0x1aa   :  { %v391_v6 = vadd.f32 1.0, %v2520_v57 }
 0x1ac   :  { %2521 = vrcp.f32 %v391_v6  ;;  %v418_v41 = vand.u32 2147483648, %v391_v6  ;;  %vm412_vm12 = vweird.f32 %v391_v6  ;;  %v416_v47 = vand.u32 2147483647, %v391_v6 }
 0x1ae   :  { %v419_v46 = vor.u32 1.1754944e-38, %v418_v41  ;;  %vm417_vm14 = vcmp.eq.f32.partialorder %v416_v47, 8.507059e+37 }
 0x1b2   :  { %v2522_v7 = vpop.eup %2521 }
 0x1b3   :  { %v408_v55 = vmul.f32 %v2522_v7, %v391_v6  ;;  %vm413_vm11 = vweird.f32 %v2522_v7 }
 0x1b4   :  { %vm414_vm13 = vmor %vm412_vm12, %vm413_vm11 }
 0x1b5   :  { %v409_v16 = vsub.f32 1.0, %v408_v55 }
 0x1b7   :  { %v410_v17 = vmul.f32 %v2522_v7, %v409_v16 }
 0x1b9   :  { %v411_v31 = vadd.f32 %v2522_v7, %v410_v17 }
 0x1bb   :  { %v415_v49 = vsel %vm414_vm13, %v2522_v7, %v411_v31  ;;  %v248_v7 = vsel %vm3160_vm6, %v3122_v63, %v3128_v4 }
 0x1bc   :  { %v420_v48 = vsel %vm417_vm14, %v419_v46, %v415_v49 }
 0x21b   :  { %v437_v51 = vpop.permute.xlu1 %436 }
 0x21c   :  { %v3195_v60 = vmul.f32 %v437_v51, %v420_v48 }
 0x21e   :  { %2437 = vmatmul.msk.f32.vlgmr.msrb.gmra.mxu0 %vm338_vm15, %v3195_v60  ;;  %2438 = vmatmul.msk.f32.vlgmr.msrb.gmra.mxu1 %vm338_vm15, %v3195_v60 }
 0x21f   :  { %855 = vmatpush.msrb.mxu0 %v2920_v8  ;;  %875 = vmatpush.msrb.mxu1 %v2925_v9 }
 0x221   :  { %856 = vmatpush.msrb.mxu0 %v2930_v10  ;;  %876 = vmatpush.msrb.mxu1 %v2935_v11 }
 0x223   :  { %857 = vmatpush.msrb.mxu0 %v2942_v12  ;;  %877 = vmatpush.msrb.mxu1 %v2947_v13 }
 0x225   :  { %858 = vmatpush.msrb.mxu0 %v2968_v18  ;;  %878 = vmatpush.msrb.mxu1 %v2973_v19 }
 0x227   :  { %859 = vmatpush.msrb.mxu0 %v2982_v20  ;;  %879 = vmatpush.msrb.mxu1 %v2987_v21 }
 0x229   :  { %860 = vmatpush.msrb.mxu0 %v2996_v22  ;;  %880 = vmatpush.msrb.mxu1 %v3001_v23 }
 0x22b   :  { %861 = vmatpush.msrb.mxu0 %v3012_v25  ;;  %881 = vmatpush.msrb.mxu1 %v3017_v26 }
 0x22d   :  { %862 = vmatpush.msrb.mxu0 %v3024_v27  ;;  %882 = vmatpush.msrb.mxu1 %v3029_v28 }
 0x29b   :  { %v480_v61 = vpop.f32.mrf.mxu1  ;;  %v460_v6 = vpop.f32.mrf.mxu0 }
 0x29c   :  { %v484_v1 = vadd.f32 %v480_v61, %v249_v52  ;;  %v483_v55 = vadd.f32 %v460_v6, %v248_v7 }
 0x29e   :  { %2523 = vtanh.f32 %v484_v1  ;;  %v2439_v16 = vmul.f32 -1.442695, %v483_v55 }
 0x2a0   :  { %2525 = vpow2.f32 %v2439_v16  ;;  %v2440_v16 = vmul.f32 -1.442695, %v484_v1 }
 0x2a4   :  { %v2524_v57 = vpop.eup %2523 }
 0x2a5   :  { %526 = vrot.lane.b32.xlu1 %v2524_v57, %s2820_s3 }
 0x2a6   :  { %v2526_v17 = vpop.eup %2525 }
 0x2a7   :  { %v491_v31 = vadd.f32 1.0, %v2526_v17 }
 0x2a9   :  { %2527 = vrcp.f32 %v491_v31  ;;  %v504_v46 = vand.u32 2147483648, %v491_v31  ;;  %vm498_vm7 = vweird.f32 %v491_v31  ;;  %v502_v48 = vand.u32 2147483647, %v491_v31 }
 0x2ab   :  { %v505_v52 = vor.u32 1.1754944e-38, %v504_v46  ;;  %vm503_vm9 = vcmp.eq.f32.partialorder %v502_v48, 8.507059e+37 }
 0x2af   :  { %v2528_v41 = vpop.eup %2527 }
 0x2b0   :  { %v494_v0 = vmul.f32 %v2528_v41, %v491_v31  ;;  %vm499_vm0 = vweird.f32 %v2528_v41 }
 0x2b1   :  { %vm500_vm8 = vmor %vm498_vm7, %vm499_vm0 }
 0x2b2   :  { %v495_v5 = vsub.f32 1.0, %v494_v0 }
 0x2b4   :  { %v496_v47 = vmul.f32 %v2528_v41, %v495_v5 }
 0x2b6   :  { %v497_v49 = vadd.f32 %v2528_v41, %v496_v47 }
 0x2b8   :  { %v501_v51 = vsel %vm500_vm8, %v2528_v41, %v497_v49 }
 0x2b9   :  { %v506_v4 = vsel %vm503_vm9, %v505_v52, %v501_v51 }
 0x2ba   :  { %v524_v57 = vmul.f32 %v506_v4, %v3190_v39 }
 0x317   :  { %v527_v63 = vpop.permute.xlu1 %526 }
 0x318   :  { %v529_v61 = vmul.f32 %v527_v63, %v506_v4  ;;  %v261_v4 = vsel %vm3112_vm4, %v3135_v15, %v3140_v29 }
 0x31a   :  { %531 = vrot.lane.b32.xlu2 %v529_v61, %s2820_s3 }
 0x374   :  { %v532_v6 = vpop.permute.xlu2 %531 }
 0x375   :  { %v3228_v7 = vadd.f32 %v532_v6, %v524_v57 }
 0x377   :  { %2529 = vtanh.f32 %v3228_v7 }
 0x378   :  { %2531 = vpow2.f32 %v2440_v16  ;;  %v260_v16 = vsel %vm3160_vm6, %v3133_v14, %v3138_v24 }
 0x37d   :  { %v2530_v55 = vpop.eup %2529 }
 0x37e   :  { %537 = vrot.lane.b32.xlu2 %v2530_v55, %s2820_s3  ;;  %v2532_v17 = vpop.eup %2531 }
 0x37f   :  { %v492_v31 = vadd.f32 1.0, %v2532_v17 }
 0x381   :  { %2533 = vrcp.f32 %v492_v31  ;;  %v519_v39 = vand.u32 2147483648, %v492_v31  ;;  %vm513_vm11 = vweird.f32 %v492_v31  ;;  %v517_v46 = vand.u32 2147483647, %v492_v31 }
 0x383   :  { %v520_v51 = vor.u32 1.1754944e-38, %v519_v39  ;;  %vm518_vm13 = vcmp.eq.f32.partialorder %v517_v46, 8.507059e+37 }
 0x387   :  { %v2534_v41 = vpop.eup %2533 }
 0x388   :  { %v509_v0 = vmul.f32 %v2534_v41, %v492_v31  ;;  %vm514_vm10 = vweird.f32 %v2534_v41 }
 0x389   :  { %vm515_vm12 = vmor %vm513_vm11, %vm514_vm10 }
 0x38a   :  { %v510_v5 = vsub.f32 1.0, %v509_v0 }
 0x38c   :  { %v511_v47 = vmul.f32 %v2534_v41, %v510_v5 }
 0x38e   :  { %v512_v49 = vadd.f32 %v2534_v41, %v511_v47 }
 0x390   :  { %v516_v48 = vsel %vm515_vm12, %v2534_v41, %v512_v49 }
 0x391   :  { %v521_v52 = vsel %vm518_vm13, %v520_v51, %v516_v48 }
 0x3d8   :  { %v538_v63 = vpop.permute.xlu2 %537 }
 0x3d9   :  { %v3232_v1 = vmul.f32 %v538_v63, %v521_v52 }
 0x3db   :  { %2441 = vmatmul.msk.f32.vlgmr.msrb.gmra.mxu2 %vm338_vm15, %v3232_v1  ;;  %2442 = vmatmul.msk.f32.vlgmr.msrb.gmra.mxu3 %vm338_vm15, %v3232_v1 }
 0x3dc   :  { %956 = vmatpush.msrb.mxu2 %v2920_v8  ;;  %976 = vmatpush.msrb.mxu3 %v2925_v9 }
 0x3de   :  { %957 = vmatpush.msrb.mxu2 %v2930_v10  ;;  %977 = vmatpush.msrb.mxu3 %v2935_v11 }
 0x3e0   :  { %958 = vmatpush.msrb.mxu2 %v2942_v12  ;;  %978 = vmatpush.msrb.mxu3 %v2947_v13 }
 0x3e2   :  { %959 = vmatpush.msrb.mxu2 %v2968_v18  ;;  %979 = vmatpush.msrb.mxu3 %v2973_v19 }
 0x3e4   :  { %960 = vmatpush.msrb.mxu2 %v2982_v20  ;;  %980 = vmatpush.msrb.mxu3 %v2987_v21 }
 0x3e6   :  { %961 = vmatpush.msrb.mxu2 %v2996_v22  ;;  %981 = vmatpush.msrb.mxu3 %v3001_v23 }
 0x3e8   :  { %962 = vmatpush.msrb.mxu2 %v3012_v25  ;;  %982 = vmatpush.msrb.mxu3 %v3017_v26 }
 0x3ea   :  { %963 = vmatpush.msrb.mxu2 %v3024_v27  ;;  %983 = vmatpush.msrb.mxu3 %v3029_v28 }
 0x45e   :  { %v581_v61 = vpop.f32.mrf.mxu3  ;;  %v561_v55 = vpop.f32.mrf.mxu2 }
 0x45f   :  { %v585_v57 = vadd.f32 %v581_v61, %v261_v4  ;;  %v584_v17 = vadd.f32 %v561_v55, %v260_v16 }
 0x461   :  { %2535 = vtanh.f32 %v585_v57  ;;  %v2443_v31 = vmul.f32 -1.442695, %v584_v17  ;;  %v2444_v55 = vmul.f32 -1.442695, %v585_v57 }
 0x463   :  { %2537 = vpow2.f32 %v2443_v31 }
 0x467   :  { %v2536_v6 = vpop.eup %2535 }
 0x468   :  { %627 = vrot.lane.b32.xlu0 %v2536_v6, %s2820_s3 }
 0x469   :  { %v2538_v41 = vpop.eup %2537 }
 0x46a   :  { %v592_v0 = vadd.f32 1.0, %v2538_v41 }
 0x46c   :  { %2539 = vrcp.f32 %v592_v0  ;;  %v605_v39 = vand.u32 2147483648, %v592_v0  ;;  %vm599_vm0 = vweird.f32 %v592_v0  ;;  %v603_v46 = vand.u32 2147483647, %v592_v0 }
 0x46e   :  { %v606_v51 = vor.u32 1.1754944e-38, %v605_v39  ;;  %vm604_vm8 = vcmp.eq.f32.partialorder %v603_v46, 8.507059e+37 }
 0x472   :  { %v2540_v5 = vpop.eup %2539 }
 0x473   :  { %v595_v15 = vmul.f32 %v2540_v5, %v592_v0  ;;  %vm600_vm14 = vweird.f32 %v2540_v5 }
 0x474   :  { %vm601_vm7 = vmor %vm599_vm0, %vm600_vm14 }
 0x475   :  { %v596_v29 = vsub.f32 1.0, %v595_v15 }
 0x477   :  { %v597_v47 = vmul.f32 %v2540_v5, %v596_v29 }
 0x479   :  { %v598_v49 = vadd.f32 %v2540_v5, %v597_v47 }
 0x47b   :  { %v602_v48 = vsel %vm601_vm7, %v2540_v5, %v598_v49 }
 0x47c   :  { %v607_v24 = vsel %vm604_vm8, %v606_v51, %v602_v48 }
 0x47d   :  { %v625_v63 = vmul.f32 %v607_v24, %v3228_v7 }
 0x4da   :  { %v628_v14 = vpop.permute.xlu0 %627 }
 0x4db   :  { %v630_v52 = vmul.f32 %v628_v14, %v607_v24 }
 0x4dd   :  { %632 = vrot.lane.b32.xlu1 %v630_v52, %s2820_s3 }
 0x54f   :  { %v633_v4 = vpop.permute.xlu1 %632 }
 0x550   :  { %v3265_v61 = vadd.f32 %v633_v4, %v625_v63 }
 0x552   :  { %2541 = vtanh.f32 %v3265_v61 }
 0x553   :  { %2543 = vpow2.f32 %v2444_v55 }
 0x558   :  { %v2542_v6 = vpop.eup %2541 }
 0x559   :  { %638 = vrot.lane.b32.xlu2 %v2542_v6, %s2820_s3  ;;  %v2544_v16 = vpop.eup %2543 }
 0x55a   :  { %v593_v17 = vadd.f32 1.0, %v2544_v16 }
 0x55c   :  { %2545 = vrcp.f32 %v593_v17  ;;  %v620_v7 = vand.u32 2147483648, %v593_v17  ;;  %vm614_vm10 = vweird.f32 %v593_v17  ;;  %v618_v29 = vand.u32 2147483647, %v593_v17 }
 0x55e   :  { %v621_v49 = vor.u32 1.1754944e-38, %v620_v7  ;;  %vm619_vm12 = vcmp.eq.f32.partialorder %v618_v29, 8.507059e+37 }
 0x562   :  { %v2546_v31 = vpop.eup %2545 }
 0x563   :  { %v610_v41 = vmul.f32 %v2546_v31, %v593_v17  ;;  %vm615_vm9 = vweird.f32 %v2546_v31 }
 0x564   :  { %vm616_vm11 = vmor %vm614_vm10, %vm615_vm9 }
 0x565   :  { %v611_v0 = vsub.f32 1.0, %v610_v41 }
 0x567   :  { %v612_v5 = vmul.f32 %v2546_v31, %v611_v0 }
 0x569   :  { %v613_v15 = vadd.f32 %v2546_v31, %v612_v5 }
 0x56b   :  { %v617_v47 = vsel %vm616_vm11, %v2546_v31, %v613_v15 }
 0x56c   :  { %v622_v39 = vsel %vm619_vm12, %v621_v49, %v617_v47 }
 0x5b3   :  { %v639_v46 = vpop.permute.xlu2 %638 }
 0x5b4   :  { %v3269_v57 = vmul.f32 %v639_v46, %v622_v39  ;;  %v285_v39 = vsel %vm3112_vm4, %v3153_v37, %v3157_v40 }
 0x5b6   :  { %2445 = vmatmul.msk.f32.vlgmr.msra.gmra.mxu0 %vm338_vm15, %v3269_v57  ;;  %2446 = vmatmul.msk.f32.vlgmr.msra.gmra.mxu1 %vm338_vm15, %v3269_v57 }
 0x5b7   :  { %1057 = vmatpush.msra.mxu0 %v2920_v8  ;;  %1077 = vmatpush.msra.mxu1 %v2925_v9  ;;  %v273_v8 = vsel %vm3112_vm4, %v3145_v33, %v3149_v35 }
 0x5b9   :  { %1058 = vmatpush.msra.mxu0 %v2930_v10  ;;  %1078 = vmatpush.msra.mxu1 %v2935_v11 }
 0x5bb   :  { %1059 = vmatpush.msra.mxu0 %v2942_v12  ;;  %1079 = vmatpush.msra.mxu1 %v2947_v13  ;;  %v272_v13 = vsel %vm3160_vm6, %v3143_v32, %v3147_v34 }
 0x5bd   :  { %1060 = vmatpush.msra.mxu0 %v2968_v18  ;;  %1080 = vmatpush.msra.mxu1 %v2973_v19 }
 0x5bf   :  { %1061 = vmatpush.msra.mxu0 %v2982_v20  ;;  %1081 = vmatpush.msra.mxu1 %v2987_v21 }
 0x5c1   :  { %1062 = vmatpush.msra.mxu0 %v2996_v22  ;;  %1082 = vmatpush.msra.mxu1 %v3001_v23 }
 0x5c3   :  { %1063 = vmatpush.msra.mxu0 %v3012_v25  ;;  %1083 = vmatpush.msra.mxu1 %v3017_v26 }
 0x5c5   :  { %1064 = vmatpush.msra.mxu0 %v3024_v27  ;;  %1084 = vmatpush.msra.mxu1 %v3029_v28 }
 0x633   :  { %v682_v9 = vpop.f32.mrf.mxu1  ;;  %v662_v12 = vpop.f32.mrf.mxu0 }
 0x634   :  { %v686_v10 = vadd.f32 %v682_v9, %v273_v8  ;;  %v685_v18 = vadd.f32 %v662_v12, %v272_v13 }
 0x636   :  { %2547 = vtanh.f32 %v686_v10  ;;  %v2447_v19 = vmul.f32 -1.442695, %v685_v18  ;;  %v2448_v4 = vmul.f32 -1.442695, %v686_v10 }
 0x638   :  { %2549 = vpow2.f32 %v2447_v19 }
 0x63c   :  { %v2548_v11 = vpop.eup %2547 }
 0x63d   :  { %728 = vrot.lane.b32.xlu0 %v2548_v11, %s2820_s3  ;;  %v284_v11 = vsel %vm3160_vm6, %v3151_v36, %v3155_v38 }
 0x63e   :  { %v2550_v20 = vpop.eup %2549 }
 0x63f   :  { %v693_v21 = vadd.f32 1.0, %v2550_v20 }
 0x641   :  { %2551 = vrcp.f32 %v693_v21  ;;  %v706_v28 = vand.u32 2147483648, %v693_v21  ;;  %vm700_vm14 = vweird.f32 %v693_v21  ;;  %v704_v33 = vand.u32 2147483647, %v693_v21 }
 0x643   :  { %v707_v48 = vor.u32 1.1754944e-38, %v706_v28  ;;  %vm705_vm7 = vcmp.eq.f32.partialorder %v704_v33, 8.507059e+37 }
 0x647   :  { %v2552_v22 = vpop.eup %2551 }
 0x648   :  { %v696_v23 = vmul.f32 %v2552_v22, %v693_v21  ;;  %vm701_vm13 = vweird.f32 %v2552_v22 }
 0x649   :  { %vm702_vm0 = vmor %vm700_vm14, %vm701_vm13 }
 0x64a   :  { %v697_v25 = vsub.f32 1.0, %v696_v23 }
 0x64c   :  { %v698_v26 = vmul.f32 %v2552_v22, %v697_v25 }
 0x64e   :  { %v699_v27 = vadd.f32 %v2552_v22, %v698_v26 }
 0x650   :  { %v703_v35 = vsel %vm702_vm0, %v2552_v22, %v699_v27 }
 0x651   :  { %v708_v34 = vsel %vm705_vm7, %v707_v48, %v703_v35 }
 0x652   :  { %v726_v14 = vmul.f32 %v708_v34, %v3265_v61 }
 0x6af   :  { %v729_v32 = vpop.permute.xlu0 %728 }
 0x6b0   :  { %v731_v51 = vmul.f32 %v729_v32, %v708_v34 }
 0x6b2   :  { %733 = vrot.lane.b32.xlu1 %v731_v51, %s2820_s3 }
 0x724   :  { %v734_v24 = vpop.permute.xlu1 %733 }
 0x725   :  { %v736_v52 = vadd.f32 %v734_v24, %v726_v14 }
 0x727   :  { %2553 = vtanh.f32 %v736_v52 }
 0x728   :  { %2555 = vpow2.f32 %v2448_v4 }
 0x72d   :  { %v2554_v63 = vpop.eup %2553 }
 0x72e   :  { %739 = vrot.lane.b32.xlu2 %v2554_v63, %s2820_s3  ;;  %v2556_v6 = vpop.eup %2555 }
 0x72f   :  { %v694_v55 = vadd.f32 1.0, %v2556_v6 }
 0x731   :  { %2557 = vrcp.f32 %v694_v55  ;;  %v721_v5 = vand.u32 2147483648, %v694_v55  ;;  %vm715_vm9 = vweird.f32 %v694_v55  ;;  %v719_v61 = vand.u32 2147483647, %v694_v55 }
 0x733   :  { %v722_v7 = vor.u32 1.1754944e-38, %v721_v5  ;;  %vm720_vm11 = vcmp.eq.f32.partialorder %v719_v61, 8.507059e+37 }
 0x737   :  { %v2558_v16 = vpop.eup %2557 }
 0x738   :  { %v711_v17 = vmul.f32 %v2558_v16, %v694_v55  ;;  %vm716_vm8 = vweird.f32 %v2558_v16 }
 0x739   :  { %vm717_vm10 = vmor %vm715_vm9, %vm716_vm8 }
 0x73a   :  { %v712_v31 = vsub.f32 1.0, %v711_v17 }
 0x73c   :  { %v713_v41 = vmul.f32 %v2558_v16, %v712_v31 }
 0x73e   :  { %v714_v0 = vadd.f32 %v2558_v16, %v713_v41 }
 0x740   :  { %v718_v15 = vsel %vm717_vm10, %v2558_v16, %v714_v0 }
 0x741   :  { %v723_v29 = vsel %vm720_vm11, %v722_v7, %v718_v15  ;;  %vm103_vm11 = vcmp.lt.s32.totalorder %v3102_v45, 32  ;;  %v3332_v7 = vld.sshfl [vmem:[#allocation1] sm:$0xff pattern:$0x73625140] }
 0x788   :  { %v740_v47 = vpop.permute.xlu2 %739 }
 0x789   :  { %v3303_v49 = vmul.f32 %v740_v47, %v723_v29  ;;  %v3334_v29 = vld.sshfl [vmem:[#allocation1 + $0x8] sm:$0xff pattern:$0x73625140]  ;;  %v297_v47 = vsel %vm3112_vm4, %v3166_v44, %v3172_v56 }
 0x78b   :  { %2449 = vmatmul.msk.f32.vlgmr.msra.gmra.mxu2 %vm338_vm15, %v3303_v49  ;;  %2450 = vmatmul.msk.f32.vlgmr.msra.gmra.mxu3 %vm338_vm15, %v3303_v49 }
 0x80e   :  { %v783_v46 = vpop.f32.mrf.mxu3  ;;  %v763_v10 = vpop.f32.mrf.mxu2 }
 0x80f   :  { %v787_v8 = vadd.f32 %v783_v46, %v285_v39  ;;  %v786_v12 = vadd.f32 %v763_v10, %v284_v11 }
 0x811   :  { %2559 = vtanh.f32 %v787_v8  ;;  %v2451_v13 = vmul.f32 -1.442695, %v786_v12  ;;  %v2452_v34 = vmul.f32 -1.442695, %v787_v8 }
 0x813   :  { %2561 = vpow2.f32 %v2451_v13 }
 0x817   :  { %v2560_v9 = vpop.eup %2559 }
 0x818   :  { %829 = vrot.lane.b32.xlu0 %v2560_v9, %s2820_s3  ;;  %v296_v9 = vsel %vm3160_vm6, %v3164_v43, %v3170_v53 }
 0x819   :  { %v2562_v18 = vpop.eup %2561 }
 0x81a   :  { %v794_v19 = vadd.f32 1.0, %v2562_v18 }
 0x81c   :  { %2563 = vrcp.f32 %v794_v19  ;;  %v807_v23 = vand.u32 2147483648, %v794_v19  ;;  %vm801_vm13 = vweird.f32 %v794_v19  ;;  %v805_v25 = vand.u32 2147483647, %v794_v19 }
 0x81e   :  { %v808_v27 = vor.u32 1.1754944e-38, %v807_v23  ;;  %vm806_vm0 = vcmp.eq.f32.partialorder %v805_v25, 8.507059e+37 }
 0x822   :  { %v2564_v20 = vpop.eup %2563 }
 0x823   :  { %v797_v37 = vmul.f32 %v2564_v20, %v794_v19  ;;  %vm802_vm12 = vweird.f32 %v2564_v20 }
 0x824   :  { %vm803_vm14 = vmor %vm801_vm13, %vm802_vm12 }
 0x825   :  { %v798_v40 = vsub.f32 1.0, %v797_v37 }
 0x827   :  { %v799_v21 = vmul.f32 %v2564_v20, %v798_v40 }
 0x829   :  { %v800_v22 = vadd.f32 %v2564_v20, %v799_v21 }
 0x82b   :  { %v804_v26 = vsel %vm803_vm14, %v2564_v20, %v800_v22 }
 0x82c   :  { %v809_v38 = vsel %vm806_vm0, %v808_v27, %v804_v26 }
 0x82d   :  { %v827_v33 = vmul.f32 %v809_v38, %v736_v52 }
 0x88a   :  { %v830_v36 = vpop.permute.xlu0 %829 }
 0x88b   :  { %v832_v28 = vmul.f32 %v830_v36, %v809_v38 }
 0x88d   :  { %834 = vrot.lane.b32.xlu1 %v832_v28, %s2820_s3 }
 0x8ff   :  { %v835_v35 = vpop.permute.xlu1 %834 }
 0x900   :  { %v3319_v48 = vadd.f32 %v835_v35, %v827_v33 }
 0x902   :  { %2565 = vtanh.f32 %v3319_v48 }
 0x903   :  { %2567 = vpow2.f32 %v2452_v34 }
 0x908   :  { %v2566_v32 = vpop.eup %2565 }
 0x909   :  { %840 = vrot.lane.b32.xlu2 %v2566_v32, %s2820_s3  ;;  %v2568_v51 = vpop.eup %2567 }
 0x90a   :  { %v795_v14 = vadd.f32 1.0, %v2568_v51 }
 0x90c   :  { %2569 = vrcp.f32 %v795_v14  ;;  %v822_v52 = vand.u32 2147483648, %v795_v14  ;;  %vm816_vm8 = vweird.f32 %v795_v14  ;;  %v820_v16 = vand.u32 2147483647, %v795_v14 }
 0x90e   :  { %v823_v31 = vor.u32 1.1754944e-38, %v822_v52  ;;  %vm821_vm10 = vcmp.eq.f32.partialorder %v820_v16, 8.507059e+37 }
 0x912   :  { %v2570_v24 = vpop.eup %2569 }
 0x913   :  { %v812_v63 = vmul.f32 %v2570_v24, %v795_v14  ;;  %vm817_vm7 = vweird.f32 %v2570_v24 }
 0x914   :  { %vm818_vm9 = vmor %vm816_vm8, %vm817_vm7 }
 0x915   :  { %v813_v4 = vsub.f32 1.0, %v812_v63 }
 0x917   :  { %v814_v6 = vmul.f32 %v2570_v24, %v813_v4 }
 0x919   :  { %v815_v55 = vadd.f32 %v2570_v24, %v814_v6 }
 0x91b   :  { %v819_v17 = vsel %vm818_vm9, %v2570_v24, %v815_v55 }
 0x91c   :  { %v824_v41 = vsel %vm821_vm10, %v823_v31, %v819_v17  ;;  %v309_v31 = vsel %vm3112_vm4, %v3176_v59, %v3180_v50 }
 0x963   :  { %v841_v0 = vpop.permute.xlu2 %840 }
 0x964   :  { %v843_v5 = vmul.f32 %v841_v0, %v824_v41 }
 0x966   :  { %v1152_v61 = vsel %vm103_vm11, %v3303_v49, %v843_v5  ;;  %v1153_v15 = vsel %vm103_vm11, %v843_v5, %v3303_v49  ;;  %2453 = vmatmul.msk.f32.vlgmr.msrb.gmra.mxu0 %vm338_vm15, %v843_v5  ;;  %2454 = vmatmul.msk.f32.vlgmr.msrb.gmra.mxu1 %vm338_vm15, %v843_v5 }
 0x967   :  { %1195 = vst [vmem:[#allocation1 + $0x20] ss:$4 sm:$0xff] %v1153_v15 }
 0x968   :  { %1193 = vst [vmem:[#allocation1 + $0x3] ss:$4 sm:$0xff] %v1152_v61 }
 0x9e3   :  { %v884_v39 = vpop.f32.mrf.mxu1  ;;  %v864_v49 = vpop.f32.mrf.mxu0 }
 0x9e4   :  { %v888_v46 = vadd.f32 %v884_v39, %v297_v47  ;;  %v887_v10 = vadd.f32 %v864_v49, %v296_v9 }
 0x9e6   :  { %2571 = vtanh.f32 %v888_v46  ;;  %v2455_v11 = vmul.f32 -1.442695, %v887_v10  ;;  %v2456_v38 = vmul.f32 -1.442695, %v888_v46 }
 0x9e8   :  { %2573 = vpow2.f32 %v2455_v11 }
 0x9ec   :  { %v2572_v8 = vpop.eup %2571 }
 0x9ed   :  { %930 = vrot.lane.b32.xlu0 %v2572_v8, %s2820_s3 }
 0x9ee   :  { %v2574_v12 = vpop.eup %2573 }
 0x9ef   :  { %v895_v13 = vadd.f32 1.0, %v2574_v12 }
 0x9f1   :  { %2575 = vrcp.f32 %v895_v13  ;;  %v908_v37 = vand.u32 2147483648, %v895_v13  ;;  %vm902_vm13 = vweird.f32 %v895_v13  ;;  %v906_v40 = vand.u32 2147483647, %v895_v13 }
 0x9f3   :  { %v909_v22 = vor.u32 1.1754944e-38, %v908_v37  ;;  %vm907_vm0 = vcmp.eq.f32.partialorder %v906_v40, 8.507059e+37 }
 0x9f7   :  { %v2576_v18 = vpop.eup %2575 }
 0x9f8   :  { %v898_v44 = vmul.f32 %v2576_v18, %v895_v13  ;;  %vm903_vm12 = vweird.f32 %v2576_v18 }
 0x9f9   :  { %vm904_vm14 = vmor %vm902_vm13, %vm903_vm12 }
 0x9fa   :  { %v899_v56 = vsub.f32 1.0, %v898_v44 }
 0x9fc   :  { %v900_v19 = vmul.f32 %v2576_v18, %v899_v56 }
 0x9fe   :  { %v901_v20 = vadd.f32 %v2576_v18, %v900_v19 }
 0xa00   :  { %v905_v21 = vsel %vm904_vm14, %v2576_v18, %v901_v20 }
 0xa01   :  { %v910_v53 = vsel %vm907_vm0, %v909_v22, %v905_v21 }
 0xa02   :  { %v928_v25 = vmul.f32 %v910_v53, %v3319_v48 }
 0xa5f   :  { %v931_v43 = vpop.permute.xlu0 %930 }
 0xa60   :  { %v933_v23 = vmul.f32 %v931_v43, %v910_v53 }
 0xa62   :  { %935 = vrot.lane.b32.xlu1 %v933_v23, %s2820_s3 }
 0xad4   :  { %v936_v26 = vpop.permute.xlu1 %935 }
 0xad5   :  { %v938_v27 = vadd.f32 %v936_v26, %v928_v25 }
 0xad7   :  { %2577 = vtanh.f32 %v938_v27 }
 0xad8   :  { %2579 = vpow2.f32 %v2456_v38 }
 0xadd   :  { %v2578_v36 = vpop.eup %2577 }
 0xade   :  { %941 = vrot.lane.b32.xlu2 %v2578_v36, %s2820_s3  ;;  %v2580_v28 = vpop.eup %2579 }
 0xadf   :  { %v896_v33 = vadd.f32 1.0, %v2580_v28 }
 0xae1   :  { %2581 = vrcp.f32 %v896_v33  ;;  %v923_v24 = vand.u32 2147483648, %v896_v33  ;;  %vm917_vm8 = vweird.f32 %v896_v33  ;;  %v921_v48 = vand.u32 2147483647, %v896_v33 }
 0xae3   :  { %v924_v4 = vor.u32 1.1754944e-38, %v923_v24  ;;  %vm922_vm10 = vcmp.eq.f32.partialorder %v921_v48, 8.507059e+37 }
 0xae7   :  { %v2582_v35 = vpop.eup %2581 }
 0xae8   :  { %v913_v32 = vmul.f32 %v2582_v35, %v896_v33  ;;  %vm918_vm7 = vweird.f32 %v2582_v35 }
 0xae9   :  { %vm919_vm9 = vmor %vm917_vm8, %vm918_vm7 }
 0xaea   :  { %v914_v34 = vsub.f32 1.0, %v913_v32 }
 0xaec   :  { %v915_v51 = vmul.f32 %v2582_v35, %v914_v34 }
 0xaee   :  { %v916_v14 = vadd.f32 %v2582_v35, %v915_v51  ;;  %v321_v51 = vsel %vm3112_vm4, %v3184_v3, %v3334_v29 }
 0xaf0   :  { %v920_v63 = vsel %vm919_vm9, %v2582_v35, %v916_v14 }
 0xaf1   :  { %v925_v6 = vsel %vm922_vm10, %v924_v4, %v920_v63 }
 0xb38   :  { %v942_v55 = vpop.permute.xlu2 %941 }
 0xb39   :  { %v944_v52 = vmul.f32 %v942_v55, %v925_v6 }
 0xb3b   :  { %v1151_v16 = vsel %vm103_vm11, %v3269_v57, %v944_v52  ;;  %v1154_v17 = vsel %vm103_vm11, %v944_v52, %v3269_v57  ;;  %2457 = vmatmul.msk.f32.vlgmr.msrb.gmra.mxu2 %vm338_vm15, %v944_v52  ;;  %2458 = vmatmul.msk.f32.vlgmr.msrb.gmra.mxu3 %vm338_vm15, %v944_v52  ;;  %v308_v57 = vsel %vm3160_vm6, %v3174_v58, %v3178_v2 }
 0xb3c   :  { %1197 = vst [vmem:[#allocation1 + $0x21] ss:$4 sm:$0xff] %v1154_v17 }
 0xb3d   :  { %1191 = vst [vmem:[#allocation1 + $0x2] ss:$4 sm:$0xff] %v1151_v16 }
 0xbbe   :  { %v985_v41 = vpop.f32.mrf.mxu3  ;;  %v965_v61 = vpop.f32.mrf.mxu2 }
 0xbbf   :  { %v989_v0 = vadd.f32 %v985_v41, %v309_v31  ;;  %v988_v15 = vadd.f32 %v965_v61, %v308_v57 }
 0xbc1   :  { %2583 = vtanh.f32 %v989_v0  ;;  %v2459_v47 = vmul.f32 -1.442695, %v988_v15  ;;  %v2460_v37 = vmul.f32 -1.442695, %v989_v0  ;;  %v1171_v15 = vld [vmem:[#allocation2 + $0x70] sm:$0xff] }
 0xbc2   :  { %1216 = vmatpush.msra.mxu2 %v1171_v15 }
 0xbc3   :  { %2585 = vpow2.f32 %v2459_v47  ;;  %v1172_v47 = vld [vmem:[#allocation2 + $0x78] sm:$0xff] }
 0xbc4   :  { %1239 = vmatpush.msra.mxu3 %v1172_v47 }
 0xbc7   :  { %v2584_v5 = vpop.eup %2583 }
 0xbc8   :  { %1031 = vrot.lane.b32.xlu0 %v2584_v5, %s2820_s3 }
 0xbc9   :  { %v2586_v39 = vpop.eup %2585 }
 0xbca   :  { %v996_v46 = vadd.f32 1.0, %v2586_v39  ;;  %v1169_v39 = vld [vmem:[#allocation2 + $0x60] sm:$0xff] }
 0xbcb   :  { %1217 = vmatpush.msra.mxu2 %v1169_v39 }
 0xbcc   :  { %2587 = vrcp.f32 %v996_v46  ;;  %v1009_v10 = vand.u32 2147483648, %v996_v46  ;;  %vm1003_vm13 = vweird.f32 %v996_v46  ;;  %v1007_v11 = vand.u32 2147483647, %v996_v46 }
 0xbce   :  { %v1010_v13 = vor.u32 1.1754944e-38, %v1009_v10  ;;  %vm1008_vm0 = vcmp.eq.f32.partialorder %v1007_v11, 8.507059e+37 }
 0xbd2   :  { %v2588_v8 = vpop.eup %2587 }
 0xbd3   :  { %v999_v59 = vmul.f32 %v2588_v8, %v996_v46  ;;  %vm1004_vm12 = vweird.f32 %v2588_v8  ;;  %v1170_v46 = vld [vmem:[#allocation2 + $0x68] sm:$0xff] }
 0xbd4   :  { %vm1005_vm14 = vmor %vm1003_vm13, %vm1004_vm12  ;;  %1240 = vmatpush.msra.mxu3 %v1170_v46 }
 0xbd5   :  { %v1000_v50 = vsub.f32 1.0, %v999_v59 }
 0xbd7   :  { %v1001_v49 = vmul.f32 %v2588_v8, %v1000_v50 }
 0xbd9   :  { %v1002_v9 = vadd.f32 %v2588_v8, %v1001_v49 }
 0xbdb   :  { %v1006_v12 = vsel %vm1005_vm14, %v2588_v8, %v1002_v9 }
 0xbdc   :  { %v1011_v2 = vsel %vm1008_vm0, %v1010_v13, %v1006_v12  ;;  %v1167_v12 = vld [vmem:[#allocation2 + $0x50] sm:$0xff]  ;;  %v1168_v13 = vld [vmem:[#allocation2 + $0x58] sm:$0xff] }
 0xbdd   :  { %v1029_v44 = vmul.f32 %v1011_v2, %v938_v27  ;;  %1218 = vmatpush.msra.mxu2 %v1167_v12  ;;  %1241 = vmatpush.msra.mxu3 %v1168_v13 }
 0xc3a   :  { %v1032_v58 = vpop.permute.xlu0 %1031 }
 0xc3b   :  { %v1034_v18 = vmul.f32 %v1032_v58, %v1011_v2  ;;  %v1165_v58 = vld [vmem:[#allocation2 + $0x40] sm:$0xff]  ;;  %v1166_v2 = vld [vmem:[#allocation2 + $0x48] sm:$0xff] }
 0xc3c   :  { %1219 = vmatpush.msra.mxu2 %v1165_v58  ;;  %1242 = vmatpush.msra.mxu3 %v1166_v2 }
 0xc3d   :  { %1036 = vrot.lane.b32.xlu1 %v1034_v18, %s2820_s3  ;;  %v1163_v18 = vld [vmem:[#allocation2 + $0x30] sm:$0xff] }
 0xc3e   :  { %1220 = vmatpush.msra.mxu2 %v1163_v18 }
 0xcaf   :  { %v1037_v56 = vpop.permute.xlu1 %1036 }
 0xcb0   :  { %v3366_v19 = vadd.f32 %v1037_v56, %v1029_v44  ;;  %v1164_v44 = vld [vmem:[#allocation2 + $0x38] sm:$0xff]  ;;  %v1161_v56 = vld [vmem:[#allocation2 + $0x20] sm:$0xff] }
 0xcb1   :  { %1243 = vmatpush.msra.mxu3 %v1164_v44  ;;  %1221 = vmatpush.msra.mxu2 %v1161_v56 }
 0xcb2   :  { %2589 = vtanh.f32 %v3366_v19 }
 0xcb3   :  { %2591 = vpow2.f32 %v2460_v37  ;;  %v1160_v37 = vld [vmem:[#allocation2 + $0x18] sm:$0xff] }
 0xcb8   :  { %v2590_v20 = vpop.eup %2589 }
 0xcb9   :  { %1042 = vrot.lane.b32.xlu2 %v2590_v20, %s2820_s3  ;;  %v2592_v40 = vpop.eup %2591  ;;  %v1159_v20 = vld [vmem:[#allocation2 + $0x10] sm:$0xff] }
 0xcba   :  { %v997_v21 = vadd.f32 1.0, %v2592_v40  ;;  %1222 = vmatpush.msra.mxu2 %v1159_v20 }
 0xcbc   :  { %2593 = vrcp.f32 %v997_v21  ;;  %v1024_v26 = vand.u32 2147483648, %v997_v21  ;;  %vm1018_vm8 = vweird.f32 %v997_v21  ;;  %v1022_v27 = vand.u32 2147483647, %v997_v21 }
 0xcbe   :  { %v1025_v38 = vor.u32 1.1754944e-38, %v1024_v26  ;;  %vm1023_vm10 = vcmp.eq.f32.partialorder %v1022_v27, 8.507059e+37  ;;  %v3396_v26 = vld [vmem:[#allocation5 + $0x78] sm:$0xff]  ;;  %v3398_v27 = vld [vmem:[#allocation5 + $0x60] sm:$0xff] }
 0xcbf   :  { %1414 = vmatpush.msrb.mxu1 %v3396_v26 }
 0xcc2   :  { %v2594_v22 = vpop.eup %2593 }
 0xcc3   :  { %v1014_v43 = vmul.f32 %v2594_v22, %v997_v21  ;;  %vm1019_vm7 = vweird.f32 %v2594_v22  ;;  %v1157_v21 = vld [vmem:[#allocation2] sm:$0xff] }
 0xcc4   :  { %vm1020_vm9 = vmor %vm1018_vm8, %vm1019_vm7  ;;  %1223 = vmatpush.msra.mxu2 %v1157_v21 }
 0xcc5   :  { %v1015_v53 = vsub.f32 1.0, %v1014_v43 }
 0xcc7   :  { %v1016_v23 = vmul.f32 %v2594_v22, %v1015_v53 }
 0xcc9   :  { %v1017_v25 = vadd.f32 %v2594_v22, %v1016_v23 }
 0xccb   :  { %v1021_v36 = vsel %vm1020_vm9, %v2594_v22, %v1017_v25  ;;  %v1158_v22 = vld [vmem:[#allocation2 + $0x8] sm:$0xff]  ;;  %v3394_v25 = vld [vmem:[#allocation5 + $0x70] sm:$0xff] }
 0xccc   :  { %v1026_v28 = vsel %vm1023_vm10, %v1025_v38, %v1021_v36  ;;  %1394 = vmatpush.msrb.mxu0 %v3394_v25  ;;  %v3402_v36 = vld [vmem:[#allocation5 + $0x68] sm:$0xff]  ;;  %v3404_v38 = vld [vmem:[#allocation5 + $0x50] sm:$0xff]  ;;  %1495 = vmatpush.msrb.mxu2 %v3394_v25 }
 0xccd   :  { %1415 = vmatpush.msrb.mxu1 %v3402_v36 }
 0xcce   :  { %1395 = vmatpush.msrb.mxu0 %v3398_v27  ;;  %1496 = vmatpush.msrb.mxu2 %v3398_v27 }
 0xcd0   :  { %1396 = vmatpush.msrb.mxu0 %v3404_v38  ;;  %1497 = vmatpush.msrb.mxu2 %v3404_v38 }
 0xd13   :  { %v1043_v33 = vpop.permute.xlu2 %1042 }
 0xd14   :  { %v1045_v35 = vmul.f32 %v1043_v33, %v1026_v28  ;;  %v3406_v28 = vld [vmem:[#allocation5 + $0x58] sm:$0xff] }
 0xd15   :  { %1416 = vmatpush.msrb.mxu1 %v3406_v28 }
 0xd16   :  { %v1150_v32 = vsel %vm103_vm11, %v3232_v1, %v1045_v35  ;;  %v1155_v34 = vsel %vm103_vm11, %v1045_v35, %v3232_v1  ;;  %2461 = vmatmul.msk.f32.vlgmr.msra.gmra.mxu0 %vm338_vm15, %v1045_v35  ;;  %2462 = vmatmul.msk.f32.vlgmr.msra.gmra.mxu1 %vm338_vm15, %v1045_v35  ;;  %v320_v1 = vsel %vm3160_vm6, %v3186_v62, %v3332_v7  ;;  %v3412_v35 = vld [vmem:[#allocation5 + $0x40] sm:$0xff] }
 0xd17   :  { %1199 = vst [vmem:[#allocation1 + $0x22] ss:$4 sm:$0xff] %v1155_v34  ;;  %1397 = vmatpush.msrb.mxu0 %v3412_v35  ;;  %1498 = vmatpush.msrb.mxu2 %v3412_v35 }
 0xd18   :  { %1189 = vst [vmem:[#allocation1 + $0x1] ss:$4 sm:$0xff] %v1150_v32  ;;  %v3414_v32 = vld [vmem:[#allocation5 + $0x48] sm:$0xff] }
 0xd19   :  { %1417 = vmatpush.msrb.mxu1 %v3414_v32 }
 0xd93   :  { %v1086_v14 = vpop.f32.mrf.mxu1  ;;  %v1066_v63 = vpop.f32.mrf.mxu0 }
 0xd94   :  { %v1090_v24 = vadd.f32 %v1086_v14, %v321_v51  ;;  %v1089_v4 = vadd.f32 %v1066_v63, %v320_v1  ;;  %v3423_v14 = vld [vmem:[#allocation5 + $0x30] sm:$0xff]  ;;  %v3437_v1 = vld [vmem:[#allocation5 + $0x20] sm:$0xff] }
 0xd95   :  { %1398 = vmatpush.msrb.mxu0 %v3423_v14  ;;  %1499 = vmatpush.msrb.mxu2 %v3423_v14 }
 0xd96   :  { %2595 = vtanh.f32 %v1090_v24  ;;  %v2463_v6 = vmul.f32 -1.442695, %v1089_v4  ;;  %v2464_v9 = vmul.f32 -1.442695, %v1090_v24  ;;  %v3425_v24 = vld [vmem:[#allocation5 + $0x38] sm:$0xff]  ;;  %v3439_v4 = vld [vmem:[#allocation5 + $0x28] sm:$0xff] }
 0xd97   :  { %1418 = vmatpush.msrb.mxu1 %v3425_v24  ;;  %1399 = vmatpush.msrb.mxu0 %v3437_v1 }
 0xd98   :  { %2597 = vpow2.f32 %v2463_v6  ;;  %1500 = vmatpush.msrb.mxu2 %v3437_v1 }
 0xd99   :  { %1419 = vmatpush.msrb.mxu1 %v3439_v4 }
 0xd9c   :  { %v2596_v48 = vpop.eup %2595 }
 0xd9d   :  { %1132 = vrot.lane.b32.xlu0 %v2596_v48, %s2820_s3 }
 0xd9e   :  { %v2598_v55 = vpop.eup %2597 }
 0xd9f   :  { %v1097_v52 = vadd.f32 1.0, %v2598_v55  ;;  %v3445_v55 = vld [vmem:[#allocation5 + $0x10] sm:$0xff] }
 0xda0   :  { %1400 = vmatpush.msrb.mxu0 %v3445_v55  ;;  %1501 = vmatpush.msrb.mxu2 %v3445_v55 }
 0xda1   :  { %2599 = vrcp.f32 %v1097_v52  ;;  %v1110_v41 = vand.u32 2147483648, %v1097_v52  ;;  %vm1104_vm13 = vweird.f32 %v1097_v52  ;;  %v1108_v0 = vand.u32 2147483647, %v1097_v52 }
 0xda3   :  { %v1111_v61 = vor.u32 1.1754944e-38, %v1110_v41  ;;  %vm1109_vm0 = vcmp.eq.f32.partialorder %v1108_v0, 8.507059e+37 }
 0xda7   :  { %v2600_v16 = vpop.eup %2599 }
 0xda8   :  { %v1100_v3 = vmul.f32 %v2600_v16, %v1097_v52  ;;  %vm1105_vm12 = vweird.f32 %v2600_v16  ;;  %v3447_v52 = vld [vmem:[#allocation5 + $0x18] sm:$0xff] }
 0xda9   :  { %vm1106_vm14 = vmor %vm1104_vm13, %vm1105_vm12  ;;  %1420 = vmatpush.msrb.mxu1 %v3447_v52 }
 0xdaa   :  { %v1101_v29 = vsub.f32 1.0, %v1100_v3 }
 0xdac   :  { %v1102_v17 = vmul.f32 %v2600_v16, %v1101_v29 }
 0xdae   :  { %v1103_v31 = vadd.f32 %v2600_v16, %v1102_v17  ;;  %v3453_v17 = vld [vmem:[#allocation5] sm:$0xff] }
 0xdaf   :  { %1401 = vmatpush.msrb.mxu0 %v3453_v17  ;;  %1502 = vmatpush.msrb.mxu2 %v3453_v17 }
 0xdb0   :  { %v1107_v5 = vsel %vm1106_vm14, %v2600_v16, %v1103_v31  ;;  %v3455_v31 = vld [vmem:[#allocation5 + $0x8] sm:$0xff]  ;;  %1402 = vmatmul.f32.vlgmr.msrb.gmra.mxu0 %v2819_v30 }
 0xdb1   :  { %v1112_v7 = vsel %vm1109_vm0, %v1111_v61, %v1107_v5  ;;  %1421 = vmatpush.msrb.mxu1 %v3455_v31  ;;  %1596 = vmatpush.msra.mxu0 %v3394_v25  ;;  %v1173_v5 = vld [vmem:[%s4007_s6] sm:$0x3] }
 0xdb2   :  { %v1130_v8 = vmul.f32 %v1112_v7, %v3366_v19  ;;  %v1162_v19 = vld [vmem:[#allocation2 + $0x28] sm:$0xff]  ;;  %1422 = vmatmul.f32.vlgmr.msrb.gmra.mxu1 %v2819_v30  ;;  %v1176_v61 = vperm.slane %v1173_v5, 1 }
 0xdb3   :  { %1244 = vmatpush.msra.mxu3 %v1162_v19  ;;  %1616 = vmatpush.msra.mxu1 %v3396_v26 }
 0xdb4   :  { %1597 = vmatpush.msra.mxu0 %v3398_v27 }
 0xdb5   :  { %1245 = vmatpush.msra.mxu3 %v1160_v37  ;;  %1617 = vmatpush.msra.mxu1 %v3402_v36 }
 0xdb6   :  { %1598 = vmatpush.msra.mxu0 %v3404_v38 }
 0xdb7   :  { %1246 = vmatpush.msra.mxu3 %v1158_v22  ;;  %1618 = vmatpush.msra.mxu1 %v3406_v28 }
 0xdb8   :  { %1599 = vmatpush.msra.mxu0 %v3412_v35 }
 0xdb9   :  { %1515 = vmatpush.msrb.mxu3 %v3396_v26  ;;  %1619 = vmatpush.msra.mxu1 %v3414_v32 }
 0xdba   :  { %1600 = vmatpush.msra.mxu0 %v3423_v14 }
 0xdbb   :  { %1516 = vmatpush.msrb.mxu3 %v3402_v36  ;;  %1620 = vmatpush.msra.mxu1 %v3425_v24 }
 0xdbc   :  { %1601 = vmatpush.msra.mxu0 %v3437_v1 }
 0xdbd   :  { %1517 = vmatpush.msrb.mxu3 %v3406_v28  ;;  %1621 = vmatpush.msra.mxu1 %v3439_v4 }
 0xdbe   :  { %1602 = vmatpush.msra.mxu0 %v3445_v55 }
 0xdbf   :  { %1518 = vmatpush.msrb.mxu3 %v3414_v32  ;;  %1622 = vmatpush.msra.mxu1 %v3447_v52 }
 0xdc0   :  { %1603 = vmatpush.msra.mxu0 %v3453_v17 }
 0xdc1   :  { %1519 = vmatpush.msrb.mxu3 %v3425_v24  ;;  %1623 = vmatpush.msra.mxu1 %v3455_v31 }
 0xdc2   :  { %1798 = vmatpush.msrb.mxu0 %v3394_v25 }
 0xdc3   :  { %1520 = vmatpush.msrb.mxu3 %v3439_v4  ;;  %1818 = vmatpush.msrb.mxu1 %v3396_v26 }
 0xdc4   :  { %1799 = vmatpush.msrb.mxu0 %v3398_v27 }
 0xdc5   :  { %1521 = vmatpush.msrb.mxu3 %v3447_v52  ;;  %1819 = vmatpush.msrb.mxu1 %v3402_v36 }
 0xdc6   :  { %1800 = vmatpush.msrb.mxu0 %v3404_v38 }
 0xdc7   :  { %1522 = vmatpush.msrb.mxu3 %v3455_v31  ;;  %1820 = vmatpush.msrb.mxu1 %v3406_v28 }
 0xdc8   :  { %1801 = vmatpush.msrb.mxu0 %v3412_v35 }
 0xdc9   :  { %1821 = vmatpush.msrb.mxu1 %v3414_v32 }
 0xdca   :  { %1802 = vmatpush.msrb.mxu0 %v3423_v14 }
 0xdcb   :  { %1822 = vmatpush.msrb.mxu1 %v3425_v24 }
 0xdcc   :  { %1803 = vmatpush.msrb.mxu0 %v3437_v1 }
 0xdcd   :  { %1823 = vmatpush.msrb.mxu1 %v3439_v4 }
 0xdce   :  { %1804 = vmatpush.msrb.mxu0 %v3445_v55 }
 0xdcf   :  { %1824 = vmatpush.msrb.mxu1 %v3447_v52 }
 0xdd0   :  { %1805 = vmatpush.msrb.mxu0 %v3453_v17 }
 0xdd1   :  { %1825 = vmatpush.msrb.mxu1 %v3455_v31 }
 0xe0f   :  { %v1133_v62 = vpop.permute.xlu0 %1132 }
 0xe10   :  { %v1135_v57 = vmul.f32 %v1133_v62, %v1112_v7  ;;  %v1175_v62 = vperm.slane %v1173_v5, 0 }
 0xe12   :  { %1137 = vrot.lane.b32.xlu1 %v1135_v57, %s2820_s3 }
 0xe2f   :  { %v1423_v18 = vpop.f32.mrf.mxu1 }
 0xe84   :  { %v1138_v59 = vpop.permute.xlu1 %1137 }
 0xe85   :  { %v1140_v50 = vadd.f32 %v1138_v59, %v1130_v8 }
 0xe87   :  { %2601 = vtanh.f32 %v1140_v50 }
 0xe88   :  { %2603 = vpow2.f32 %v2464_v9 }
 0xe8d   :  { %v2602_v49 = vpop.eup %2601 }
 0xe8e   :  { %1143 = vrot.lane.b32.xlu2 %v2602_v49, %s2820_s3  ;;  %v2604_v10 = vpop.eup %2603 }
 0xe8f   :  { %v3390_v11 = vadd.f32 1.0, %v2604_v10 }
 0xe91   :  { %2605 = vrcp.f32 %v3390_v11  ;;  %v1125_v34 = vand.u32 2147483648, %v3390_v11  ;;  %vm1119_vm8 = vweird.f32 %v3390_v11  ;;  %v1123_v51 = vand.u32 2147483647, %v3390_v11 }
 0xe93   :  { %v1126_v6 = vor.u32 1.1754944e-38, %v1125_v34  ;;  %vm1124_vm10 = vcmp.eq.f32.partialorder %v1123_v51, 8.507059e+37 }
 0xe97   :  { %v2606_v40 = vpop.eup %2605 }
 0xe98   :  { %v1115_v43 = vmul.f32 %v2606_v40, %v3390_v11  ;;  %vm1120_vm7 = vweird.f32 %v2606_v40 }
 0xe99   :  { %vm3429_vm9 = vmor %vm1119_vm8, %vm1120_vm7 }
 0xe9a   :  { %v1116_v53 = vsub.f32 1.0, %v1115_v43 }
 0xe9c   :  { %v1117_v23 = vmul.f32 %v2606_v40, %v1116_v53 }
 0xe9e   :  { %v1118_v33 = vadd.f32 %v2606_v40, %v1117_v23 }
 0xea0   :  { %v1122_v63 = vsel %vm3429_vm9, %v2606_v40, %v1118_v33 }
 0xea1   :  { %v1127_v16 = vsel %vm1124_vm10, %v1126_v6, %v1122_v63 }
 0xee8   :  { %v1144_v3 = vpop.permute.xlu2 %1143 }
 0xee9   :  { %v1146_v29 = vmul.f32 %v1144_v3, %v1127_v16 }
 0xeeb   :  { %v1149_v41 = vsel %vm103_vm11, %v3195_v60, %v1146_v29  ;;  %v1156_v0 = vsel %vm103_vm11, %v1146_v29, %v3195_v60 }
 0xeec   :  { %1201 = vst [vmem:[#allocation1 + $0x23] ss:$4 sm:$0xff] %v1156_v0 }
 0xeed   :  { %1187 = vst [vmem:[#allocation1] ss:$4 sm:$0xff] %v1149_v41 }
 0xef3   :  { %v1203_v30 = vld.sshfl [vmem:[#allocation1 + $0x20] sm:$0xff pattern:$0x73625140] }
 0xef4   :  { %v1202_v60 = vld.sshfl [vmem:[#allocation1] sm:$0xff pattern:$0x73625140] }
 0xef5   :  { %2465 = vmatmul.msk.f32.vlgmr.msra.gmra.mxu2 %vm338_vm15, %v1202_v60  ;;  %2467 = vmatmul.msk.f32.vlgmr.msra.gmra.mxu3 %vm338_vm15, %v1202_v60 }
 0xef6   :  { %1697 = vmatpush.msra.mxu2 %v3394_v25  ;;  %1717 = vmatpush.msra.mxu3 %v3396_v26 }
 0xef8   :  { %1698 = vmatpush.msra.mxu2 %v3398_v27  ;;  %1718 = vmatpush.msra.mxu3 %v3402_v36 }
 0xefa   :  { %1699 = vmatpush.msra.mxu2 %v3404_v38  ;;  %1719 = vmatpush.msra.mxu3 %v3406_v28 }
 0xefc   :  { %1700 = vmatpush.msra.mxu2 %v3412_v35  ;;  %1720 = vmatpush.msra.mxu3 %v3414_v32 }
 0xefd   :  { %2466 = vmatmul.msk.f32.gmra.mxu2 %vm338_vm15, %v1203_v30  ;;  %2468 = vmatmul.msk.f32.gmra.mxu3 %vm338_vm15, %v1203_v30 }
 0xefe   :  { %1701 = vmatpush.msra.mxu2 %v3423_v14  ;;  %1721 = vmatpush.msra.mxu3 %v3425_v24 }
 0xf00   :  { %1702 = vmatpush.msra.mxu2 %v3437_v1  ;;  %1722 = vmatpush.msra.mxu3 %v3439_v4 }
 0xf02   :  { %1703 = vmatpush.msra.mxu2 %v3445_v55  ;;  %1723 = vmatpush.msra.mxu3 %v3447_v52 }
 0xf04   :  { %1704 = vmatpush.msra.mxu2 %v3453_v17  ;;  %1724 = vmatpush.msra.mxu3 %v3455_v31 }
 0xf78   :  { %v1225_v7 = vpop.f32.mrf.mxu2  ;;  %v1248_v57 = vpop.f32.mrf.mxu3 }
 0xf79   :  { %v1249_v15 = vadd.f32 %v1248_v57, %v1176_v61  ;;  %v1226_v47 = vadd.f32 %v1225_v7, %v1175_v62 }
 0xf7b   :  { %v1258_v39 = vrot.slane %v1249_v15, 6 }
 0xf7d   :  { %v3531_v46 = vsel %vm204_vm1, %v1226_v47, %v1258_v39  ;;  %v3541_v58 = vsel %vm206_vm3, %v1226_v47, %v1258_v39  ;;  %v1263_v53 = vsel %vm209_vm5, %v1226_v47, %v1258_v39  ;;  %v1265_v16 = vsel %vm212_vm2, %v1258_v39, %v1226_v47 }
 0xf7e   :  { %1274 = vst [vmem:[#allocation1] ss:$4 sm:$0xff] %v3531_v46  ;;  %v1262_v2 = vrot.slane %v3541_v58, 2  ;;  %v1264_v23 = vrot.slane %v1263_v53, 4  ;;  %v1266_v3 = vrot.slane %v1265_v16, 6 }
 0xf80   :  { %v1228_v8 = vpop.f32.mrf.mxu2  ;;  %v1251_v59 = vpop.f32.mrf.mxu3 }
 0xf81   :  { %v1252_v50 = vadd.f32 %v1251_v59, %v1176_v61  ;;  %v1229_v49 = vadd.f32 %v1228_v8, %v1175_v62 }
 0xf83   :  { %v1259_v9 = vrot.slane %v1252_v50, 6 }
 0xf85   :  { %v3535_v10 = vsel %vm212_vm2, %v1259_v9, %v1229_v49  ;;  %v1275_v12 = vld.sshfl [vmem:[#allocation1] sm:$0xff pattern:$0x73625140]  ;;  %v1276_v13 = vld.sshfl [vmem:[#allocation1 + $0x8] sm:$0xff pattern:$0x73625140]  ;;  %v1270_v37 = vsel %vm209_vm5, %v1229_v49, %v1259_v9  ;;  %v1268_v51 = vsel %vm206_vm3, %v1229_v49, %v1259_v9  ;;  %v1267_v0 = vsel %vm204_vm1, %v1229_v49, %v1259_v9  ;;  %v1403_v49 = vpop.f32.mrf.mxu0 }
 0xf86   :  { %v1273_v11 = vrot.slane %v3535_v10, 6  ;;  %v1271_v40 = vrot.slane %v1270_v37, 4  ;;  %v1269_v48 = vrot.slane %v1268_v51, 2 }
 0xf88   :  { %1279 = vst [vmem:[#allocation1] ss:$4 sm:$0xff] %v1273_v11 }
 0xf8f   :  { %v1280_v44 = vld.sshfl [vmem:[#allocation1] sm:$0xff pattern:$0x73625140]  ;;  %v1281_v56 = vld.sshfl [vmem:[#allocation1 + $0x8] sm:$0xff pattern:$0x73625140] }
 0xf90   :  { %v1285_v19 = vsel %vm3112_vm4, %v1276_v13, %v1281_v56  ;;  %1286 = vst [vmem:[#allocation1] ss:$4 sm:$0xff] %v1262_v2  ;;  %v1284_v50 = vsel %vm3160_vm6, %v1275_v12, %v1280_v44 }
 0xf91   :  { %v3546_v20 = vadd.f32 %v1423_v18, %v1285_v19  ;;  %v1426_v58 = vadd.f32 %v1403_v49, %v1284_v50 }
 0xf93   :  { %2607 = vtanh.f32 %v3546_v20  ;;  %v2469_v18 = vmul.f32 -1.442695, %v1426_v58 }
 0xf95   :  { %2609 = vpow2.f32 %v2469_v18 }
 0xf97   :  { %v3550_v21 = vld.sshfl [vmem:[#allocation1] sm:$0xff pattern:$0x73625140]  ;;  %v3552_v22 = vld.sshfl [vmem:[#allocation1 + $0x8] sm:$0xff pattern:$0x73625140] }
 0xf98   :  { %1291 = vst [vmem:[#allocation1] ss:$4 sm:$0xff] %v1271_v40 }
 0xf99   :  { %v2608_v43 = vpop.eup %2607 }
 0xf9a   :  { %1469 = vrot.lane.b32.xlu0 %v2608_v43, %s2820_s3 }
 0xf9b   :  { %v2610_v44 = vpop.eup %2609 }
 0xf9f   :  { %v3556_v33 = vld.sshfl [vmem:[#allocation1] sm:$0xff pattern:$0x73625140]  ;;  %v3558_v34 = vld.sshfl [vmem:[#allocation1 + $0x8] sm:$0xff pattern:$0x73625140] }
 0xfa0   :  { %1298 = vst [vmem:[#allocation1] ss:$4 sm:$0xff] %v1264_v23 }
 0xfa7   :  { %v3561_v63 = vld.sshfl [vmem:[#allocation1] sm:$0xff pattern:$0x73625140]  ;;  %v3563_v6 = vld.sshfl [vmem:[#allocation1 + $0x8] sm:$0xff pattern:$0x73625140] }
 0xfa8   :  { %1303 = vst [vmem:[#allocation1] ss:$4 sm:$0xff] %v1269_v48 }
 0xfaf   :  { %v3566_v29 = vld.sshfl [vmem:[#allocation1] sm:$0xff pattern:$0x73625140]  ;;  %v3568_v41 = vld.sshfl [vmem:[#allocation1 + $0x8] sm:$0xff pattern:$0x73625140] }
 0xfb0   :  { %1310 = vst [vmem:[#allocation1] ss:$4 sm:$0xff] %v1266_v3 }
 0xfb7   :  { %v3571_v60 = vld.sshfl [vmem:[#allocation1] sm:$0xff pattern:$0x73625140]  ;;  %v3573_v30 = vld.sshfl [vmem:[#allocation1 + $0x8] sm:$0xff pattern:$0x73625140] }
 0xfb8   :  { %1315 = vst [vmem:[#allocation1] ss:$4 sm:$0xff] %v1267_v0 }
 0xfbf   :  { %v3575_v5 = vld.sshfl [vmem:[#allocation1] sm:$0xff pattern:$0x73625140]  ;;  %v3577_v61 = vld.sshfl [vmem:[#allocation1 + $0x8] sm:$0xff pattern:$0x73625140] }
 0xfc0   :  { %v1321_v7 = vsel %vm3112_vm4, %v3573_v30, %v3577_v61  ;;  %1322 = vst [vmem:[#allocation1] ss:$4 sm:$0xff] %v1267_v0 }
 0xfc7   :  { %v3587_v57 = vld.sshfl [vmem:[#allocation1] sm:$0xff pattern:$0x73625140]  ;;  %v3589_v15 = vld.sshfl [vmem:[#allocation1 + $0x8] sm:$0xff pattern:$0x73625140] }
 0xfc8   :  { %1327 = vst [vmem:[#allocation1] ss:$4 sm:$0xff] %v1266_v3 }
 0xfcf   :  { %v3591_v47 = vld.sshfl [vmem:[#allocation1] sm:$0xff pattern:$0x73625140]  ;;  %v3593_v39 = vld.sshfl [vmem:[#allocation1 + $0x8] sm:$0xff pattern:$0x73625140] }
 0xfd0   :  { %1334 = vst [vmem:[#allocation1] ss:$4 sm:$0xff] %v1269_v48 }
 0xfd7   :  { %v3605_v9 = vld.sshfl [vmem:[#allocation1] sm:$0xff pattern:$0x73625140]  ;;  %v3607_v13 = vld.sshfl [vmem:[#allocation1 + $0x8] sm:$0xff pattern:$0x73625140] }
 0xfd8   :  { %1339 = vst [vmem:[#allocation1] ss:$4 sm:$0xff] %v1264_v23  ;;  %v1434_v23 = vadd.f32 1.0, %v2610_v44 }
 0xfda   :  { %2611 = vrcp.f32 %v1434_v23  ;;  %v1447_v44 = vand.u32 2147483648, %v1434_v23  ;;  %vm1441_vm3 = vweird.f32 %v1434_v23  ;;  %v1445_v16 = vand.u32 2147483647, %v1434_v23 }
 0xfdc   :  { %v1448_v37 = vor.u32 1.1754944e-38, %v1447_v44  ;;  %vm1446_vm12 = vcmp.eq.f32.partialorder %v1445_v16, 8.507059e+37 }
 0xfdf   :  { %v3609_v56 = vld.sshfl [vmem:[#allocation1] sm:$0xff pattern:$0x73625140]  ;;  %v3611_v19 = vld.sshfl [vmem:[#allocation1 + $0x8] sm:$0xff pattern:$0x73625140] }
 0xfe0   :  { %1346 = vst [vmem:[#allocation1] ss:$4 sm:$0xff] %v1271_v40 }
 0xfe7   :  { %v3621_v43 = vld.sshfl [vmem:[#allocation1] sm:$0xff pattern:$0x73625140]  ;;  %v3623_v53 = vld.sshfl [vmem:[#allocation1 + $0x8] sm:$0xff pattern:$0x73625140] }
 0xfe8   :  { %1351 = vst [vmem:[#allocation1] ss:$4 sm:$0xff] %v1262_v2  ;;  %v2612_v2 = vpop.eup %2611 }
 0xfe9   :  { %v1437_v3 = vmul.f32 %v2612_v2, %v1434_v23  ;;  %vm1442_vm2 = vweird.f32 %v2612_v2  ;;  %v2470_v23 = vmul.f32 -1.442695, %v3546_v20 }
 0xfea   :  { %vm1443_vm5 = vmor %vm1441_vm3, %vm1442_vm2 }
 0xfeb   :  { %v1438_v49 = vsub.f32 1.0, %v1437_v3 }
 0xfed   :  { %v1439_v58 = vmul.f32 %v2612_v2, %v1438_v49 }
 0xfef   :  { %v3625_v51 = vld.sshfl [vmem:[#allocation1] sm:$0xff pattern:$0x73625140]  ;;  %v3627_v48 = vld.sshfl [vmem:[#allocation1 + $0x8] sm:$0xff pattern:$0x73625140]  ;;  %v1440_v18 = vadd.f32 %v2612_v2, %v1439_v58 }
 0xff0   :  { %1358 = vst [vmem:[#allocation1] ss:$4 sm:$0xff] %v1273_v11 }
 0xff1   :  { %v1444_v40 = vsel %vm1443_vm5, %v2612_v2, %v1440_v18 }
 0xff2   :  { %v1449_v11 = vsel %vm1446_vm12, %v1448_v37, %v1444_v40 }
 0xff3   :  { %v1467_v8 = vmul.f32 0.0, %v1449_v11 }
 0xff7   :  { %v3639_v0 = vld.sshfl [vmem:[#allocation1] sm:$0xff pattern:$0x73625140]  ;;  %v3641_v50 = vld.sshfl [vmem:[#allocation1 + $0x8] sm:$0xff pattern:$0x73625140] }
 0xff8   :  { %1363 = vst [vmem:[#allocation1] ss:$4 sm:$0xff] %v3531_v46 }
0x100c   :  { %v1470_v10 = vpop.permute.xlu0 %1469 }
0x100d   :  { %v1472_v12 = vmul.f32 %v1470_v10, %v1449_v11  ;;  %v1297_v11 = vsel %vm3112_vm4, %v3552_v22, %v3558_v34 }
0x100f   :  { %1474 = vrot.lane.b32.xlu1 %v1472_v12, %s2820_s3 }
0x1081   :  { %v1475_v59 = vpop.permute.xlu1 %1474 }
0x1082   :  { %v3645_v62 = vadd.f32 %v1475_v59, %v1467_v8 }
0x1084   :  { %2613 = vtanh.f32 %v3645_v62 }
0x1085   :  { %2615 = vpow2.f32 %v2470_v23 }
0x108a   :  { %v2614_v46 = vpop.eup %2613 }
0x108b   :  { %1480 = vrot.lane.b32.xlu2 %v2614_v46, %s2820_s3  ;;  %v2616_v2 = vpop.eup %2615 }
0x108c   :  { %v1435_v3 = vadd.f32 1.0, %v2616_v2 }
0x108e   :  { %2617 = vrcp.f32 %v1435_v3  ;;  %v1462_v58 = vand.u32 2147483648, %v1435_v3  ;;  %vm1456_vm14 = vweird.f32 %v1435_v3  ;;  %v1460_v8 = vand.u32 2147483647, %v1435_v3 }
0x1090   :  { %v1463_v18 = vor.u32 1.1754944e-38, %v1462_v58  ;;  %vm1461_vm7 = vcmp.eq.f32.partialorder %v1460_v8, 8.507059e+37 }
0x1094   :  { %v2618_v16 = vpop.eup %2617 }
0x1095   :  { %v1452_v37 = vmul.f32 %v2618_v16, %v1435_v3  ;;  %vm1457_vm13 = vweird.f32 %v2618_v16 }
0x1096   :  { %vm1458_vm0 = vmor %vm1456_vm14, %vm1457_vm13 }
0x1097   :  { %v1453_v40 = vsub.f32 1.0, %v1452_v37 }
0x1099   :  { %v1454_v49 = vmul.f32 %v2618_v16, %v1453_v40 }
0x109b   :  { %v1455_v12 = vadd.f32 %v2618_v16, %v1454_v49 }
0x109d   :  { %v1459_v59 = vsel %vm1458_vm0, %v2618_v16, %v1455_v12  ;;  %v1296_v16 = vsel %vm3160_vm6, %v3550_v21, %v3556_v33 }
0x109e   :  { %v1464_v44 = vsel %vm1461_vm7, %v1463_v18, %v1459_v59 }
0x10e5   :  { %v1481_v10 = vpop.permute.xlu2 %1480 }
0x10e6   :  { %v3650_v20 = vmul.f32 %v1481_v10, %v1464_v44 }
0x10e8   :  { %2471 = vmatmul.msk.f32.vlgmr.msrb.gmra.mxu2 %vm338_vm15, %v3650_v20  ;;  %2472 = vmatmul.msk.f32.vlgmr.msrb.gmra.mxu3 %vm338_vm15, %v3650_v20 }
0x10e9   :  { %1899 = vmatpush.msrb.mxu2 %v3394_v25  ;;  %1919 = vmatpush.msrb.mxu3 %v3396_v26 }
0x10eb   :  { %1900 = vmatpush.msrb.mxu2 %v3398_v27  ;;  %1920 = vmatpush.msrb.mxu3 %v3402_v36 }
0x10ed   :  { %1901 = vmatpush.msrb.mxu2 %v3404_v38  ;;  %1921 = vmatpush.msrb.mxu3 %v3406_v28 }
0x10ef   :  { %1902 = vmatpush.msrb.mxu2 %v3412_v35  ;;  %1922 = vmatpush.msrb.mxu3 %v3414_v32 }
0x10f1   :  { %1903 = vmatpush.msrb.mxu2 %v3423_v14  ;;  %1923 = vmatpush.msrb.mxu3 %v3425_v24 }
0x10f3   :  { %1904 = vmatpush.msrb.mxu2 %v3437_v1  ;;  %1924 = vmatpush.msrb.mxu3 %v3439_v4 }
0x10f5   :  { %1905 = vmatpush.msrb.mxu2 %v3445_v55  ;;  %1925 = vmatpush.msrb.mxu3 %v3447_v52 }
0x10f7   :  { %1906 = vmatpush.msrb.mxu2 %v3453_v17  ;;  %1926 = vmatpush.msrb.mxu3 %v3455_v31 }
0x116b   :  { %v1524_v46 = vpop.f32.mrf.mxu3  ;;  %v1504_v3 = vpop.f32.mrf.mxu2 }
0x116c   :  { %v1528_v23 = vadd.f32 %v1524_v46, %v1297_v11  ;;  %v1527_v37 = vadd.f32 %v1504_v3, %v1296_v16 }
0x116e   :  { %2619 = vtanh.f32 %v1528_v23  ;;  %v2473_v40 = vmul.f32 -1.442695, %v1527_v37 }
0x1170   :  { %2621 = vpow2.f32 %v2473_v40  ;;  %v2474_v40 = vmul.f32 -1.442695, %v1528_v23 }
0x1174   :  { %v2620_v2 = vpop.eup %2619 }
0x1175   :  { %1570 = vrot.lane.b32.xlu0 %v2620_v2, %s2820_s3 }
0x1176   :  { %v2622_v49 = vpop.eup %2621 }
0x1177   :  { %v1535_v12 = vadd.f32 1.0, %v2622_v49 }
0x1179   :  { %2623 = vrcp.f32 %v1535_v12  ;;  %v1548_v18 = vand.u32 2147483648, %v1535_v12  ;;  %vm1542_vm9 = vweird.f32 %v1535_v12  ;;  %v1546_v44 = vand.u32 2147483647, %v1535_v12 }
0x117b   :  { %v1549_v11 = vor.u32 1.1754944e-38, %v1548_v18  ;;  %vm1547_vm2 = vcmp.eq.f32.partialorder %v1546_v44, 8.507059e+37 }
0x117f   :  { %v2624_v58 = vpop.eup %2623 }
0x1180   :  { %v1538_v22 = vmul.f32 %v2624_v58, %v1535_v12  ;;  %vm1543_vm8 = vweird.f32 %v2624_v58 }
0x1181   :  { %vm1544_vm10 = vmor %vm1542_vm9, %vm1543_vm8 }
0x1182   :  { %v1539_v34 = vsub.f32 1.0, %v1538_v22 }
0x1184   :  { %v1540_v8 = vmul.f32 %v2624_v58, %v1539_v34 }
0x1186   :  { %v1541_v59 = vadd.f32 %v2624_v58, %v1540_v8 }
0x1188   :  { %v1545_v10 = vsel %vm1544_vm10, %v2624_v58, %v1541_v59 }
0x1189   :  { %v1550_v33 = vsel %vm1547_vm2, %v1549_v11, %v1545_v10 }
0x118a   :  { %v1568_v2 = vmul.f32 %v1550_v33, %v3645_v62 }
0x11e7   :  { %v1571_v21 = vpop.permute.xlu0 %1570 }
0x11e8   :  { %v1573_v46 = vmul.f32 %v1571_v21, %v1550_v33  ;;  %v1309_v33 = vsel %vm3112_vm4, %v3563_v6, %v3568_v41 }
0x11ea   :  { %1575 = vrot.lane.b32.xlu1 %v1573_v46, %s2820_s3 }
0x125c   :  { %v1576_v3 = vpop.permute.xlu1 %1575 }
0x125d   :  { %v3683_v16 = vadd.f32 %v1576_v3, %v1568_v2 }
0x125f   :  { %2625 = vtanh.f32 %v3683_v16 }
0x1260   :  { %2627 = vpow2.f32 %v2474_v40  ;;  %v1308_v40 = vsel %vm3160_vm6, %v3561_v63, %v3566_v29 }
0x1265   :  { %v2626_v37 = vpop.eup %2625 }
0x1266   :  { %1581 = vrot.lane.b32.xlu2 %v2626_v37, %s2820_s3  ;;  %v2628_v49 = vpop.eup %2627 }
0x1267   :  { %v1536_v12 = vadd.f32 1.0, %v2628_v49 }
0x1269   :  { %2629 = vrcp.f32 %v1536_v12  ;;  %v1563_v62 = vand.u32 2147483648, %v1536_v12  ;;  %vm1557_vm5 = vweird.f32 %v1536_v12  ;;  %v1561_v18 = vand.u32 2147483647, %v1536_v12 }
0x126b   :  { %v1564_v10 = vor.u32 1.1754944e-38, %v1563_v62  ;;  %vm1562_vm13 = vcmp.eq.f32.partialorder %v1561_v18, 8.507059e+37 }
0x126f   :  { %v2630_v58 = vpop.eup %2629 }
0x1270   :  { %v1553_v22 = vmul.f32 %v2630_v58, %v1536_v12  ;;  %vm1558_vm3 = vweird.f32 %v2630_v58 }
0x1271   :  { %vm1559_vm12 = vmor %vm1557_vm5, %vm1558_vm3 }
0x1272   :  { %v1554_v34 = vsub.f32 1.0, %v1553_v22 }
0x1274   :  { %v1555_v8 = vmul.f32 %v2630_v58, %v1554_v34 }
0x1276   :  { %v1556_v59 = vadd.f32 %v2630_v58, %v1555_v8 }
0x1278   :  { %v1560_v44 = vsel %vm1559_vm12, %v2630_v58, %v1556_v59 }
0x1279   :  { %v1565_v11 = vsel %vm1562_vm13, %v1564_v10, %v1560_v44 }
0x12c0   :  { %v1582_v21 = vpop.permute.xlu2 %1581 }
0x12c1   :  { %v3687_v23 = vmul.f32 %v1582_v21, %v1565_v11 }
0x12c3   :  { %2475 = vmatmul.msk.f32.vlgmr.msra.gmra.mxu0 %vm338_vm15, %v3687_v23  ;;  %2476 = vmatmul.msk.f32.vlgmr.msra.gmra.mxu1 %vm338_vm15, %v3687_v23 }
0x12c4   :  { %2000 = vmatpush.msra.mxu0 %v3394_v25  ;;  %2020 = vmatpush.msra.mxu1 %v3396_v26 }
0x12c6   :  { %2001 = vmatpush.msra.mxu0 %v3398_v27  ;;  %2021 = vmatpush.msra.mxu1 %v3402_v36 }
0x12c8   :  { %2002 = vmatpush.msra.mxu0 %v3404_v38  ;;  %2022 = vmatpush.msra.mxu1 %v3406_v28 }
0x12ca   :  { %2003 = vmatpush.msra.mxu0 %v3412_v35  ;;  %2023 = vmatpush.msra.mxu1 %v3414_v32 }
0x12cc   :  { %2004 = vmatpush.msra.mxu0 %v3423_v14  ;;  %2024 = vmatpush.msra.mxu1 %v3425_v24 }
0x12ce   :  { %2005 = vmatpush.msra.mxu0 %v3437_v1  ;;  %2025 = vmatpush.msra.mxu1 %v3439_v4 }
0x12d0   :  { %2006 = vmatpush.msra.mxu0 %v3445_v55  ;;  %2026 = vmatpush.msra.mxu1 %v3447_v52 }
0x12d2   :  { %2007 = vmatpush.msra.mxu0 %v3453_v17  ;;  %2027 = vmatpush.msra.mxu1 %v3455_v31 }
0x1340   :  { %v1625_v46 = vpop.f32.mrf.mxu1  ;;  %v1605_v37 = vpop.f32.mrf.mxu0 }
0x1341   :  { %v1629_v2 = vadd.f32 %v1625_v46, %v1309_v33  ;;  %v1628_v49 = vadd.f32 %v1605_v37, %v1308_v40 }
0x1343   :  { %2631 = vtanh.f32 %v1629_v2  ;;  %v2477_v12 = vmul.f32 -1.442695, %v1628_v49  ;;  %v2478_v37 = vmul.f32 -1.442695, %v1629_v2 }
0x1345   :  { %2633 = vpow2.f32 %v2477_v12 }
0x1349   :  { %v2632_v3 = vpop.eup %2631 }
0x134a   :  { %1671 = vrot.lane.b32.xlu0 %v2632_v3, %s2820_s3 }
0x134b   :  { %v2634_v58 = vpop.eup %2633 }
0x134c   :  { %v1636_v22 = vadd.f32 1.0, %v2634_v58 }
0x134e   :  { %2635 = vrcp.f32 %v1636_v22  ;;  %v1649_v62 = vand.u32 2147483648, %v1636_v22  ;;  %vm1643_vm0 = vweird.f32 %v1636_v22  ;;  %v1647_v18 = vand.u32 2147483647, %v1636_v22 }
0x1350   :  { %v1650_v10 = vor.u32 1.1754944e-38, %v1649_v62  ;;  %vm1648_vm8 = vcmp.eq.f32.partialorder %v1647_v18, 8.507059e+37 }
0x1354   :  { %v2636_v34 = vpop.eup %2635 }
0x1355   :  { %v1639_v6 = vmul.f32 %v2636_v34, %v1636_v22  ;;  %vm1644_vm14 = vweird.f32 %v2636_v34 }
0x1356   :  { %vm1645_vm7 = vmor %vm1643_vm0, %vm1644_vm14 }
0x1357   :  { %v1640_v41 = vsub.f32 1.0, %v1639_v6 }
0x1359   :  { %v1641_v8 = vmul.f32 %v2636_v34, %v1640_v41 }
0x135b   :  { %v1642_v59 = vadd.f32 %v2636_v34, %v1641_v8 }
0x135d   :  { %v1646_v44 = vsel %vm1645_vm7, %v2636_v34, %v1642_v59 }
0x135e   :  { %v1651_v29 = vsel %vm1648_vm8, %v1650_v10, %v1646_v44 }
0x135f   :  { %v1669_v21 = vmul.f32 %v1651_v29, %v3683_v16 }
0x13bc   :  { %v1672_v63 = vpop.permute.xlu0 %1671 }
0x13bd   :  { %v1674_v11 = vmul.f32 %v1672_v63, %v1651_v29 }
0x13bf   :  { %1676 = vrot.lane.b32.xlu1 %v1674_v11, %s2820_s3 }
0x1431   :  { %v1677_v33 = vpop.permute.xlu1 %1676 }
0x1432   :  { %v3720_v46 = vadd.f32 %v1677_v33, %v1669_v21 }
0x1434   :  { %2637 = vtanh.f32 %v3720_v46 }
0x1435   :  { %2639 = vpow2.f32 %v2478_v37 }
0x143a   :  { %v2638_v3 = vpop.eup %2637 }
0x143b   :  { %1682 = vrot.lane.b32.xlu2 %v2638_v3, %s2820_s3  ;;  %v2640_v40 = vpop.eup %2639 }
0x143c   :  { %v1637_v49 = vadd.f32 1.0, %v2640_v40 }
0x143e   :  { %2641 = vrcp.f32 %v1637_v49  ;;  %v1664_v16 = vand.u32 2147483648, %v1637_v49  ;;  %vm1658_vm10 = vweird.f32 %v1637_v49  ;;  %v1662_v41 = vand.u32 2147483647, %v1637_v49 }
0x1440   :  { %v1665_v59 = vor.u32 1.1754944e-38, %v1664_v16  ;;  %vm1663_vm3 = vcmp.eq.f32.partialorder %v1662_v41, 8.507059e+37 }
0x1444   :  { %v2642_v12 = vpop.eup %2641 }
0x1445   :  { %v1654_v58 = vmul.f32 %v2642_v12, %v1637_v49  ;;  %vm1659_vm9 = vweird.f32 %v2642_v12 }
0x1446   :  { %vm1660_vm2 = vmor %vm1658_vm10, %vm1659_vm9 }
0x1447   :  { %v1655_v22 = vsub.f32 1.0, %v1654_v58 }
0x1449   :  { %v1656_v34 = vmul.f32 %v2642_v12, %v1655_v22 }
0x144b   :  { %v1657_v6 = vadd.f32 %v2642_v12, %v1656_v34 }
0x144d   :  { %v1661_v8 = vsel %vm1660_vm2, %v2642_v12, %v1657_v6 }
0x144e   :  { %v1666_v62 = vsel %vm1663_vm3, %v1665_v59, %v1661_v8  ;;  %v4021_v59 = vsel %vm3112_vm4, %v3589_v15, %v3593_v39 }
0x1495   :  { %v1683_v18 = vpop.permute.xlu2 %1682 }
0x1496   :  { %v3724_v2 = vmul.f32 %v1683_v18, %v1666_v62 }
0x1498   :  { %2479 = vmatmul.msk.f32.vlgmr.msra.gmra.mxu2 %vm338_vm15, %v3724_v2  ;;  %2480 = vmatmul.msk.f32.vlgmr.msra.gmra.mxu3 %vm338_vm15, %v3724_v2 }
0x1499   :  { %2101 = vmatpush.msra.mxu2 %v3394_v25  ;;  %2121 = vmatpush.msra.mxu3 %v3396_v26 }
0x149b   :  { %2102 = vmatpush.msra.mxu2 %v3398_v27  ;;  %2122 = vmatpush.msra.mxu3 %v3402_v36 }
0x149d   :  { %2103 = vmatpush.msra.mxu2 %v3404_v38  ;;  %2123 = vmatpush.msra.mxu3 %v3406_v28  ;;  %v4020_v38 = vsel %vm3160_vm6, %v3571_v60, %v3575_v5 }
0x149f   :  { %2104 = vmatpush.msra.mxu2 %v3412_v35  ;;  %2124 = vmatpush.msra.mxu3 %v3414_v32 }
0x14a1   :  { %2105 = vmatpush.msra.mxu2 %v3423_v14  ;;  %2125 = vmatpush.msra.mxu3 %v3425_v24 }
0x14a3   :  { %2106 = vmatpush.msra.mxu2 %v3437_v1  ;;  %2126 = vmatpush.msra.mxu3 %v3439_v4 }
0x14a5   :  { %2107 = vmatpush.msra.mxu2 %v3445_v55  ;;  %2127 = vmatpush.msra.mxu3 %v3447_v52 }
0x14a7   :  { %2108 = vmatpush.msra.mxu2 %v3453_v17  ;;  %2128 = vmatpush.msra.mxu3 %v3455_v31 }
0x151b   :  { %v1726_v25 = vpop.f32.mrf.mxu3  ;;  %v1706_v36 = vpop.f32.mrf.mxu2 }
0x151c   :  { %v1730_v26 = vadd.f32 %v1726_v25, %v1321_v7  ;;  %v1729_v28 = vadd.f32 %v1706_v36, %v4020_v38 }
0x151e   :  { %2643 = vtanh.f32 %v1730_v26  ;;  %v2481_v35 = vmul.f32 -1.442695, %v1729_v28  ;;  %v2482_v11 = vmul.f32 -1.442695, %v1730_v26  ;;  %v4022_v26 = vsel %vm3160_vm6, %v3587_v57, %v3591_v47 }
0x1520   :  { %2645 = vpow2.f32 %v2481_v35 }
0x1524   :  { %v2644_v27 = vpop.eup %2643 }
0x1525   :  { %1772 = vrot.lane.b32.xlu0 %v2644_v27, %s2820_s3 }
0x1526   :  { %v2646_v32 = vpop.eup %2645 }
0x1527   :  { %v1737_v14 = vadd.f32 1.0, %v2646_v32 }
0x1529   :  { %2647 = vrcp.f32 %v1737_v14  ;;  %v1750_v17 = vand.u32 2147483648, %v1737_v14  ;;  %vm1744_vm12 = vweird.f32 %v1737_v14  ;;  %v1748_v31 = vand.u32 2147483647, %v1737_v14 }
0x152b   :  { %v1751_v61 = vor.u32 1.1754944e-38, %v1750_v17  ;;  %vm1749_vm14 = vcmp.eq.f32.partialorder %v1748_v31, 8.507059e+37 }
0x152f   :  { %v2648_v24 = vpop.eup %2647 }
0x1530   :  { %v1740_v1 = vmul.f32 %v2648_v24, %v1737_v14  ;;  %vm1745_vm5 = vweird.f32 %v2648_v24 }
0x1531   :  { %vm1746_vm13 = vmor %vm1744_vm12, %vm1745_vm5 }
0x1532   :  { %v1741_v4 = vsub.f32 1.0, %v1740_v1 }
0x1534   :  { %v1742_v55 = vmul.f32 %v2648_v24, %v1741_v4 }
0x1536   :  { %v1743_v52 = vadd.f32 %v2648_v24, %v1742_v55 }
0x1538   :  { %v1747_v30 = vsel %vm1746_vm13, %v2648_v24, %v1743_v52 }
0x1539   :  { %v1752_v5 = vsel %vm1749_vm14, %v1751_v61, %v1747_v30 }
0x153a   :  { %v1770_v44 = vmul.f32 %v1752_v5, %v3720_v46 }
0x1597   :  { %v1773_v60 = vpop.permute.xlu0 %1772 }
0x1598   :  { %v1775_v7 = vmul.f32 %v1773_v60, %v1752_v5 }
0x159a   :  { %1777 = vrot.lane.b32.xlu1 %v1775_v7, %s2820_s3 }
0x160c   :  { %v1778_v10 = vpop.permute.xlu1 %1777 }
0x160d   :  { %v1780_v63 = vadd.f32 %v1778_v10, %v1770_v44 }
0x160f   :  { %2649 = vtanh.f32 %v1780_v63 }
0x1610   :  { %2651 = vpow2.f32 %v2482_v11 }
0x1615   :  { %v2650_v29 = vpop.eup %2649 }
0x1616   :  { %1783 = vrot.lane.b32.xlu2 %v2650_v29, %s2820_s3  ;;  %v2652_v21 = vpop.eup %2651 }
0x1617   :  { %v1738_v33 = vadd.f32 1.0, %v2652_v21 }
0x1619   :  { %2653 = vrcp.f32 %v1738_v33  ;;  %v1765_v58 = vand.u32 2147483648, %v1738_v33  ;;  %vm1759_vm7 = vweird.f32 %v1738_v33  ;;  %v1763_v46 = vand.u32 2147483647, %v1738_v33 }
0x161b   :  { %v1766_v34 = vor.u32 1.1754944e-38, %v1765_v58  ;;  %vm1764_vm9 = vcmp.eq.f32.partialorder %v1763_v46, 8.507059e+37  ;;  %v4023_v46 = vsel %vm3112_vm4, %v3607_v13, %v3611_v19 }
0x161f   :  { %v2654_v3 = vpop.eup %2653 }
0x1620   :  { %v1755_v37 = vmul.f32 %v2654_v3, %v1738_v33  ;;  %vm1760_vm0 = vweird.f32 %v2654_v3 }
0x1621   :  { %vm1761_vm8 = vmor %vm1759_vm7, %vm1760_vm0 }
0x1622   :  { %v1756_v40 = vsub.f32 1.0, %v1755_v37 }
0x1624   :  { %v1757_v49 = vmul.f32 %v2654_v3, %v1756_v40 }
0x1626   :  { %v1758_v12 = vadd.f32 %v2654_v3, %v1757_v49 }
0x1628   :  { %v1762_v22 = vsel %vm1761_vm8, %v2654_v3, %v1758_v12 }
0x1629   :  { %v1767_v6 = vsel %vm1764_vm9, %v1766_v34, %v1762_v22 }
0x1670   :  { %v1784_v16 = vpop.permute.xlu2 %1783 }
0x1671   :  { %v3760_v41 = vmul.f32 %v1784_v16, %v1767_v6  ;;  %v4024_v16 = vsel %vm3160_vm6, %v3605_v9, %v3609_v56 }
0x1673   :  { %2483 = vmatmul.msk.f32.vlgmr.msrb.gmra.mxu0 %vm338_vm15, %v3760_v41  ;;  %2484 = vmatmul.msk.f32.vlgmr.msrb.gmra.mxu1 %vm338_vm15, %v3760_v41 }
0x16f0   :  { %v1827_v8 = vpop.f32.mrf.mxu1  ;;  %v1807_v25 = vpop.f32.mrf.mxu0 }
0x16f1   :  { %v1831_v62 = vadd.f32 %v1827_v8, %v4021_v59  ;;  %v1830_v27 = vadd.f32 %v1807_v25, %v4022_v26 }
0x16f3   :  { %2655 = vtanh.f32 %v1831_v62  ;;  %v2485_v36 = vmul.f32 -1.442695, %v1830_v27  ;;  %v2486_v60 = vmul.f32 -1.442695, %v1831_v62 }
0x16f5   :  { %2657 = vpow2.f32 %v2485_v36 }
0x16f9   :  { %v2656_v18 = vpop.eup %2655 }
0x16fa   :  { %1873 = vrot.lane.b32.xlu0 %v2656_v18, %s2820_s3 }
0x16fb   :  { %v2658_v38 = vpop.eup %2657 }
0x16fc   :  { %v1838_v28 = vadd.f32 1.0, %v2658_v38 }
0x16fe   :  { %2659 = vrcp.f32 %v1838_v28  ;;  %v1851_v24 = vand.u32 2147483648, %v1838_v28  ;;  %vm1845_vm2 = vweird.f32 %v1838_v28  ;;  %v1849_v1 = vand.u32 2147483647, %v1838_v28 }
0x1700   :  { %v1852_v55 = vor.u32 1.1754944e-38, %v1851_v24  ;;  %vm1850_vm5 = vcmp.eq.f32.partialorder %v1849_v1, 8.507059e+37 }
0x1704   :  { %v2660_v35 = vpop.eup %2659 }
0x1705   :  { %v1841_v32 = vmul.f32 %v2660_v35, %v1838_v28  ;;  %vm1846_vm10 = vweird.f32 %v2660_v35 }
0x1706   :  { %vm1847_vm3 = vmor %vm1845_vm2, %vm1846_vm10 }
0x1707   :  { %v1842_v15 = vsub.f32 1.0, %v1841_v32 }
0x1709   :  { %v1843_v39 = vmul.f32 %v2660_v35, %v1842_v15 }
0x170b   :  { %v1844_v14 = vadd.f32 %v2660_v35, %v1843_v39 }
0x170d   :  { %v1848_v4 = vsel %vm1847_vm3, %v2660_v35, %v1844_v14 }
0x170e   :  { %v1853_v47 = vsel %vm1850_vm5, %v1852_v55, %v1848_v4 }
0x170f   :  { %v1871_v17 = vmul.f32 %v1853_v47, %v1780_v63 }
0x176c   :  { %v1874_v57 = vpop.permute.xlu0 %1873 }
0x176d   :  { %v1876_v52 = vmul.f32 %v1874_v57, %v1853_v47 }
0x176f   :  { %1878 = vrot.lane.b32.xlu1 %v1876_v52, %s2820_s3 }
0x17e1   :  { %v1879_v31 = vpop.permute.xlu1 %1878 }
0x17e2   :  { %v1881_v30 = vadd.f32 %v1879_v31, %v1871_v17 }
0x17e4   :  { %2661 = vtanh.f32 %v1881_v30 }
0x17e5   :  { %2663 = vpow2.f32 %v2486_v60 }
0x17ea   :  { %v2662_v61 = vpop.eup %2661 }
0x17eb   :  { %1884 = vrot.lane.b32.xlu2 %v2662_v61, %s2820_s3  ;;  %v2664_v5 = vpop.eup %2663 }
0x17ec   :  { %v1839_v7 = vadd.f32 1.0, %v2664_v5 }
0x17ee   :  { %2665 = vrcp.f32 %v1839_v7  ;;  %v1866_v33 = vand.u32 2147483648, %v1839_v7  ;;  %vm1860_vm13 = vweird.f32 %v1839_v7  ;;  %v1864_v63 = vand.u32 2147483647, %v1839_v7 }
0x17f0   :  { %v1867_v37 = vor.u32 1.1754944e-38, %v1866_v33  ;;  %vm1865_vm0 = vcmp.eq.f32.partialorder %v1864_v63, 8.507059e+37 }
0x17f4   :  { %v2666_v44 = vpop.eup %2665 }
0x17f5   :  { %v1856_v10 = vmul.f32 %v2666_v44, %v1839_v7  ;;  %vm1861_vm12 = vweird.f32 %v2666_v44 }
0x17f6   :  { %vm1862_vm14 = vmor %vm1860_vm13, %vm1861_vm12 }
0x17f7   :  { %v1857_v29 = vsub.f32 1.0, %v1856_v10 }
0x17f9   :  { %v1858_v11 = vmul.f32 %v2666_v44, %v1857_v29 }
0x17fb   :  { %v1859_v21 = vadd.f32 %v2666_v44, %v1858_v11  ;;  %v4025_v11 = vsel %vm3112_vm4, %v3623_v53, %v3627_v48 }
0x17fd   :  { %v1863_v3 = vsel %vm1862_vm14, %v2666_v44, %v1859_v21 }
0x17fe   :  { %v1868_v40 = vsel %vm1865_vm0, %v1867_v37, %v1863_v3  ;;  %v4026_v3 = vsel %vm3160_vm6, %v3621_v43, %v3625_v51 }
0x1845   :  { %v1885_v49 = vpop.permute.xlu2 %1884 }
0x1846   :  { %v3779_v12 = vmul.f32 %v1885_v49, %v1868_v40 }
0x1848   :  { %2487 = vmatmul.msk.f32.vlgmr.msrb.gmra.mxu2 %vm338_vm15, %v3779_v12  ;;  %2488 = vmatmul.msk.f32.vlgmr.msrb.gmra.mxu3 %vm338_vm15, %v3779_v12 }
0x18cb   :  { %v1928_v58 = vpop.f32.mrf.mxu3  ;;  %v1908_v6 = vpop.f32.mrf.mxu2 }
0x18cc   :  { %v1932_v22 = vadd.f32 %v1928_v58, %v4023_v46  ;;  %v1931_v8 = vadd.f32 %v1908_v6, %v4024_v16 }
0x18ce   :  { %2667 = vtanh.f32 %v1932_v22  ;;  %v2489_v59 = vmul.f32 -1.442695, %v1931_v8  ;;  %v2490_v1 = vmul.f32 -1.442695, %v1932_v22 }
0x18d0   :  { %2669 = vpow2.f32 %v2489_v59 }
0x18d4   :  { %v2668_v34 = vpop.eup %2667 }
0x18d5   :  { %1974 = vrot.lane.b32.xlu0 %v2668_v34, %s2820_s3 }
0x18d6   :  { %v2670_v62 = vpop.eup %2669 }
0x18d7   :  { %v1939_v18 = vadd.f32 1.0, %v2670_v62 }
0x18d9   :  { %2671 = vrcp.f32 %v1939_v18  ;;  %v1952_v36 = vand.u32 2147483648, %v1939_v18  ;;  %vm1946_vm8 = vweird.f32 %v1939_v18  ;;  %v1950_v38 = vand.u32 2147483647, %v1939_v18 }
0x18db   :  { %v1953_v35 = vor.u32 1.1754944e-38, %v1952_v36  ;;  %vm1951_vm10 = vcmp.eq.f32.partialorder %v1950_v38, 8.507059e+37 }
0x18df   :  { %v2672_v25 = vpop.eup %2671 }
0x18e0   :  { %v1942_v26 = vmul.f32 %v2672_v25, %v1939_v18  ;;  %vm1947_vm7 = vweird.f32 %v2672_v25 }
0x18e1   :  { %vm1948_vm9 = vmor %vm1946_vm8, %vm1947_vm7 }
0x18e2   :  { %v1943_v13 = vsub.f32 1.0, %v1942_v26 }
0x18e4   :  { %v1944_v19 = vmul.f32 %v2672_v25, %v1943_v13 }
0x18e6   :  { %v1945_v27 = vadd.f32 %v2672_v25, %v1944_v19 }
0x18e8   :  { %v1949_v28 = vsel %vm1948_vm9, %v2672_v25, %v1945_v27 }
0x18e9   :  { %v1954_v56 = vsel %vm1951_vm10, %v1953_v35, %v1949_v28 }
0x18ea   :  { %v1972_v15 = vmul.f32 %v1954_v56, %v1881_v30 }
0x1947   :  { %v1975_v9 = vpop.permute.xlu0 %1974 }
0x1948   :  { %v1977_v32 = vmul.f32 %v1975_v9, %v1954_v56 }
0x194a   :  { %1979 = vrot.lane.b32.xlu1 %v1977_v32, %s2820_s3 }
0x19bc   :  { %v1980_v39 = vpop.permute.xlu1 %1979 }
0x19bd   :  { %v1982_v14 = vadd.f32 %v1980_v39, %v1972_v15 }
0x19bf   :  { %2673 = vtanh.f32 %v1982_v14 }
0x19c0   :  { %2675 = vpow2.f32 %v2490_v1 }
0x19c5   :  { %v2674_v24 = vpop.eup %2673 }
0x19c6   :  { %1985 = vrot.lane.b32.xlu2 %v2674_v24, %s2820_s3  ;;  %v2676_v4 = vpop.eup %2675 }
0x19c7   :  { %v1940_v55 = vadd.f32 1.0, %v2676_v4 }
0x19c9   :  { %2677 = vrcp.f32 %v1940_v55  ;;  %v1967_v61 = vand.u32 2147483648, %v1940_v55  ;;  %vm1961_vm3 = vweird.f32 %v1940_v55  ;;  %v1965_v30 = vand.u32 2147483647, %v1940_v55 }
0x19cb   :  { %v1968_v5 = vor.u32 1.1754944e-38, %v1967_v61  ;;  %vm1966_vm12 = vcmp.eq.f32.partialorder %v1965_v30, 8.507059e+37 }
0x19cf   :  { %v2678_v57 = vpop.eup %2677 }
0x19d0   :  { %v1957_v47 = vmul.f32 %v2678_v57, %v1940_v55  ;;  %vm1962_vm2 = vweird.f32 %v2678_v57  ;;  %v1365_v55 = vld.sshfl [vmem:[#allocation1 + $0x8] sm:$0xff pattern:$0x73625140] }
0x19d1   :  { %vm1963_vm5 = vmor %vm1961_vm3, %vm1962_vm2 }
0x19d2   :  { %v1958_v52 = vsub.f32 1.0, %v1957_v47 }
0x19d4   :  { %v1959_v17 = vmul.f32 %v2678_v57, %v1958_v52 }
0x19d6   :  { %v1960_v31 = vadd.f32 %v2678_v57, %v1959_v17 }
0x19d8   :  { %v1964_v60 = vsel %vm1963_vm5, %v2678_v57, %v1960_v31  ;;  %v1369_v57 = vsel %vm3112_vm4, %v3641_v50, %v1365_v55  ;;  %v3837_v31 = vsel %vm103_vm11, %v3779_v12, %v3760_v41  ;;  %vm2219_vm4 = vcmask 517120  }
0x19d9   :  { %v1969_v7 = vsel %vm1966_vm12, %v1968_v5, %v1964_v60  ;;  %v1364_v60 = vld.sshfl [vmem:[#allocation1] sm:$0xff pattern:$0x73625140] }
0x1a20   :  { %v1986_v44 = vpop.permute.xlu2 %1985 }
0x1a21   :  { %v3798_v10 = vmul.f32 %v1986_v44, %v1969_v7  ;;  %v1368_v7 = vsel %vm3160_vm6, %v3639_v0, %v1364_v60 }
0x1a23   :  { %2491 = vmatmul.msk.f32.vlgmr.msra.gmra.mxu0 %vm338_vm15, %v3798_v10  ;;  %2492 = vmatmul.msk.f32.vlgmr.msra.gmra.mxu1 %vm338_vm15, %v3798_v10 }
0x1aa0   :  { %v2029_v29 = vpop.f32.mrf.mxu1  ;;  %v2009_v63 = vpop.f32.mrf.mxu0 }
0x1aa1   :  { %v2033_v21 = vadd.f32 %v2029_v29, %v4025_v11  ;;  %v2032_v37 = vadd.f32 %v2009_v63, %v4026_v3 }
0x1aa3   :  { %2679 = vtanh.f32 %v2033_v21  ;;  %v2493_v40 = vmul.f32 -1.442695, %v2032_v37  ;;  %v2494_v19 = vmul.f32 -1.442695, %v2033_v21 }
0x1aa5   :  { %2681 = vpow2.f32 %v2493_v40 }
0x1aa9   :  { %v2680_v33 = vpop.eup %2679 }
0x1aaa   :  { %2075 = vrot.lane.b32.xlu0 %v2680_v33, %s2820_s3 }
0x1aab   :  { %v2682_v49 = vpop.eup %2681 }
0x1aac   :  { %v2040_v58 = vadd.f32 1.0, %v2682_v49 }
0x1aae   :  { %2683 = vrcp.f32 %v2040_v58  ;;  %v2053_v6 = vand.u32 2147483648, %v2040_v58  ;;  %vm2047_vm14 = vweird.f32 %v2040_v58  ;;  %v2051_v16 = vand.u32 2147483647, %v2040_v58 }
0x1ab0   :  { %v2054_v59 = vor.u32 1.1754944e-38, %v2053_v6  ;;  %vm2052_vm7 = vcmp.eq.f32.partialorder %v2051_v16, 8.507059e+37 }
0x1ab4   :  { %v2684_v46 = vpop.eup %2683 }
0x1ab5   :  { %v2043_v22 = vmul.f32 %v2684_v46, %v2040_v58  ;;  %vm2048_vm13 = vweird.f32 %v2684_v46 }
0x1ab6   :  { %vm2049_vm0 = vmor %vm2047_vm14, %vm2048_vm13 }
0x1ab7   :  { %v2044_v53 = vsub.f32 1.0, %v2043_v22 }
0x1ab9   :  { %v2045_v48 = vmul.f32 %v2684_v46, %v2044_v53 }
0x1abb   :  { %v2046_v34 = vadd.f32 %v2684_v46, %v2045_v48 }
0x1abd   :  { %v2050_v8 = vsel %vm2049_vm0, %v2684_v46, %v2046_v34  ;;  %v3862_v34 = vsel %vm103_vm11, %v3798_v10, %v3724_v2 }
0x1abe   :  { %v2055_v51 = vsel %vm2052_vm7, %v2054_v59, %v2050_v8 }
0x1abf   :  { %v2073_v18 = vmul.f32 %v2055_v51, %v1982_v14 }
0x1b1c   :  { %v2076_v43 = vpop.permute.xlu0 %2075 }
0x1b1d   :  { %v2078_v62 = vmul.f32 %v2076_v43, %v2055_v51 }
0x1b1f   :  { %2080 = vrot.lane.b32.xlu1 %v2078_v62, %s2820_s3 }
0x1b91   :  { %v2081_v25 = vpop.permute.xlu1 %2080 }
0x1b92   :  { %v3816_v26 = vadd.f32 %v2081_v25, %v2073_v18 }
0x1b94   :  { %2685 = vtanh.f32 %v3816_v26 }
0x1b95   :  { %2687 = vpow2.f32 %v2494_v19  ;;  %v3875_v19 = vsel %vm103_vm11, %v3724_v2, %v3798_v10 }
0x1b9a   :  { %v2686_v13 = vpop.eup %2685 }
0x1b9b   :  { %2086 = vrot.lane.b32.xlu2 %v2686_v13, %s2820_s3  ;;  %v2688_v27 = vpop.eup %2687 }
0x1b9c   :  { %v2041_v36 = vadd.f32 1.0, %v2688_v27  ;;  %v3882_v27 = vsel %vm103_vm11, %v3760_v41, %v3779_v12 }
0x1b9e   :  { %2689 = vrcp.f32 %v2041_v36  ;;  %v2068_v32 = vand.u32 2147483648, %v2041_v36  ;;  %vm2062_vm9 = vweird.f32 %v2041_v36  ;;  %v2066_v15 = vand.u32 2147483647, %v2041_v36 }
0x1ba0   :  { %v2069_v14 = vor.u32 1.1754944e-38, %v2068_v32  ;;  %vm2067_vm2 = vcmp.eq.f32.partialorder %v2066_v15, 8.507059e+37 }
0x1ba4   :  { %v2690_v38 = vpop.eup %2689 }
0x1ba5   :  { %v2058_v28 = vmul.f32 %v2690_v38, %v2041_v36  ;;  %vm2063_vm8 = vweird.f32 %v2690_v38 }
0x1ba6   :  { %vm2064_vm10 = vmor %vm2062_vm9, %vm2063_vm8 }
0x1ba7   :  { %v2059_v35 = vsub.f32 1.0, %v2058_v28 }
0x1ba9   :  { %v2060_v9 = vmul.f32 %v2690_v38, %v2059_v35 }
0x1bab   :  { %v2061_v56 = vadd.f32 %v2690_v38, %v2060_v9 }
0x1bad   :  { %v2065_v39 = vsel %vm2064_vm10, %v2690_v38, %v2061_v56  ;;  %vm2387_vm10 = vcmask 261120  }
0x1bae   :  { %v2070_v24 = vsel %vm2067_vm2, %v2069_v14, %v2065_v39 }
0x1bf5   :  { %v2087_v1 = vpop.permute.xlu2 %2086 }
0x1bf6   :  { %v3820_v4 = vmul.f32 %v2087_v1, %v2070_v24 }
0x1bf8   :  { %2495 = vmatmul.msk.f32.vlgmr.msra.gmra.mxu2 %vm338_vm15, %v3820_v4  ;;  %2496 = vmatmul.msk.f32.vlgmr.msra.gmra.mxu3 %vm338_vm15, %v3820_v4  ;;  %v3855_v48 = vsel %vm103_vm11, %v3687_v23, %v3820_v4  ;;  %v3890_v38 = vsel %vm103_vm11, %v3820_v4, %v3687_v23 }
0x1c7b   :  { %v2130_v47 = vpop.f32.mrf.mxu3  ;;  %v2110_v5 = vpop.f32.mrf.mxu2 }
0x1c7c   :  { %v3829_v52 = vadd.f32 %v2130_v47, %v1369_v57  ;;  %v2133_v44 = vadd.f32 %v2110_v5, %v1368_v7 }
0x1c7e   :  { %2691 = vtanh.f32 %v3829_v52  ;;  %v2497_v29 = vmul.f32 -1.442695, %v2133_v44  ;;  %v2498_v12 = vmul.f32 -1.442695, %v3829_v52 }
0x1c7f   :  { %2693 = vtanh.f32 %v3837_v31 }
0x1c80   :  { %2695 = vpow2.f32 %v2497_v29 }
0x1c84   :  { %v2692_v17 = vpop.eup %2691 }
0x1c85   :  { %2176 = vrot.lane.b32.xlu0 %v2692_v17, %s2820_s3  ;;  %v2694_v50 = vpop.eup %2693 }
0x1c86   :  { %v2215_v61 = vmul.f32 %v2694_v50, %v3843_v54  ;;  %v2696_v11 = vpop.eup %2695 }
0x1c87   :  { %v2141_v21 = vadd.f32 1.0, %v2696_v11 }
0x1c88   :  { %v2232_v30 = vsel %vm2219_vm4, %v2215_v61, 0.0 }
0x1c89   :  { %2697 = vrcp.f32 %v2141_v21  ;;  %v2154_v49 = vand.u32 2147483648, %v2141_v21  ;;  %vm2148_vm5 = vweird.f32 %v2141_v21  ;;  %v2152_v58 = vand.u32 2147483647, %v2141_v21 }
0x1c8a   :  { %2699 = vtanh.f32 %v3855_v48 }
0x1c8b   :  { %v2155_v22 = vor.u32 1.1754944e-38, %v2154_v49  ;;  %vm2153_vm13 = vcmp.eq.f32.partialorder %v2152_v58, 8.507059e+37  ;;  %2701 = vtanh.f32 %v3862_v34 }
0x1c8f   :  { %v2698_v33 = vpop.eup %2697 }
0x1c90   :  { %v2144_v63 = vmul.f32 %v2698_v33, %v2141_v21  ;;  %vm2149_vm3 = vweird.f32 %v2698_v33  ;;  %v2700_v6 = vpop.eup %2699 }
0x1c91   :  { %vm2150_vm12 = vmor %vm2148_vm5, %vm2149_vm3  ;;  %v2212_v16 = vmul.f32 %v2700_v6, %v3843_v54  ;;  %v2702_v59 = vpop.eup %2701 }
0x1c92   :  { %v2145_v3 = vsub.f32 1.0, %v2144_v63  ;;  %v2216_v43 = vmul.f32 %v2702_v59, %v3843_v54 }
0x1c93   :  { %v2223_v8 = vsel %vm2219_vm4, %v2212_v16, 0.0 }
0x1c94   :  { %v2146_v37 = vmul.f32 %v2698_v33, %v2145_v3  ;;  %v2235_v51 = vsel %vm2219_vm4, %v2216_v43, 0.0 }
0x1c96   :  { %v2147_v40 = vadd.f32 %v2698_v33, %v2146_v37 }
0x1c98   :  { %v2151_v46 = vsel %vm2150_vm12, %v2698_v33, %v2147_v40 }
0x1c99   :  { %v2156_v0 = vsel %vm2153_vm13, %v2155_v22, %v2151_v46 }
0x1c9a   :  { %v2174_v62 = vmul.f32 %v2156_v0, %v3816_v26 }
0x1caf   :  { %2233 = vadd.xlane.f32.xlu0 %v2232_v30 }
0x1cf7   :  { %v2177_v42 = vpop.permute.xlu0 %2176 }
0x1cf8   :  { %v2179_v53 = vmul.f32 %v2177_v42, %v2156_v0 }
0x1cfa   :  { %2181 = vrot.lane.b32.xlu1 %v2179_v53, %s2820_s3 }
0x1d22   :  { %v2234_v33 = vpop.xlane.xlu0 %2233 }
0x1d23   :  { %v2248_v49 = vsel %vm204_vm1, %v2234_v33, -inf }
0x1d24   :  { %2224 = vadd.xlane.f32.xlu1 %v2223_v8 }
0x1d2c   :  { %2236 = vadd.xlane.f32.xlu1 %v2235_v51 }
0x1d6c   :  { %v2182_v18 = vpop.permute.xlu1 %2181 }
0x1d6d   :  { %v2184_v25 = vadd.f32 %v2182_v18, %v2174_v62 }
0x1d6f   :  { %2703 = vtanh.f32 %v2184_v25 }
0x1d70   :  { %2705 = vtanh.f32 %v3875_v19 }
0x1d71   :  { %2707 = vtanh.f32 %v3882_v27 }
0x1d72   :  { %2709 = vtanh.f32 %v3890_v38 }
0x1d73   :  { %2711 = vpow2.f32 %v2498_v12 }
0x1d75   :  { %v2704_v13 = vpop.eup %2703 }
0x1d76   :  { %2187 = vrot.lane.b32.xlu2 %v2704_v13, %s2820_s3  ;;  %v2706_v26 = vpop.eup %2705 }
0x1d77   :  { %v2213_v36 = vmul.f32 %v2706_v26, %v3843_v54  ;;  %v2708_v10 = vpop.eup %2707 }
0x1d78   :  { %v2214_v41 = vmul.f32 %v2708_v10, %v3843_v54  ;;  %v2710_v35 = vpop.eup %2709 }
0x1d79   :  { %v2226_v2 = vsel %vm2219_vm4, %v2213_v36, 0.0  ;;  %v2217_v9 = vmul.f32 %v2710_v35, %v3843_v54  ;;  %v2712_v56 = vpop.eup %2711 }
0x1d7a   :  { %v2229_v28 = vsel %vm2219_vm4, %v2214_v41, 0.0  ;;  %v2142_v32 = vadd.f32 1.0, %v2712_v56 }
0x1d7b   :  { %v2238_v23 = vsel %vm2219_vm4, %v2217_v9, 0.0 }
0x1d7c   :  { %2713 = vrcp.f32 %v2142_v32  ;;  %v2169_v4 = vand.u32 2147483648, %v2142_v32  ;;  %vm2163_vm14 = vweird.f32 %v2142_v32  ;;  %v2167_v55 = vand.u32 2147483647, %v2142_v32 }
0x1d7e   :  { %v2170_v47 = vor.u32 1.1754944e-38, %v2169_v4  ;;  %vm2168_vm7 = vcmp.eq.f32.partialorder %v2167_v55, 8.507059e+37 }
0x1d82   :  { %v2714_v15 = vpop.eup %2713 }
0x1d83   :  { %v2159_v39 = vmul.f32 %v2714_v15, %v2142_v32  ;;  %vm2164_vm6 = vweird.f32 %v2714_v15 }
0x1d84   :  { %vm2165_vm0 = vmor %vm2163_vm14, %vm2164_vm6 }
0x1d85   :  { %v2160_v14 = vsub.f32 1.0, %v2159_v39 }
0x1d87   :  { %v2161_v24 = vmul.f32 %v2714_v15, %v2160_v14 }
0x1d89   :  { %v2162_v1 = vadd.f32 %v2714_v15, %v2161_v24 }
0x1d8b   :  { %v2166_v57 = vsel %vm2165_vm0, %v2714_v15, %v2162_v1 }
0x1d8c   :  { %v2171_v52 = vsel %vm2168_vm7, %v2170_v47, %v2166_v57 }
0x1d97   :  { %v2225_v63 = vpop.xlane.xlu1 %2224 }
0x1d98   :  { %v2245_v42 = vsel %vm204_vm1, %v2225_v63, -inf }
0x1d9f   :  { %2227 = vadd.xlane.f32.xlu2 %v2226_v2  ;;  %v2237_v3 = vpop.xlane.xlu1 %2236 }
0x1da0   :  { %v2250_v58 = vsel %vm204_vm1, %v2237_v3, -inf }
0x1da1   :  { %v2251_v16 = vmax.f32 %v2245_v42, %v2250_v58  ;;  %v2344_v42 = vld [vmem:[%s4009_s8] sm:$0xff] }
0x1da7   :  { %2230 = vadd.xlane.f32.xlu2 %v2229_v28 }
0x1daf   :  { %2239 = vadd.xlane.f32.xlu2 %v2238_v23 }
0x1dd0   :  { %v2188_v17 = vpop.permute.xlu2 %2187 }
0x1dd1   :  { %v2190_v50 = vmul.f32 %v2188_v17, %v2171_v52 }
0x1dd3   :  { %v3902_v61 = vsel %vm103_vm11, %v3650_v20, %v2190_v50  ;;  %v3908_v30 = vsel %vm103_vm11, %v2190_v50, %v3650_v20 }
0x1dd4   :  { %2715 = vtanh.f32 %v3902_v61 }
0x1dd5   :  { %2717 = vtanh.f32 %v3908_v30 }
0x1dda   :  { %v2716_v60 = vpop.eup %2715 }
0x1ddb   :  { %v2211_v5 = vmul.f32 %v2716_v60, %v3843_v54  ;;  %v2718_v44 = vpop.eup %2717  ;;  %v2351_v60 = vld [vmem:[%s4009_s8 + $0x38] sm:$0xff] }
0x1ddc   :  { %v2218_v29 = vmul.f32 %v2718_v44, %v3843_v54  ;;  %2367 = vmatpush.msrb.mxu0 %v2351_v60 }
0x1ddd   :  { %v2220_v7 = vsel %vm2219_vm4, %v2211_v5, 0.0  ;;  %v2350_v5 = vld [vmem:[%s4009_s8 + $0x30] sm:$0xff] }
0x1dde   :  { %2221 = vadd.xlane.f32.xlu0 %v2220_v7  ;;  %v2241_v11 = vsel %vm2219_vm4, %v2218_v29, 0.0  ;;  %2368 = vmatpush.msrb.mxu0 %v2350_v5 }
0x1de6   :  { %2242 = vadd.xlane.f32.xlu0 %v2241_v11  ;;  %v2349_v11 = vld [vmem:[%s4009_s8 + $0x28] sm:$0xff] }
0x1de7   :  { %2369 = vmatpush.msrb.mxu0 %v2349_v11  ;;  %v2510_v11 = vld [vmem:[%s4012_s11] ss:$0 sm:$0xff] }
0x1e12   :  { %v2228_v21 = vpop.xlane.xlu2 %2227 }
0x1e13   :  { %v2246_v0 = vsel %vm204_vm1, %v2228_v21, -inf }
0x1e1a   :  { %v2231_v45 = vpop.xlane.xlu2 %2230 }
0x1e1b   :  { %v2247_v53 = vsel %vm204_vm1, %v2231_v45, -inf }
0x1e22   :  { %v2240_v37 = vpop.xlane.xlu2 %2239 }
0x1e23   :  { %v2252_v46 = vsel %vm204_vm1, %v2240_v37, -inf }
0x1e24   :  { %v2253_v8 = vmax.f32 %v2246_v0, %v2252_v46  ;;  %v2346_v46 = vld [vmem:[%s4009_s8 + $0x10] sm:$0xff] }
0x1e51   :  { %v2222_v20 = vpop.xlane.xlu0 %2221 }
0x1e52   :  { %v2244_v40 = vsel %vm204_vm1, %v2222_v20, -inf }
0x1e53   :  { %v2249_v22 = vmax.f32 %v2244_v40, %v2248_v49  ;;  %v2347_v40 = vld [vmem:[%s4009_s8 + $0x18] sm:$0xff] }
0x1e55   :  { %v2256_v43 = vmax.f32 %v2249_v22, %v2251_v16 }
0x1e59   :  { %v2243_v54 = vpop.xlane.xlu0 %2242 }
0x1e5a   :  { %v2254_v6 = vsel %vm204_vm1, %v2243_v54, -inf }
0x1e5b   :  { %v2255_v59 = vmax.f32 %v2247_v53, %v2254_v6  ;;  %v2382_v53 = vld [vmem:[%s4011_s10 + $0x18] sm:$0xff]  ;;  %v2381_v6 = vld [vmem:[%s4011_s10 + $0x10] sm:$0xff] }
0x1e5c   :  { %2403 = vmatpush.msrb.mxu1 %v2382_v53 }
0x1e5d   :  { %v2257_v51 = vmax.f32 %v2253_v8, %v2255_v59  ;;  %v2380_v8 = vld [vmem:[%s4011_s10 + $0x8] sm:$0xff] }
0x1e5e   :  { %2404 = vmatpush.msrb.mxu1 %v2381_v6 }
0x1e5f   :  { %v2258_v62 = vmax.f32 %v2256_v43, %v2257_v51 }
0x1e60   :  { %2405 = vmatpush.msrb.mxu1 %v2380_v8 }
0x1e61   :  { %v2259_v18 = vsub.f32 %v2222_v20, %v2258_v62  ;;  %v2260_v25 = vsub.f32 %v2225_v63, %v2258_v62  ;;  %v2261_v13 = vsub.f32 %v2228_v21, %v2258_v62  ;;  %v2262_v26 = vsub.f32 %v2231_v45, %v2258_v62  ;;  %v2348_v45 = vld [vmem:[%s4009_s8 + $0x20] sm:$0xff] }
0x1e62   :  { %v2263_v36 = vsub.f32 %v2234_v33, %v2258_v62  ;;  %v2264_v12 = vsub.f32 %v2237_v3, %v2258_v62  ;;  %v2265_v35 = vsub.f32 %v2240_v37, %v2258_v62  ;;  %v2266_v56 = vsub.f32 %v2243_v54, %v2258_v62  ;;  %2370 = vmatpush.msrb.mxu0 %v2348_v45  ;;  %v2345_v54 = vld [vmem:[%s4009_s8 + $0x8] sm:$0xff] }
0x1e63   :  { %v2267_v2 = vmul.f32 1.442695, %v2259_v18  ;;  %v2269_v10 = vmul.f32 1.442695, %v2260_v25  ;;  %v2271_v41 = vmul.f32 1.442695, %v2261_v13 }
0x1e64   :  { %v2273_v28 = vmul.f32 1.442695, %v2262_v26  ;;  %v2275_v9 = vmul.f32 1.442695, %v2263_v36  ;;  %v2277_v23 = vmul.f32 1.442695, %v2264_v12  ;;  %2371 = vmatpush.msrb.mxu0 %v2347_v40 }
0x1e65   :  { %2719 = vpow2.f32 %v2267_v2  ;;  %v2279_v32 = vmul.f32 1.442695, %v2265_v35  ;;  %v2281_v14 = vmul.f32 1.442695, %v2266_v56 }
0x1e66   :  { %2721 = vpow2.f32 %v2269_v10  ;;  %2372 = vmatpush.msrb.mxu0 %v2346_v46 }
0x1e67   :  { %2723 = vpow2.f32 %v2271_v41 }
0x1e68   :  { %2725 = vpow2.f32 %v2273_v28  ;;  %2373 = vmatpush.msrb.mxu0 %v2345_v54 }
0x1e69   :  { %2727 = vpow2.f32 %v2275_v9 }
0x1e6a   :  { %2729 = vpow2.f32 %v2277_v23  ;;  %2374 = vmatpush.msrb.mxu0 %v2344_v42 }
0x1e6b   :  { %v3923_v15 = vpop.eup %2719  ;;  %2731 = vpow2.f32 %v2279_v32 }
0x1e6c   :  { %v3925_v39 = vpop.eup %2721  ;;  %v2283_v24 = vsel %vm204_vm1, %v3923_v15, 0.0  ;;  %2733 = vpow2.f32 %v2281_v14 }
0x1e6d   :  { %v2724_v1 = vpop.eup %2723  ;;  %v2284_v4 = vsel %vm204_vm1, %v3925_v39, 0.0 }
0x1e6e   :  { %v2726_v55 = vpop.eup %2725  ;;  %v2285_v57 = vadd.f32 %v2284_v4, %v2283_v24  ;;  %v2286_v47 = vsel %vm204_vm1, %v2724_v1, 0.0 }
0x1e6f   :  { %v2728_v52 = vpop.eup %2727  ;;  %v2288_v50 = vsel %vm204_vm1, %v2726_v55, 0.0 }
0x1e70   :  { %v2287_v17 = vadd.f32 %v2286_v47, %v2285_v57  ;;  %v2730_v7 = vpop.eup %2729  ;;  %v2290_v29 = vsel %vm204_vm1, %v2728_v52, 0.0 }
0x1e71   :  { %v2732_v21 = vpop.eup %2731  ;;  %v2292_v63 = vsel %vm204_vm1, %v2730_v7, 0.0 }
0x1e72   :  { %v2289_v44 = vadd.f32 %v2288_v50, %v2287_v17  ;;  %v2734_v20 = vpop.eup %2733  ;;  %v2294_v37 = vsel %vm204_vm1, %v2732_v21, 0.0 }
0x1e73   :  { %v2296_v58 = vsel %vm204_vm1, %v2734_v20, 0.0 }
0x1e74   :  { %v2291_v33 = vadd.f32 %v2290_v29, %v2289_v44 }
0x1e76   :  { %v2293_v3 = vadd.f32 %v2292_v63, %v2291_v33 }
0x1e78   :  { %v2295_v49 = vadd.f32 %v2294_v37, %v2293_v3 }
0x1e7a   :  { %v2297_v22 = vadd.f32 %v2296_v58, %v2295_v49 }
0x1e7c   :  { %2735 = vrcp.f32 %v2297_v22  ;;  %v2309_v43 = vand.u32 2147483648, %v2297_v22  ;;  %v2307_v62 = vand.u32 2147483647, %v2297_v22  ;;  %vm2303_vm11 = vweird.f32 %v2297_v22 }
0x1e7e   :  { %v2310_v25 = vor.u32 1.1754944e-38, %v2309_v43  ;;  %vm2308_vm9 = vcmp.eq.f32.partialorder %v2307_v62, 8.507059e+37 }
0x1e82   :  { %v2736_v0 = vpop.eup %2735 }
0x1e83   :  { %v2299_v16 = vmul.f32 %v2736_v0, %v2297_v22  ;;  %vm2304_vm1 = vweird.f32 %v2736_v0 }
0x1e84   :  { %vm2305_vm8 = vmor %vm2303_vm11, %vm2304_vm1 }
0x1e85   :  { %v2300_v59 = vsub.f32 1.0, %v2299_v16 }
0x1e87   :  { %v2301_v51 = vmul.f32 %v2736_v0, %v2300_v59 }
0x1e89   :  { %v2302_v18 = vadd.f32 %v2736_v0, %v2301_v51 }
0x1e8b   :  { %v2306_v13 = vsel %vm2305_vm8, %v2736_v0, %v2302_v18 }
0x1e8c   :  { %v2311_v26 = vsel %vm2308_vm9, %v2310_v25, %v2306_v13 }
0x1e8d   :  { %v2312_v36 = vmul.f32 %v3923_v15, %v2311_v26  ;;  %v2313_v2 = vmul.f32 %v3925_v39, %v2311_v26  ;;  %v2314_v10 = vmul.f32 %v2724_v1, %v2311_v26  ;;  %v2315_v41 = vmul.f32 %v2726_v55, %v2311_v26 }
0x1e8e   :  { %v2316_v12 = vmul.f32 %v2728_v52, %v2311_v26  ;;  %v2317_v56 = vmul.f32 %v2730_v7, %v2311_v26  ;;  %v2318_v15 = vmul.f32 %v2732_v21, %v2311_v26  ;;  %v2319_v55 = vmul.f32 %v2734_v20, %v2311_v26 }
0x1e8f   :  { %v2320_v28 = vmul.f32 %v2312_v36, %v3902_v61  ;;  %v2321_v35 = vmul.f32 %v2313_v2, %v3855_v48  ;;  %v2322_v9 = vmul.f32 %v2314_v10, %v3875_v19  ;;  %v2323_v23 = vmul.f32 %v2315_v41, %v3882_v27 }
0x1e90   :  { %v2324_v39 = vmul.f32 %v2316_v12, %v3837_v31  ;;  %v2325_v61 = vmul.f32 %v2317_v56, %v3862_v34  ;;  %v2326_v57 = vmul.f32 %v2318_v15, %v3890_v38  ;;  %v2327_v52 = vmul.f32 %v2319_v55, %v3908_v30  ;;  %v2379_v38 = vld [vmem:[%s4011_s10] sm:$0xff] }
0x1e91   :  { %v2328_v32 = vsel %vm2219_vm4, %v2320_v28, 0.0  ;;  %v2329_v14 = vsel %vm2219_vm4, %v2321_v35, 0.0  ;;  %v2331_v1 = vsel %vm2219_vm4, %v2322_v9, 0.0  ;;  %v2333_v48 = vsel %vm2219_vm4, %v2323_v23, 0.0  ;;  %2406 = vmatpush.msrb.mxu1 %v2379_v38  ;;  %v2509_v30 = vld [vmem:[%s4010_s9] ss:$0 sm:$0xff] }
0x1e92   :  { %v2330_v24 = vadd.f32 %v2329_v14, %v2328_v32  ;;  %v2335_v27 = vsel %vm2219_vm4, %v2324_v39, 0.0  ;;  %v2337_v17 = vsel %vm2219_vm4, %v2325_v61, 0.0  ;;  %v2339_v31 = vsel %vm2219_vm4, %v2326_v57, 0.0 }
0x1e93   :  { %v2341_v5 = vsel %vm2219_vm4, %v2327_v52, 0.0 }
0x1e94   :  { %v2332_v4 = vadd.f32 %v2331_v1, %v2330_v24 }
0x1e96   :  { %v2334_v19 = vadd.f32 %v2333_v48, %v2332_v4 }
0x1e98   :  { %v2336_v47 = vadd.f32 %v2335_v27, %v2334_v19 }
0x1e9a   :  { %v2338_v50 = vadd.f32 %v2337_v17, %v2336_v47 }
0x1e9c   :  { %v2340_v60 = vadd.f32 %v2339_v31, %v2338_v50 }
0x1e9e   :  { %v2342_v7 = vadd.f32 %v2341_v5, %v2340_v60 }
0x1ea0   :  { %v2343_v34 = vmax.f32 %v2342_v7, 0.0 }
0x1ea2   :  { %2499 = vmatmul.msk.f32.vlgmr.msrb.gmra.mxu0 %vm338_vm15, %v2343_v34  ;;  %vm2411_vm15 = vcmask 25600  }
0x1f1f   :  { %v2376_v44 = vpop.f32.mrf.mxu0 }
0x1f20   :  { %v2377_v29 = vadd.f32 %v2509_v30, %v2376_v44 }
0x1f22   :  { %2500 = vmatmul.msk.f32.vlgmr.msrb.gmra.mxu1 %vm2387_vm10, %v2377_v29 }
0x1f9f   :  { %v2408_v21 = vpop.f32.mrf.mxu1 }
0x1fa0   :  { %v2409_v33 = vadd.f32 %v2510_v11, %v2408_v21 }
0x1fa2   :  { %2412 = vst.msk [vmem:[#allocation7] sm:$0x3] %vm2411_vm15, %v2409_v33 }
0x1fa3   :  { %2423 = dma.vmem_to_hbm [thread:$0]  %s2419_s13, 32, %s2421_s4, [#allocation4]  }
0x1fa4   :  { %2813 = dma.done.wait [#allocation4], 32  }
0x1fa5   :  { %2814 = vsyncadd [#allocation4], 4294967264 }
0x1fa6   :  { %2428 = vsyncpa [#allocation3], 1 }
0x1fa7   :  { %2429 = vsyncpa [#allocation6], 1 }
0x1fa8   :  { %2430 = vsyncpa [#allocation4], 1 }

</bundles_post_ra>
